<compile_context>
chip_gen: v7x
topology: tpu7x:2x2x1
jax: 0.10.0
libtpu: 0.0.40
codegen_flags: <defaults>
</compile_context>

<pallas_src>
import functools

import jax
import jax.numpy as jnp
from jax.experimental import pallas as pl
from jax.experimental.pallas import tpu as pltpu


# ----------------------------- Pallas kernels ------------------------------


def _matmul_f32(a, w):
    """bf16 x bf16 -> f32.  Tiny-N (Cout == 1) falls back to a VPU/XLU reduce."""
    if w.shape[1] == 1:
        return jnp.sum(
            a.astype(jnp.float32) * w.astype(jnp.float32).T, axis=1, keepdims=True
        )
    return jnp.dot(a, w, preferred_element_type=jnp.float32)


def _activation(y, act):
    if act == "lrelu":
        return jnp.where(y > 0, y, 0.2 * y)
    if act == "sigmoid":
        return 1.0 / (1.0 + jnp.exp(-y))
    return y


def _conv_act_kernel(a_ref, w_ref, o_ref, *, act):
    # [tm, K] @ [K, Cout] -> activation -> [tm, Cout]
    y = _matmul_f32(a_ref[...], w_ref[...])
    o_ref[...] = _activation(y, act)


def _conv_bn_act_kernel(a_ref, w_ref, g_ref, b_ref, o_ref, *, act, eps):
    # [M, K] @ [K, Cout] -> BatchNorm (batch stats, biased var) -> activation.
    # All statistics in f32.
    y = _matmul_f32(a_ref[...], w_ref[...])
    mean = jnp.mean(y, axis=0, keepdims=True)
    var = jnp.mean(jnp.square(y - mean), axis=0, keepdims=True)
    y = (y - mean) * (g_ref[...] * jax.lax.rsqrt(var + eps)) + b_ref[...]
    o_ref[...] = _activation(y, act)


# --------------------------- fused conv block -------------------------------


def _conv_block(patches, w_mat, gamma, beta, *, act, use_bn):
    """patches [M, K] @ w_mat [K, Cout], fused BN/activation -> [M, Cout] f32."""
    M, K = patches.shape
    cout = w_mat.shape[1]

    a = patches.astype(jnp.bfloat16)
    w = w_mat.astype(jnp.bfloat16)

    cost = pl.CostEstimate(
        flops=2 * M * K * cout,
        transcendentals=(M * cout if act == "sigmoid" else 0),
        bytes_accessed=M * K * 2 + K * cout * 2 + M * cout * 4
        + (2 * cout * 4 if use_bn else 0),
    )

    if use_bn:
        g = gamma.reshape(1, cout).astype(jnp.float32)
        b = beta.reshape(1, cout).astype(jnp.float32)
        # Full-slab block: BN statistics need every row of M in one view.
        return pl.pallas_call(
            functools.partial(_conv_bn_act_kernel, act=act, eps=1e-5),
            out_shape=jax.ShapeDtypeStruct((M, cout), jnp.float32),
            grid=(1,),
            in_specs=[
                pl.BlockSpec((M, K), lambda i: (0, 0)),
                pl.BlockSpec((K, cout), lambda i: (0, 0)),
                pl.BlockSpec((1, cout), lambda i: (0, 0)),
                pl.BlockSpec((1, cout), lambda i: (0, 0)),
            ],
            out_specs=pl.BlockSpec((M, cout), lambda i: (0, 0)),
            compiler_params=pltpu.CompilerParams(
                dimension_semantics=("arbitrary",)),
            cost_estimate=cost,
        )(a, w, g, b)

    # No BN: tile M (multiple of 8) and mark the axis "parallel" (megacore).
    tm = M if M <= 512 else 512
    grid_m = pl.cdiv(M, tm)
    return pl.pallas_call(
        functools.partial(_conv_act_kernel, act=act),
        out_shape=jax.ShapeDtypeStruct((M, cout), jnp.float32),
        grid=(grid_m,),
        in_specs=[
            pl.BlockSpec((tm, K), lambda i: (i, 0)),
            pl.BlockSpec((K, cout), lambda i: (0, 0)),
        ],
        out_specs=pl.BlockSpec((tm, cout), lambda i: (i, 0)),
        compiler_params=pltpu.CompilerParams(
            dimension_semantics=("parallel",)),
        cost_estimate=cost,
    )(a, w)


# ------------------------------- JAX glue -----------------------------------


def _im2col_nhwc(x, kh, kw, stride, pad):
    """x: NHWC -> patches [N*Ho*Wo, kh*kw*C], K ordered (kh, kw, c)."""
    n, h, w, c = x.shape
    if pad:
        x = jnp.pad(x, ((0, 0), (pad, pad), (pad, pad), (0, 0)))
    ho = (h + 2 * pad - kh) // stride + 1
    wo = (w + 2 * pad - kw) // stride + 1
    cols = []
    for i in range(kh):
        for j in range(kw):
            cols.append(
                x[:, i : i + stride * (ho - 1) + 1 : stride,
                     j : j + stride * (wo - 1) + 1 : stride, :]
            )
    patches = jnp.stack(cols, axis=3)           # [N, Ho, Wo, kh*kw, C]
    return patches.reshape(n * ho * wo, kh * kw * c), (n, ho, wo)


def conv_layer(x_nhwc, w, gamma=None, beta=None, *, stride, pad, act, use_bn):
    """PyTorch Conv2d(cin, cout, kh, kw, stride, pad, bias=False) + BN + act.

    w: [Cout, Cin, Kh, Kw] (PyTorch layout).  x_nhwc: [N, H, W, Cin].
    Returns NHWC output [N, Ho, Wo, Cout] (f32).
    """
    cout, cin, kh, kw = w.shape
    patches, (n, ho, wo) = _im2col_nhwc(x_nhwc, kh, kw, stride, pad)
    # (kh, kw, cin) ordering on K to match the patch layout; no kernel flip
    # (Conv2d is cross-correlation).
    wm = jnp.transpose(w, (2, 3, 1, 0)).reshape(kh * kw * cin, cout)
    y = _conv_block(patches, wm, gamma, beta, act=act, use_bn=use_bn)
    return y.reshape(n, ho, wo, cout)


# ------------------------- Domain_Discriminator ------------------------------


def init_domain_discriminator_params(key, nc=3, ndf=8):
    ks = jax.random.split(key, 5)

    def conv_w(k, cout, cin):
        return 0.02 * jax.random.normal(k, (cout, cin, 4, 4), jnp.float32)

    def bn(ch):
        return jnp.ones((ch,), jnp.float32), jnp.zeros((ch,), jnp.float32)

    p = {}
    p["c1"] = conv_w(ks[0], ndf, nc * 2)
    p["c2"] = conv_w(ks[1], ndf * 2, ndf); p["bn2_g"], p["bn2_b"] = bn(ndf * 2)
    p["c3"] = conv_w(ks[2], ndf * 4, ndf * 2); p["bn3_g"], p["bn3_b"] = bn(ndf * 4)
    p["c4"] = conv_w(ks[3], ndf * 8, ndf * 4); p["bn4_g"], p["bn4_b"] = bn(ndf * 8)
    p["c5"] = conv_w(ks[4], 1, ndf * 8)
    return p


def domain_discriminator_forward(p, x_nchw):
    # matches `input_.float()`; single NCHW -> NHWC layout change, then NHWC
    # end-to-end (no per-layer transposes).
    x = jnp.transpose(x_nchw.astype(jnp.float32), (0, 2, 3, 1))
    x = conv_layer(x, p["c1"], stride=2, pad=1, act="lrelu", use_bn=False)
    x = conv_layer(x, p["c2"], p["bn2_g"], p["bn2_b"],
                   stride=2, pad=1, act="lrelu", use_bn=True)
    x = conv_layer(x, p["c3"], p["bn3_g"], p["bn3_b"],
                   stride=2, pad=1, act="lrelu", use_bn=True)
    x = conv_layer(x, p["c4"], p["bn4_g"], p["bn4_b"],
                   stride=2, pad=1, act="lrelu", use_bn=True)
    x = conv_layer(x, p["c5"], stride=1, pad=0, act="sigmoid", use_bn=False)
    # x: [N, Ho, Wo, 1]; PyTorch: output.view(-1, 1).squeeze(1)
    return x.reshape(-1)


if __name__ == "__main__":
    key = jax.random.PRNGKey(0)
    kx, kp = jax.random.split(key)

    nc, ndf = 3, 8
    # Discriminator input is the channel-concat of two nc-channel images; the
    # final 4x4/s1/p0 conv implies 64x64 spatial input (DCGAN-standard).
    x = jax.random.normal(kx, (2, nc * 2, 64, 64), jnp.float32)
    params = init_domain_discriminator_params(kp, nc=nc, ndf=ndf)

    out = jax.jit(domain_discriminator_forward)(params, x)
    out = jax.block_until_ready(out)

    assert out.shape == (2,), out.shape
    assert out.dtype == jnp.float32
    assert bool(jnp.all(jnp.isfinite(out)))
    assert bool(jnp.all((out >= 0.0) & (out <= 1.0)))  # sigmoid output range
    print("KERNEL_OK")
</pallas_src>

<mosaic_0001>
module attributes {stable_mosaic.version = 11 : i64} {
  func.func @_conv_act_kernel(%arg0: i32, %arg1: memref<512x96xbf16, #tpu.memory_space<vmem>>, %arg2: memref<96x8xbf16, #tpu.memory_space<vmem>>, %arg3: memref<512x8xf32, #tpu.memory_space<vmem>>) attributes {dimension_semantics = [#tpu.dimension_semantics<parallel>], iteration_bounds = array<i64: 4>, scalar_prefetch = 0 : i64, scratch_operands = 0 : i64, tpu.core_type = #tpu.core_type<tc>, window_params = [{transform_indices = @transform_0, window_bounds = array<i64: 512, 96>}, {pipeline_mode = #tpu.pipeline_mode<synchronous>, transform_indices = @transform_1, window_bounds = array<i64: 96, 8>}, {transform_indices = @transform_2, window_bounds = array<i64: 512, 8>}]} {
    %c0 = arith.constant 0 : index
    %c0_0 = arith.constant 0 : index
    %0 = vector.load %arg1[%c0, %c0_0] : memref<512x96xbf16, #tpu.memory_space<vmem>>, vector<512x96xbf16>
    %c0_1 = arith.constant 0 : index
    %c0_2 = arith.constant 0 : index
    %1 = vector.load %arg2[%c0_1, %c0_2] : memref<96x8xbf16, #tpu.memory_space<vmem>>, vector<96x8xbf16>
    %cst = arith.constant dense<0.000000e+00> : vector<512x8xf32>
    %2 = tpu.matmul %0, %1, %cst {dimension_numbers = #tpu.dot_dimension_numbers<[1], [0], [0], [1], [0, 0, 1, 1], [], []>} : vector<512x96xbf16>, vector<96x8xbf16>, vector<512x8xf32> -> vector<512x8xf32>
    %cst_3 = arith.constant 0.000000e+00 : f32
    %3 = vector.broadcast %cst_3 : f32 to vector<512x8xf32>
    %4 = arith.cmpf ogt, %2, %3 : vector<512x8xf32>
    %cst_4 = arith.constant 2.000000e-01 : f32
    %5 = vector.broadcast %cst_4 : f32 to vector<512x8xf32>
    %6 = arith.mulf %5, %2 : vector<512x8xf32>
    %7 = arith.select %4, %2, %6 : vector<512x8xi1>, vector<512x8xf32>
    %c0_5 = arith.constant 0 : index
    %c0_6 = arith.constant 0 : index
    %8 = vector.load %arg3[%c0_5, %c0_6] : memref<512x8xf32, #tpu.memory_space<vmem>>, vector<512x8xf32>
    tpu.vector_store %arg3[%c0_5, %c0_6], %7 {strides = array<i32>} : memref<512x8xf32, #tpu.memory_space<vmem>>, vector<512x8xf32>,
    return
  }
  func.func @transform_0(%arg0: i32) -> (i32, i32) {
    %c0_i32 = arith.constant 0 : i32
    %c0_i32_0 = arith.constant 0 : i32
    return %arg0, %c0_i32 : i32, i32
  }
  func.func @transform_1(%arg0: i32) -> (i32, i32) {
    %c0_i32 = arith.constant 0 : i32
    %c0_i32_0 = arith.constant 0 : i32
    %c0_i32_1 = arith.constant 0 : i32
    return %c0_i32, %c0_i32_0 : i32, i32
  }
  func.func @transform_2(%arg0: i32) -> (i32, i32) {
    %c0_i32 = arith.constant 0 : i32
    %c0_i32_0 = arith.constant 0 : i32
    return %arg0, %c0_i32 : i32, i32
  }
}

module attributes {stable_mosaic.version = 11 : i64} {
  func.func @_conv_bn_act_kernel(%arg0: i32, %arg1: memref<512x128xbf16, #tpu.memory_space<vmem>>, %arg2: memref<128x16xbf16, #tpu.memory_space<vmem>>, %arg3: memref<1x16xf32, #tpu.memory_space<vmem>>, %arg4: memref<1x16xf32, #tpu.memory_space<vmem>>, %arg5: memref<512x16xf32, #tpu.memory_space<vmem>>) attributes {dimension_semantics = [#tpu.dimension_semantics<arbitrary>], iteration_bounds = array<i64: 1>, scalar_prefetch = 0 : i64, scratch_operands = 0 : i64, tpu.core_type = #tpu.core_type<tc>, window_params = [{pipeline_mode = #tpu.pipeline_mode<synchronous>, transform_indices = @transform_0, window_bounds = array<i64: 512, 128>}, {pipeline_mode = #tpu.pipeline_mode<synchronous>, transform_indices = @transform_1, window_bounds = array<i64: 128, 16>}, {pipeline_mode = #tpu.pipeline_mode<synchronous>, transform_indices = @transform_2, window_bounds = array<i64: 1, 16>}, {pipeline_mode = #tpu.pipeline_mode<synchronous>, transform_indices = @transform_3, window_bounds = array<i64: 1, 16>}, {pipeline_mode = #tpu.pipeline_mode<synchronous>, transform_indices = @transform_4, window_bounds = array<i64: 512, 16>}]} {
    %c0 = arith.constant 0 : index
    %c0_0 = arith.constant 0 : index
    %0 = vector.load %arg1[%c0, %c0_0] : memref<512x128xbf16, #tpu.memory_space<vmem>>, vector<512x128xbf16>
    %c0_1 = arith.constant 0 : index
    %c0_2 = arith.constant 0 : index
    %1 = vector.load %arg2[%c0_1, %c0_2] : memref<128x16xbf16, #tpu.memory_space<vmem>>, vector<128x16xbf16>
    %cst = arith.constant dense<0.000000e+00> : vector<512x16xf32>
    %2 = tpu.matmul %0, %1, %cst {dimension_numbers = #tpu.dot_dimension_numbers<[1], [0], [0], [1], [0, 0, 1, 1], [], []>} : vector<512x128xbf16>, vector<128x16xbf16>, vector<512x16xf32> -> vector<512x16xf32>
    %cst_3 = arith.constant dense<0.000000e+00> : vector<16xf32>
    %3 = vector.multi_reduction <add>, %2, %cst_3 [0] : vector<512x16xf32> to vector<16xf32>
    %4 = vector.shape_cast %3 : vector<16xf32> to vector<1x16xf32>
    %cst_4 = arith.constant 5.120000e+02 : f32
    %5 = vector.broadcast %cst_4 : f32 to vector<1x16xf32>
    %6 = arith.divf %4, %5 : vector<1x16xf32>
    %7 = vector.broadcast %6 : vector<1x16xf32> to vector<512x16xf32>
    %8 = arith.subf %2, %7 : vector<512x16xf32>
    %9 = arith.mulf %8, %8 : vector<512x16xf32>
    %cst_5 = arith.constant dense<0.000000e+00> : vector<16xf32>
    %10 = vector.multi_reduction <add>, %9, %cst_5 [0] : vector<512x16xf32> to vector<16xf32>
    %11 = vector.shape_cast %10 : vector<16xf32> to vector<1x16xf32>
    %cst_6 = arith.constant 5.120000e+02 : f32
    %12 = vector.broadcast %cst_6 : f32 to vector<1x16xf32>
    %13 = arith.divf %11, %12 : vector<1x16xf32>
    %14 = vector.broadcast %6 : vector<1x16xf32> to vector<512x16xf32>
    %15 = arith.subf %2, %14 : vector<512x16xf32>
    %c0_7 = arith.constant 0 : index
    %c0_8 = arith.constant 0 : index
    %16 = vector.load %arg3[%c0_7, %c0_8] : memref<1x16xf32, #tpu.memory_space<vmem>>, vector<1x16xf32>
    %cst_9 = arith.constant 9.99999974E-6 : f32
    %17 = vector.broadcast %cst_9 : f32 to vector<1x16xf32>
    %18 = arith.addf %13, %17 : vector<1x16xf32>
    %19 = math.rsqrt %18 : vector<1x16xf32>
    %20 = arith.mulf %16, %19 : vector<1x16xf32>
    %21 = vector.broadcast %20 : vector<1x16xf32> to vector<512x16xf32>
    %22 = arith.mulf %15, %21 : vector<512x16xf32>
    %c0_10 = arith.constant 0 : index
    %c0_11 = arith.constant 0 : index
    %23 = vector.load %arg4[%c0_10, %c0_11] : memref<1x16xf32, #tpu.memory_space<vmem>>, vector<1x16xf32>
    %24 = vector.broadcast %23 : vector<1x16xf32> to vector<512x16xf32>
    %25 = arith.addf %22, %24 : vector<512x16xf32>
    %cst_12 = arith.constant 0.000000e+00 : f32
    %26 = vector.broadcast %cst_12 : f32 to vector<512x16xf32>
    %27 = arith.cmpf ogt, %25, %26 : vector<512x16xf32>
    %cst_13 = arith.constant 2.000000e-01 : f32
    %28 = vector.broadcast %cst_13 : f32 to vector<512x16xf32>
    %29 = arith.mulf %28, %25 : vector<512x16xf32>
    %30 = arith.select %27, %25, %29 : vector<512x16xi1>, vector<512x16xf32>
    %c0_14 = arith.constant 0 : index
    %c0_15 = arith.constant 0 : index
    %31 = vector.load %arg5[%c0_14, %c0_15] : memref<512x16xf32, #tpu.memory_space<vmem>>, vector<512x16xf32>
    tpu.vector_store %arg5[%c0_14, %c0_15], %30 {strides = array<i32>} : memref<512x16xf32, #tpu.memory_space<vmem>>, vector<512x16xf32>,
    return
  }
  func.func @transform_0(%arg0: i32) -> (i32, i32) {
    %c0_i32 = arith.constant 0 : i32
    %c0_i32_0 = arith.constant 0 : i32
    %c0_i32_1 = arith.constant 0 : i32
    return %c0_i32, %c0_i32_0 : i32, i32
  }
  func.func @transform_1(%arg0: i32) -> (i32, i32) {
    %c0_i32 = arith.constant 0 : i32
    %c0_i32_0 = arith.constant 0 : i32
    %c0_i32_1 = arith.constant 0 : i32
    return %c0_i32, %c0_i32_0 : i32, i32
  }
  func.func @transform_2(%arg0: i32) -> (i32, i32) {
    %c0_i32 = arith.constant 0 : i32
    %c0_i32_0 = arith.constant 0 : i32
    %c0_i32_1 = arith.constant 0 : i32
    return %c0_i32, %c0_i32_0 : i32, i32
  }
  func.func @transform_3(%arg0: i32) -> (i32, i32) {
    %c0_i32 = arith.constant 0 : i32
    %c0_i32_0 = arith.constant 0 : i32
    %c0_i32_1 = arith.constant 0 : i32
    return %c0_i32, %c0_i32_0 : i32, i32
  }
  func.func @transform_4(%arg0: i32) -> (i32, i32) {
    %c0_i32 = arith.constant 0 : i32
    %c0_i32_0 = arith.constant 0 : i32
    %c0_i32_1 = arith.constant 0 : i32
    return %c0_i32, %c0_i32_0 : i32, i32
  }
}

module attributes {stable_mosaic.version = 11 : i64} {
  func.func @_conv_bn_act_kernel(%arg0: i32, %arg1: memref<128x256xbf16, #tpu.memory_space<vmem>>, %arg2: memref<256x32xbf16, #tpu.memory_space<vmem>>, %arg3: memref<1x32xf32, #tpu.memory_space<vmem>>, %arg4: memref<1x32xf32, #tpu.memory_space<vmem>>, %arg5: memref<128x32xf32, #tpu.memory_space<vmem>>) attributes {dimension_semantics = [#tpu.dimension_semantics<arbitrary>], iteration_bounds = array<i64: 1>, scalar_prefetch = 0 : i64, scratch_operands = 0 : i64, tpu.core_type = #tpu.core_type<tc>, window_params = [{pipeline_mode = #tpu.pipeline_mode<synchronous>, transform_indices = @transform_0, window_bounds = array<i64: 128, 256>}, {pipeline_mode = #tpu.pipeline_mode<synchronous>, transform_indices = @transform_1, window_bounds = array<i64: 256, 32>}, {pipeline_mode = #tpu.pipeline_mode<synchronous>, transform_indices = @transform_2, window_bounds = array<i64: 1, 32>}, {pipeline_mode = #tpu.pipeline_mode<synchronous>, transform_indices = @transform_3, window_bounds = array<i64: 1, 32>}, {pipeline_mode = #tpu.pipeline_mode<synchronous>, transform_indices = @transform_4, window_bounds = array<i64: 128, 32>}]} {
    %c0 = arith.constant 0 : index
    %c0_0 = arith.constant 0 : index
    %0 = vector.load %arg1[%c0, %c0_0] : memref<128x256xbf16, #tpu.memory_space<vmem>>, vector<128x256xbf16>
    %c0_1 = arith.constant 0 : index
    %c0_2 = arith.constant 0 : index
    %1 = vector.load %arg2[%c0_1, %c0_2] : memref<256x32xbf16, #tpu.memory_space<vmem>>, vector<256x32xbf16>
    %cst = arith.constant dense<0.000000e+00> : vector<128x32xf32>
    %2 = tpu.matmul %0, %1, %cst {dimension_numbers = #tpu.dot_dimension_numbers<[1], [0], [0], [1], [0, 0, 1, 1], [], []>} : vector<128x256xbf16>, vector<256x32xbf16>, vector<128x32xf32> -> vector<128x32xf32>
    %cst_3 = arith.constant dense<0.000000e+00> : vector<32xf32>
    %3 = vector.multi_reduction <add>, %2, %cst_3 [0] : vector<128x32xf32> to vector<32xf32>
    %4 = vector.shape_cast %3 : vector<32xf32> to vector<1x32xf32>
    %cst_4 = arith.constant 1.280000e+02 : f32
    %5 = vector.broadcast %cst_4 : f32 to vector<1x32xf32>
    %6 = arith.divf %4, %5 : vector<1x32xf32>
    %7 = vector.broadcast %6 : vector<1x32xf32> to vector<128x32xf32>
    %8 = arith.subf %2, %7 : vector<128x32xf32>
    %9 = arith.mulf %8, %8 : vector<128x32xf32>
    %cst_5 = arith.constant dense<0.000000e+00> : vector<32xf32>
    %10 = vector.multi_reduction <add>, %9, %cst_5 [0] : vector<128x32xf32> to vector<32xf32>
    %11 = vector.shape_cast %10 : vector<32xf32> to vector<1x32xf32>
    %cst_6 = arith.constant 1.280000e+02 : f32
    %12 = vector.broadcast %cst_6 : f32 to vector<1x32xf32>
    %13 = arith.divf %11, %12 : vector<1x32xf32>
    %14 = vector.broadcast %6 : vector<1x32xf32> to vector<128x32xf32>
    %15 = arith.subf %2, %14 : vector<128x32xf32>
    %c0_7 = arith.constant 0 : index
    %c0_8 = arith.constant 0 : index
    %16 = vector.load %arg3[%c0_7, %c0_8] : memref<1x32xf32, #tpu.memory_space<vmem>>, vector<1x32xf32>
    %cst_9 = arith.constant 9.99999974E-6 : f32
    %17 = vector.broadcast %cst_9 : f32 to vector<1x32xf32>
    %18 = arith.addf %13, %17 : vector<1x32xf32>
    %19 = math.rsqrt %18 : vector<1x32xf32>
    %20 = arith.mulf %16, %19 : vector<1x32xf32>
    %21 = vector.broadcast %20 : vector<1x32xf32> to vector<128x32xf32>
    %22 = arith.mulf %15, %21 : vector<128x32xf32>
    %c0_10 = arith.constant 0 : index
    %c0_11 = arith.constant 0 : index
    %23 = vector.load %arg4[%c0_10, %c0_11] : memref<1x32xf32, #tpu.memory_space<vmem>>, vector<1x32xf32>
    %24 = vector.broadcast %23 : vector<1x32xf32> to vector<128x32xf32>
    %25 = arith.addf %22, %24 : vector<128x32xf32>
    %cst_12 = arith.constant 0.000000e+00 : f32
    %26 = vector.broadcast %cst_12 : f32 to vector<128x32xf32>
    %27 = arith.cmpf ogt, %25, %26 : vector<128x32xf32>
    %cst_13 = arith.constant 2.000000e-01 : f32
    %28 = vector.broadcast %cst_13 : f32 to vector<128x32xf32>
    %29 = arith.mulf %28, %25 : vector<128x32xf32>
    %30 = arith.select %27, %25, %29 : vector<128x32xi1>, vector<128x32xf32>
    %c0_14 = arith.constant 0 : index
    %c0_15 = arith.constant 0 : index
    %31 = vector.load %arg5[%c0_14, %c0_15] : memref<128x32xf32, #tpu.memory_space<vmem>>, vector<128x32xf32>
    tpu.vector_store %arg5[%c0_14, %c0_15], %30 {strides = array<i32>} : memref<128x32xf32, #tpu.memory_space<vmem>>, vector<128x32xf32>,
    return
  }
  func.func @transform_0(%arg0: i32) -> (i32, i32) {
    %c0_i32 = arith.constant 0 : i32
    %c0_i32_0 = arith.constant 0 : i32
    %c0_i32_1 = arith.constant 0 : i32
    return %c0_i32, %c0_i32_0 : i32, i32
  }
  func.func @transform_1(%arg0: i32) -> (i32, i32) {
    %c0_i32 = arith.constant 0 : i32
    %c0_i32_0 = arith.constant 0 : i32
    %c0_i32_1 = arith.constant 0 : i32
    return %c0_i32, %c0_i32_0 : i32, i32
  }
  func.func @transform_2(%arg0: i32) -> (i32, i32) {
    %c0_i32 = arith.constant 0 : i32
    %c0_i32_0 = arith.constant 0 : i32
    %c0_i32_1 = arith.constant 0 : i32
    return %c0_i32, %c0_i32_0 : i32, i32
  }
  func.func @transform_3(%arg0: i32) -> (i32, i32) {
    %c0_i32 = arith.constant 0 : i32
    %c0_i32_0 = arith.constant 0 : i32
    %c0_i32_1 = arith.constant 0 : i32
    return %c0_i32, %c0_i32_0 : i32, i32
  }
  func.func @transform_4(%arg0: i32) -> (i32, i32) {
    %c0_i32 = arith.constant 0 : i32
    %c0_i32_0 = arith.constant 0 : i32
    %c0_i32_1 = arith.constant 0 : i32
    return %c0_i32, %c0_i32_0 : i32, i32
  }
}

module attributes {stable_mosaic.version = 11 : i64} {
  func.func @_conv_bn_act_kernel(%arg0: i32, %arg1: memref<32x512xbf16, #tpu.memory_space<vmem>>, %arg2: memref<512x64xbf16, #tpu.memory_space<vmem>>, %arg3: memref<1x64xf32, #tpu.memory_space<vmem>>, %arg4: memref<1x64xf32, #tpu.memory_space<vmem>>, %arg5: memref<32x64xf32, #tpu.memory_space<vmem>>) attributes {dimension_semantics = [#tpu.dimension_semantics<arbitrary>], iteration_bounds = array<i64: 1>, scalar_prefetch = 0 : i64, scratch_operands = 0 : i64, tpu.core_type = #tpu.core_type<tc>, window_params = [{pipeline_mode = #tpu.pipeline_mode<synchronous>, transform_indices = @transform_0, window_bounds = array<i64: 32, 512>}, {pipeline_mode = #tpu.pipeline_mode<synchronous>, transform_indices = @transform_1, window_bounds = array<i64: 512, 64>}, {pipeline_mode = #tpu.pipeline_mode<synchronous>, transform_indices = @transform_2, window_bounds = array<i64: 1, 64>}, {pipeline_mode = #tpu.pipeline_mode<synchronous>, transform_indices = @transform_3, window_bounds = array<i64: 1, 64>}, {pipeline_mode = #tpu.pipeline_mode<synchronous>, transform_indices = @transform_4, window_bounds = array<i64: 32, 64>}]} {
    %c0 = arith.constant 0 : index
    %c0_0 = arith.constant 0 : index
    %0 = vector.load %arg1[%c0, %c0_0] : memref<32x512xbf16, #tpu.memory_space<vmem>>, vector<32x512xbf16>
    %c0_1 = arith.constant 0 : index
    %c0_2 = arith.constant 0 : index
    %1 = vector.load %arg2[%c0_1, %c0_2] : memref<512x64xbf16, #tpu.memory_space<vmem>>, vector<512x64xbf16>
    %cst = arith.constant dense<0.000000e+00> : vector<32x64xf32>
    %2 = tpu.matmul %0, %1, %cst {dimension_numbers = #tpu.dot_dimension_numbers<[1], [0], [0], [1], [0, 0, 1, 1], [], []>} : vector<32x512xbf16>, vector<512x64xbf16>, vector<32x64xf32> -> vector<32x64xf32>
    %cst_3 = arith.constant dense<0.000000e+00> : vector<64xf32>
    %3 = vector.multi_reduction <add>, %2, %cst_3 [0] : vector<32x64xf32> to vector<64xf32>
    %4 = vector.shape_cast %3 : vector<64xf32> to vector<1x64xf32>
    %cst_4 = arith.constant 3.200000e+01 : f32
    %5 = vector.broadcast %cst_4 : f32 to vector<1x64xf32>
    %6 = arith.divf %4, %5 : vector<1x64xf32>
    %7 = vector.broadcast %6 : vector<1x64xf32> to vector<32x64xf32>
    %8 = arith.subf %2, %7 : vector<32x64xf32>
    %9 = arith.mulf %8, %8 : vector<32x64xf32>
    %cst_5 = arith.constant dense<0.000000e+00> : vector<64xf32>
    %10 = vector.multi_reduction <add>, %9, %cst_5 [0] : vector<32x64xf32> to vector<64xf32>
    %11 = vector.shape_cast %10 : vector<64xf32> to vector<1x64xf32>
    %cst_6 = arith.constant 3.200000e+01 : f32
    %12 = vector.broadcast %cst_6 : f32 to vector<1x64xf32>
    %13 = arith.divf %11, %12 : vector<1x64xf32>
    %14 = vector.broadcast %6 : vector<1x64xf32> to vector<32x64xf32>
    %15 = arith.subf %2, %14 : vector<32x64xf32>
    %c0_7 = arith.constant 0 : index
    %c0_8 = arith.constant 0 : index
    %16 = vector.load %arg3[%c0_7, %c0_8] : memref<1x64xf32, #tpu.memory_space<vmem>>, vector<1x64xf32>
    %cst_9 = arith.constant 9.99999974E-6 : f32
    %17 = vector.broadcast %cst_9 : f32 to vector<1x64xf32>
    %18 = arith.addf %13, %17 : vector<1x64xf32>
    %19 = math.rsqrt %18 : vector<1x64xf32>
    %20 = arith.mulf %16, %19 : vector<1x64xf32>
    %21 = vector.broadcast %20 : vector<1x64xf32> to vector<32x64xf32>
    %22 = arith.mulf %15, %21 : vector<32x64xf32>
    %c0_10 = arith.constant 0 : index
    %c0_11 = arith.constant 0 : index
    %23 = vector.load %arg4[%c0_10, %c0_11] : memref<1x64xf32, #tpu.memory_space<vmem>>, vector<1x64xf32>
    %24 = vector.broadcast %23 : vector<1x64xf32> to vector<32x64xf32>
    %25 = arith.addf %22, %24 : vector<32x64xf32>
    %cst_12 = arith.constant 0.000000e+00 : f32
    %26 = vector.broadcast %cst_12 : f32 to vector<32x64xf32>
    %27 = arith.cmpf ogt, %25, %26 : vector<32x64xf32>
    %cst_13 = arith.constant 2.000000e-01 : f32
    %28 = vector.broadcast %cst_13 : f32 to vector<32x64xf32>
    %29 = arith.mulf %28, %25 : vector<32x64xf32>
    %30 = arith.select %27, %25, %29 : vector<32x64xi1>, vector<32x64xf32>
    %c0_14 = arith.constant 0 : index
    %c0_15 = arith.constant 0 : index
    %31 = vector.load %arg5[%c0_14, %c0_15] : memref<32x64xf32, #tpu.memory_space<vmem>>, vector<32x64xf32>
    tpu.vector_store %arg5[%c0_14, %c0_15], %30 {strides = array<i32>} : memref<32x64xf32, #tpu.memory_space<vmem>>, vector<32x64xf32>,
    return
  }
  func.func @transform_0(%arg0: i32) -> (i32, i32) {
    %c0_i32 = arith.constant 0 : i32
    %c0_i32_0 = arith.constant 0 : i32
    %c0_i32_1 = arith.constant 0 : i32
    return %c0_i32, %c0_i32_0 : i32, i32
  }
  func.func @transform_1(%arg0: i32) -> (i32, i32) {
    %c0_i32 = arith.constant 0 : i32
    %c0_i32_0 = arith.constant 0 : i32
    %c0_i32_1 = arith.constant 0 : i32
    return %c0_i32, %c0_i32_0 : i32, i32
  }
  func.func @transform_2(%arg0: i32) -> (i32, i32) {
    %c0_i32 = arith.constant 0 : i32
    %c0_i32_0 = arith.constant 0 : i32
    %c0_i32_1 = arith.constant 0 : i32
    return %c0_i32, %c0_i32_0 : i32, i32
  }
  func.func @transform_3(%arg0: i32) -> (i32, i32) {
    %c0_i32 = arith.constant 0 : i32
    %c0_i32_0 = arith.constant 0 : i32
    %c0_i32_1 = arith.constant 0 : i32
    return %c0_i32, %c0_i32_0 : i32, i32
  }
  func.func @transform_4(%arg0: i32) -> (i32, i32) {
    %c0_i32 = arith.constant 0 : i32
    %c0_i32_0 = arith.constant 0 : i32
    %c0_i32_1 = arith.constant 0 : i32
    return %c0_i32, %c0_i32_0 : i32, i32
  }
}

module attributes {stable_mosaic.version = 11 : i64} {
  func.func @_conv_act_kernel(%arg0: i32, %arg1: memref<2x1024xbf16, #tpu.memory_space<vmem>>, %arg2: memref<1024x1xbf16, #tpu.memory_space<vmem>>, %arg3: memref<2x1xf32, #tpu.memory_space<vmem>>) attributes {dimension_semantics = [#tpu.dimension_semantics<parallel>], iteration_bounds = array<i64: 1>, scalar_prefetch = 0 : i64, scratch_operands = 0 : i64, tpu.core_type = #tpu.core_type<tc>, window_params = [{transform_indices = @transform_0, window_bounds = array<i64: 2, 1024>}, {pipeline_mode = #tpu.pipeline_mode<synchronous>, transform_indices = @transform_1, window_bounds = array<i64: 1024, 1>}, {transform_indices = @transform_2, window_bounds = array<i64: 2, 1>}]} {
    %c0 = arith.constant 0 : index
    %c0_0 = arith.constant 0 : index
    %0 = vector.load %arg1[%c0, %c0_0] : memref<2x1024xbf16, #tpu.memory_space<vmem>>, vector<2x1024xbf16>
    %c0_1 = arith.constant 0 : index
    %c0_2 = arith.constant 0 : index
    %1 = vector.load %arg2[%c0_1, %c0_2] : memref<1024x1xbf16, #tpu.memory_space<vmem>>, vector<1024x1xbf16>
    %2 = arith.extf %0 : vector<2x1024xbf16> to vector<2x1024xf32>
    %3 = arith.extf %1 : vector<1024x1xbf16> to vector<1024x1xf32>
    %4 = tpu.transpose %3, [1, 0] : vector<1024x1xf32> -> vector<1x1024xf32>
    %5 = vector.broadcast %4 : vector<1x1024xf32> to vector<2x1024xf32>
    %6 = arith.mulf %2, %5 : vector<2x1024xf32>
    %cst = arith.constant dense<0.000000e+00> : vector<2xf32>
    %7 = vector.multi_reduction <add>, %6, %cst [1] : vector<2x1024xf32> to vector<2xf32>
    %8 = vector.shape_cast %7 : vector<2xf32> to vector<2x1xf32>
    %cst_3 = arith.constant 0.000000e+00 : f32
    %9 = vector.broadcast %cst_3 : f32 to vector<2x1xf32>
    %10 = arith.subf %9, %8 : vector<2x1xf32>
    %11 = math.exp %10 : vector<2x1xf32>
    %cst_4 = arith.constant 1.000000e+00 : f32
    %12 = vector.broadcast %cst_4 : f32 to vector<2x1xf32>
    %13 = arith.addf %12, %11 : vector<2x1xf32>
    %cst_5 = arith.constant 1.000000e+00 : f32
    %14 = vector.broadcast %cst_5 : f32 to vector<2x1xf32>
    %15 = arith.divf %14, %13 : vector<2x1xf32>
    %c0_6 = arith.constant 0 : index
    %c0_7 = arith.constant 0 : index
    %16 = vector.load %arg3[%c0_6, %c0_7] : memref<2x1xf32, #tpu.memory_space<vmem>>, vector<2x1xf32>
    tpu.vector_store %arg3[%c0_6, %c0_7], %15 {strides = array<i32>} : memref<2x1xf32, #tpu.memory_space<vmem>>, vector<2x1xf32>,
    return
  }
  func.func @transform_0(%arg0: i32) -> (i32, i32) {
    %c0_i32 = arith.constant 0 : i32
    %c0_i32_0 = arith.constant 0 : i32
    return %arg0, %c0_i32 : i32, i32
  }
  func.func @transform_1(%arg0: i32) -> (i32, i32) {
    %c0_i32 = arith.constant 0 : i32
    %c0_i32_0 = arith.constant 0 : i32
    %c0_i32_1 = arith.constant 0 : i32
    return %c0_i32, %c0_i32_0 : i32, i32
  }
  func.func @transform_2(%arg0: i32) -> (i32, i32) {
    %c0_i32 = arith.constant 0 : i32
    %c0_i32_0 = arith.constant 0 : i32
    return %arg0, %c0_i32 : i32, i32
  }
}

</mosaic_0001>

<bundles_post_ra>
// kernel: domain_discriminator_forward.5
= control target key start
LH: loop header
LB: loop body
LE: loop exit
PB: predicated region body
PF: predicated region fallthrough
CT: control target
= control target key end

     0   :  { %s1395_s9 = smov 0   ;;  %s1630_s0 = inlined_call_operand.vmem [shape: bf16[2048,96], index: 0, kind: input, shape index: {}]   ;;  %s1631_s1 = inlined_call_operand.vmem [shape: bf16[96,8], index: 1, kind: input, shape index: {}]   ;;  %s1632_s2 = inlined_call_operand.vmem [shape: f32[2048,8], index: 2, kind: output, shape index: {}]  }
   0x1 LB: > { %s1119_s10 = sadd.s32 4294967295, %s1378_s9   ;;  %p1123_p0 = scmp.ge.s32.totalorder %s1378_s9, 1  ;;  %s1378_s9 = sphi %s1395_s9, %s12_s9  }
   0x2   : > { %p113_p1 = scmp.lt.s32.totalorder %s1378_s9, 5 }
   0x4   : > { %p114_p2 = pnand %p1123_p0, %p113_p1 }
   0x5   : > { %v1334_v0 = vld [vmem:[%s1631_s1] sm:$0xff] (!%p114_p2)   ;;  %s1124_s13 = sshll.u32 (!%p114_p2), %s1119_s10, 6  ;;  %v1335_v1 = vld [vmem:[%s1631_s1 + $0x8] sm:$0xff] (!%p114_p2)   ;;  %v1336_v2 = vld [vmem:[%s1631_s1 + $0x10] sm:$0xff] (!%p114_p2)   ;;  %vm420_vm0 = vcmask (!%p114_p2), 785408   ;;  %vm998_vm1 = vcmask (!%p114_p2), 64512  }
   0x6   : > { %117 = sbr.rel (%p114_p2) target bundleno = 308 (0x134), region = 28  ;;  %p136_p3 = scmp.lt.s32.totalorder (!%p114_p2), %s1124_s13, 255  ;;  %1238 = vmatprep.subr.bf16.mxu0 (!%p114_p2), %v1334_v0  ;;  %1314 = vmatprep.subr.bf16.mxu1 (!%p114_p2), %v1334_v0  ;;  %v1337_v3 = vld [vmem:[%s1631_s1 + $0x18] sm:$0xff] (!%p114_p2)   ;;  %v1338_v6 = vld [vmem:[%s1631_s1 + $0x20] sm:$0xff] (!%p114_p2)   ;;  %v1339_v7 = vld [vmem:[%s1631_s1 + $0x28] sm:$0xff] (!%p114_p2)  }
   0x7   : > { %1239 = vmatpush3.bf16.msra.mxu0 (!%p114_p2), %v1334_v0  ;;  %1320 = vmatpush3.bf16.msra.mxu1 (!%p114_p2), %v1334_v0 }
   0x8   : > { %1240 = vmatprep.subr.bf16.mxu0 (!%p114_p2), %v1335_v1  ;;  %1315 = vmatprep.subr.bf16.mxu1 (!%p114_p2), %v1335_v1 }
   0xb   : > { %1241 = vmatpush3.bf16.msra.mxu0 (!%p114_p2), %v1335_v1  ;;  %1321 = vmatpush3.bf16.msra.mxu1 (!%p114_p2), %v1335_v1 }
   0xc   : > { %1242 = vmatprep.subr.bf16.mxu0 (!%p114_p2), %v1336_v2  ;;  %1316 = vmatprep.subr.bf16.mxu1 (!%p114_p2), %v1336_v2 }
   0xd   : > { %s1634_s13 = smov (!%p136_p3, %s1124_s13), 255 }
   0xe   : > { %s1125_s18 = sshll.u32 %s1634_s13, 2  ;;  %s1127_s28 = sshll.u32 %s1634_s13, 3 }
   0xf   : > { %s1421_s23 = scalar_lea.vmem %s1630_s0, %s1125_s18  ;;  %1243 = vmatpush3.bf16.msra.mxu0 %v1336_v2  ;;  %1322 = vmatpush3.bf16.msra.mxu1 %v1336_v2  ;;  %s1497_s3 = scalar_lea.vmem %s1632_s2, %s1127_s28 }
  0x10   : > { %v1340_v4 = vld [vmem:[%s1421_s23] sm:$0xff]   ;;  %1244 = vmatprep.subr.bf16.mxu0 %v1337_v3  ;;  %1317 = vmatprep.subr.bf16.mxu1 %v1337_v3  ;;  %v1342_v8 = vld [vmem:[%s1421_s23 + $0x8] sm:$0xff]   ;;  %v1344_v10 = vld [vmem:[%s1421_s23 + $0x10] sm:$0xff]  }
  0x11   : > { %v1341_v5 = vld [vmem:[%s1421_s23 + $0x80] sm:$0xff]   ;;  %1250 = vmatprep.mubr.msk.bf16.mxu0 %vm420_vm0, %v1340_v4  ;;  %v1343_v9 = vld [vmem:[%s1421_s23 + $0x88] sm:$0xff]   ;;  %v1345_v11 = vld [vmem:[%s1421_s23 + $0x90] sm:$0xff]  }
  0x12   : > { %1282 = vmatprep.mubr.msk.bf16.mxu1 %vm420_vm0, %v1341_v5  ;;  %v1346_v12 = vld [vmem:[%s1421_s23 + $0x18] sm:$0xff]   ;;  %v1348_v14 = vld [vmem:[%s1421_s23 + $0x20] sm:$0xff]   ;;  %v1350_v16 = vld [vmem:[%s1421_s23 + $0x28] sm:$0xff]  }
  0x13   : > { %1245 = vmatpush3.bf16.msra.mxu0 %v1337_v3  ;;  %1323 = vmatpush3.bf16.msra.mxu1 %v1337_v3  ;;  %v1347_v13 = vld [vmem:[%s1421_s23 + $0x98] sm:$0xff]   ;;  %v1349_v15 = vld [vmem:[%s1421_s23 + $0xa0] sm:$0xff]   ;;  %v1351_v17 = vld [vmem:[%s1421_s23 + $0xa8] sm:$0xff]  }
  0x14   : > { %1246 = vmatprep.subr.bf16.mxu0 %v1338_v6  ;;  %1318 = vmatprep.subr.bf16.mxu1 %v1338_v6  ;;  %v1352_v18 = vld [vmem:[%s1421_s23 + $0x30] sm:$0xff]   ;;  %v1354_v20 = vld [vmem:[%s1421_s23 + $0x38] sm:$0xff]   ;;  %v1356_v22 = vld [vmem:[%s1421_s23 + $0x40] sm:$0xff]  }
  0x15   : > { %v1353_v19 = vld [vmem:[%s1421_s23 + $0xb0] sm:$0xff]   ;;  %v1355_v21 = vld [vmem:[%s1421_s23 + $0xb8] sm:$0xff]   ;;  %v1357_v23 = vld [vmem:[%s1421_s23 + $0xc0] sm:$0xff]  }
  0x16   : > { %v1358_v24 = vld [vmem:[%s1421_s23 + $0x48] sm:$0xff]   ;;  %v1360_v26 = vld [vmem:[%s1421_s23 + $0x50] sm:$0xff]   ;;  %v1362_v28 = vld [vmem:[%s1421_s23 + $0x58] sm:$0xff]  }
  0x17   : > { %1247 = vmatpush3.bf16.msra.mxu0 %v1338_v6  ;;  %1324 = vmatpush3.bf16.msra.mxu1 %v1338_v6  ;;  %v1359_v25 = vld [vmem:[%s1421_s23 + $0xc8] sm:$0xff]   ;;  %v1361_v27 = vld [vmem:[%s1421_s23 + $0xd0] sm:$0xff]   ;;  %v1363_v29 = vld [vmem:[%s1421_s23 + $0xd8] sm:$0xff]  }
  0x18   : > { %1248 = vmatprep.subr.bf16.mxu0 %v1339_v7  ;;  %1319 = vmatprep.subr.bf16.mxu1 %v1339_v7  ;;  %v1364_v30 = vld [vmem:[%s1421_s23 + $0x60] sm:$0xff]   ;;  %v1366_v32 = vld [vmem:[%s1421_s23 + $0x68] sm:$0xff]   ;;  %v1368_v34 = vld [vmem:[%s1421_s23 + $0x70] sm:$0xff]  }
  0x19   : > { %v1365_v31 = vld [vmem:[%s1421_s23 + $0xe0] sm:$0xff]   ;;  %v1367_v33 = vld [vmem:[%s1421_s23 + $0xe8] sm:$0xff]   ;;  %v1369_v35 = vld [vmem:[%s1421_s23 + $0xf0] sm:$0xff]  }
  0x1a   : > { %v1370_v36 = vld [vmem:[%s1421_s23 + $0x78] sm:$0xff]  }
  0x1b   : > { %1249 = vmatpush3.bf16.msra.mxu0 %v1339_v7  ;;  %1325 = vmatpush3.bf16.msra.mxu1 %v1339_v7  ;;  %v1371_v37 = vld [vmem:[%s1421_s23 + $0xf8] sm:$0xff]  }
  0x1e   : > { %1251 = vmatmul.mubr.msk.bf16.vlgmr.msra.gmra.mrb[0].mxu0 %vm420_vm0, %v1342_v8  ;;  %1283 = vmatmul.mubr.msk.bf16.vlgmr.msra.gmra.mrb[0].mxu1 %vm420_vm0, %v1343_v9 }
  0x1f   : > { %1254 = vmatprep.mubr.msk.bf16.mxu0 %vm420_vm0, %v1344_v10  ;;  %1286 = vmatprep.mubr.msk.bf16.mxu1 %vm420_vm0, %v1345_v11 }
  0x26   : > { %1255 = vmatmul.mubr.msk.bf16.gmra.mrb[4].mxu0 %vm420_vm0, %v1346_v12  ;;  %1287 = vmatmul.mubr.msk.bf16.gmra.mrb[4].mxu1 %vm420_vm0, %v1347_v13 }
  0x27   : > { %1258 = vmatprep.mubr.msk.bf16.mxu0 %vm420_vm0, %v1348_v14  ;;  %1290 = vmatprep.mubr.msk.bf16.mxu1 %vm420_vm0, %v1349_v15 }
  0x2e   : > { %1259 = vmatmul.mubr.msk.bf16.gmra.mrb[8].mxu0 %vm420_vm0, %v1350_v16  ;;  %1291 = vmatmul.mubr.msk.bf16.gmra.mrb[8].mxu1 %vm420_vm0, %v1351_v17 }
  0x2f   : > { %1262 = vmatprep.mubr.msk.bf16.mxu0 %vm420_vm0, %v1352_v18  ;;  %1294 = vmatprep.mubr.msk.bf16.mxu1 %vm420_vm0, %v1353_v19 }
  0x36   : > { %1263 = vmatmul.mubr.msk.bf16.gmra.mrb[12].mxu0 %vm420_vm0, %v1354_v20  ;;  %1295 = vmatmul.mubr.msk.bf16.gmra.mrb[12].mxu1 %vm420_vm0, %v1355_v21 }
  0x37   : > { %1266 = vmatprep.mubr.msk.bf16.mxu0 %vm420_vm0, %v1356_v22  ;;  %1298 = vmatprep.mubr.msk.bf16.mxu1 %vm420_vm0, %v1357_v23 }
  0x3e   : > { %1267 = vmatmul.mubr.msk.bf16.gmra.mrb[16].mxu0 %vm420_vm0, %v1358_v24  ;;  %1299 = vmatmul.mubr.msk.bf16.gmra.mrb[16].mxu1 %vm420_vm0, %v1359_v25 }
  0x3f   : > { %1270 = vmatprep.mubr.msk.bf16.mxu0 %vm420_vm0, %v1360_v26  ;;  %1302 = vmatprep.mubr.msk.bf16.mxu1 %vm420_vm0, %v1361_v27 }
  0x46   : > { %1271 = vmatmul.mubr.msk.bf16.gmra.mrb[20].mxu0 %vm420_vm0, %v1362_v28  ;;  %1303 = vmatmul.mubr.msk.bf16.gmra.mrb[20].mxu1 %vm420_vm0, %v1363_v29 }
  0x47   : > { %1274 = vmatprep.mubr.msk.bf16.mxu0 %vm420_vm0, %v1364_v30  ;;  %1306 = vmatprep.mubr.msk.bf16.mxu1 %vm420_vm0, %v1365_v31 }
  0x4e   : > { %1275 = vmatmul.mubr.msk.bf16.gmra.mrb[24].mxu0 %vm420_vm0, %v1366_v32  ;;  %1307 = vmatmul.mubr.msk.bf16.gmra.mrb[24].mxu1 %vm420_vm0, %v1367_v33 }
  0x4f   : > { %1278 = vmatprep.mubr.msk.bf16.mxu0 %vm420_vm0, %v1368_v34  ;;  %1310 = vmatprep.mubr.msk.bf16.mxu1 %vm420_vm0, %v1369_v35 }
  0x56   : > { %1279 = vmatmul.mubr.msk.bf16.gmra.mrb[28].mxu0 %vm420_vm0, %v1370_v36  ;;  %1311 = vmatmul.mubr.msk.bf16.gmra.mrb[28].mxu1 %vm420_vm0, %v1371_v37 }
  0xf1   : > { %v1252_v38 = vpop.f32.mrb[0].mxu0  ;;  %v1284_v39 = vpop.f32.mrb[0].mxu1 }
  0xf2   : > { %vm808_vm2 = vcmp.gt.f32.partialorder %v1252_v38, 0.0  ;;  %v872_v40 = vmul.f32 0.2, %v1252_v38  ;;  %vm840_vm3 = vcmp.gt.f32.partialorder %v1284_v39, 0.0  ;;  %v904_v41 = vmul.f32 0.2, %v1284_v39 }
  0xf3   : > { %v551_v42 = vpop.f32.mrb[1].mxu0  ;;  %v679_v43 = vpop.f32.mrb[1].mxu1 }
  0xf4   : > { %v936_v44 = vsel %vm808_vm2, %v1252_v38, %v872_v40  ;;  %v968_v45 = vsel %vm840_vm3, %v1284_v39, %v904_v41  ;;  %vm806_vm4 = vcmp.gt.f32.partialorder %v551_v42, 0.0  ;;  %v870_v46 = vmul.f32 0.2, %v551_v42  ;;  %v1253_v47 = vpop.f32.mrb[2].mxu0  ;;  %v1285_v48 = vpop.f32.mrb[2].mxu1 }
  0xf5   : > { %1001 = vst.msk [vmem:[%s1497_s3 + $0x10] sm:$0xff] %vm998_vm1, %v936_v44  ;;  %1033 = vst.msk [vmem:[%s1497_s3 + $0x110] sm:$0xff] %vm998_vm1, %v968_v45  ;;  %vm838_vm5 = vcmp.gt.f32.partialorder %v679_v43, 0.0  ;;  %v902_v49 = vmul.f32 0.2, %v679_v43  ;;  %vm809_vm6 = vcmp.gt.f32.partialorder %v1253_v47, 0.0 }
  0xf6   : > { %v873_v50 = vmul.f32 0.2, %v1253_v47  ;;  %v934_v51 = vsel %vm806_vm4, %v551_v42, %v870_v46  ;;  %vm841_vm7 = vcmp.gt.f32.partialorder %v1285_v48, 0.0  ;;  %v905_v52 = vmul.f32 0.2, %v1285_v48  ;;  %v554_v53 = vpop.f32.mrb[3].mxu0 }
  0xf7   : > { %v682_v54 = vpop.f32.mrb[3].mxu1  ;;  %999 = vst.msk [vmem:[%s1497_s3] sm:$0xff] %vm998_vm1, %v934_v51  ;;  %v966_v55 = vsel %vm838_vm5, %v679_v43, %v902_v49  ;;  %vm807_vm8 = vcmp.gt.f32.partialorder %v554_v53, 0.0  ;;  %v871_v57 = vmul.f32 0.2, %v554_v53 }
  0xf8   : > { %v937_v56 = vsel %vm809_vm6, %v1253_v47, %v873_v50  ;;  %1031 = vst.msk [vmem:[%s1497_s3 + $0x100] sm:$0xff] %vm998_vm1, %v966_v55  ;;  %v969_v58 = vsel %vm841_vm7, %v1285_v48, %v905_v52  ;;  %vm839_vm9 = vcmp.gt.f32.partialorder %v682_v54, 0.0  ;;  %v903_v59 = vmul.f32 0.2, %v682_v54 }
  0xf9   : > { %1002 = vst.msk [vmem:[%s1497_s3 + $0x18] sm:$0xff] %vm998_vm1, %v937_v56  ;;  %1034 = vst.msk [vmem:[%s1497_s3 + $0x118] sm:$0xff] %vm998_vm1, %v969_v58  ;;  %v935_v60 = vsel %vm807_vm8, %v554_v53, %v871_v57  ;;  %v1256_v61 = vpop.f32.mrb[4].mxu0  ;;  %v1288_v62 = vpop.f32.mrb[4].mxu1 }
  0xfa   : > { %1000 = vst.msk [vmem:[%s1497_s3 + $0x8] sm:$0xff] %vm998_vm1, %v935_v60  ;;  %v967_v63 = vsel %vm839_vm9, %v682_v54, %v903_v59  ;;  %vm812_vm10 = vcmp.gt.f32.partialorder %v1256_v61, 0.0  ;;  %v876_v0 = vmul.f32 0.2, %v1256_v61  ;;  %vm844_vm11 = vcmp.gt.f32.partialorder %v1288_v62, 0.0  ;;  %v567_v1 = vpop.f32.mrb[5].mxu0 }
  0xfb   : > { %v695_v2 = vpop.f32.mrb[5].mxu1  ;;  %1032 = vst.msk [vmem:[%s1497_s3 + $0x108] sm:$0xff] %vm998_vm1, %v967_v63  ;;  %v908_v3 = vmul.f32 0.2, %v1288_v62  ;;  %vm810_vm12 = vcmp.gt.f32.partialorder %v567_v1, 0.0  ;;  %v1257_v7 = vpop.f32.mrb[6].mxu0 }
  0xfc   : > { %v874_v4 = vmul.f32 0.2, %v567_v1  ;;  %vm842_vm13 = vcmp.gt.f32.partialorder %v695_v2, 0.0  ;;  %v940_v5 = vsel %vm812_vm10, %v1256_v61, %v876_v0  ;;  %v906_v6 = vmul.f32 0.2, %v695_v2  ;;  %v1289_v8 = vpop.f32.mrb[6].mxu1 }
  0xfd   : > { %1005 = vst.msk [vmem:[%s1497_s3 + $0x30] sm:$0xff] %vm998_vm1, %v940_v5  ;;  %v972_v9 = vsel %vm844_vm11, %v1288_v62, %v908_v3  ;;  %vm813_vm14 = vcmp.gt.f32.partialorder %v1257_v7, 0.0  ;;  %v877_v11 = vmul.f32 0.2, %v1257_v7  ;;  %v570_v12 = vpop.f32.mrb[7].mxu0  ;;  %v698_v13 = vpop.f32.mrb[7].mxu1 }
  0xfe   : > { %v938_v10 = vsel %vm810_vm12, %v567_v1, %v874_v4  ;;  %1037 = vst.msk [vmem:[%s1497_s3 + $0x130] sm:$0xff] %vm998_vm1, %v972_v9  ;;  %v970_v14 = vsel %vm842_vm13, %v695_v2, %v906_v6  ;;  %vm845_vm15 = vcmp.gt.f32.partialorder %v1289_v8, 0.0  ;;  %v909_v15 = vmul.f32 0.2, %v1289_v8 }
  0xff   : > { %1003 = vst.msk [vmem:[%s1497_s3 + $0x20] sm:$0xff] %vm998_vm1, %v938_v10  ;;  %vm811_vm0 = vcmp.gt.f32.partialorder %v570_v12, 0.0  ;;  %1035 = vst.msk [vmem:[%s1497_s3 + $0x120] sm:$0xff] %vm998_vm1, %v970_v14  ;;  %v941_v16 = vsel %vm813_vm14, %v1257_v7, %v877_v11  ;;  %v875_v17 = vmul.f32 0.2, %v570_v12  ;;  %vm843_vm2 = vcmp.gt.f32.partialorder %v698_v13, 0.0 }
 0x100   : > { %v907_v18 = vmul.f32 0.2, %v698_v13  ;;  %1006 = vst.msk [vmem:[%s1497_s3 + $0x38] sm:$0xff] %vm998_vm1, %v941_v16  ;;  %v973_v19 = vsel %vm845_vm15, %v1289_v8, %v909_v15 }
 0x101   : > { %1038 = vst.msk [vmem:[%s1497_s3 + $0x138] sm:$0xff] %vm998_vm1, %v973_v19  ;;  %v939_v20 = vsel %vm811_vm0, %v570_v12, %v875_v17  ;;  %v1260_v22 = vpop.f32.mrb[8].mxu0  ;;  %v1292_v23 = vpop.f32.mrb[8].mxu1 }
 0x102   : > { %v971_v21 = vsel %vm843_vm2, %v698_v13, %v907_v18  ;;  %1004 = vst.msk [vmem:[%s1497_s3 + $0x28] sm:$0xff] %vm998_vm1, %v939_v20  ;;  %vm816_vm3 = vcmp.gt.f32.partialorder %v1260_v22, 0.0  ;;  %v880_v24 = vmul.f32 0.2, %v1260_v22  ;;  %vm848_vm4 = vcmp.gt.f32.partialorder %v1292_v23, 0.0  ;;  %v583_v26 = vpop.f32.mrb[9].mxu0 }
 0x103   : > { %1036 = vst.msk [vmem:[%s1497_s3 + $0x128] sm:$0xff] %vm998_vm1, %v971_v21  ;;  %v912_v25 = vmul.f32 0.2, %v1292_v23  ;;  %v711_v27 = vpop.f32.mrb[9].mxu1  ;;  %vm814_vm5 = vcmp.gt.f32.partialorder %v583_v26, 0.0  ;;  %v1261_v31 = vpop.f32.mrb[10].mxu0 }
 0x104   : > { %v944_v28 = vsel %vm816_vm3, %v1260_v22, %v880_v24  ;;  %v878_v30 = vmul.f32 0.2, %v583_v26  ;;  %v1293_v32 = vpop.f32.mrb[10].mxu1  ;;  %vm846_vm6 = vcmp.gt.f32.partialorder %v711_v27, 0.0  ;;  %v910_v33 = vmul.f32 0.2, %v711_v27 }
 0x105   : > { %v976_v29 = vsel %vm848_vm4, %v1292_v23, %v912_v25  ;;  %1009 = vst.msk [vmem:[%s1497_s3 + $0x50] sm:$0xff] %vm998_vm1, %v944_v28  ;;  %vm817_vm7 = vcmp.gt.f32.partialorder %v1261_v31, 0.0  ;;  %v881_v34 = vmul.f32 0.2, %v1261_v31  ;;  %vm849_vm8 = vcmp.gt.f32.partialorder %v1293_v32, 0.0  ;;  %v586_v37 = vpop.f32.mrb[11].mxu0 }
 0x106   : > { %1041 = vst.msk [vmem:[%s1497_s3 + $0x150] sm:$0xff] %vm998_vm1, %v976_v29  ;;  %v942_v35 = vsel %vm814_vm5, %v583_v26, %v878_v30  ;;  %v913_v36 = vmul.f32 0.2, %v1293_v32  ;;  %v714_v38 = vpop.f32.mrb[11].mxu1  ;;  %v974_v39 = vsel %vm846_vm6, %v711_v27, %v910_v33  ;;  %vm815_vm9 = vcmp.gt.f32.partialorder %v586_v37, 0.0 }
 0x107   : > { %1007 = vst.msk [vmem:[%s1497_s3 + $0x40] sm:$0xff] %vm998_vm1, %v942_v35  ;;  %v945_v40 = vsel %vm817_vm7, %v1261_v31, %v881_v34  ;;  %v879_v41 = vmul.f32 0.2, %v586_v37  ;;  %1039 = vst.msk [vmem:[%s1497_s3 + $0x140] sm:$0xff] %vm998_vm1, %v974_v39  ;;  %vm847_vm10 = vcmp.gt.f32.partialorder %v714_v38, 0.0 }
 0x108   : > { %1010 = vst.msk [vmem:[%s1497_s3 + $0x58] sm:$0xff] %vm998_vm1, %v945_v40  ;;  %v977_v42 = vsel %vm849_vm8, %v1293_v32, %v913_v36  ;;  %v911_v43 = vmul.f32 0.2, %v714_v38 }
 0x109   : > { %1042 = vst.msk [vmem:[%s1497_s3 + $0x158] sm:$0xff] %vm998_vm1, %v977_v42  ;;  %v943_v44 = vsel %vm815_vm9, %v586_v37, %v879_v41  ;;  %v1264_v45 = vpop.f32.mrb[12].mxu0  ;;  %v1296_v46 = vpop.f32.mrb[12].mxu1 }
 0x10a   : > { %1008 = vst.msk [vmem:[%s1497_s3 + $0x48] sm:$0xff] %vm998_vm1, %v943_v44  ;;  %v975_v47 = vsel %vm847_vm10, %v714_v38, %v911_v43  ;;  %vm820_vm11 = vcmp.gt.f32.partialorder %v1264_v45, 0.0  ;;  %v884_v48 = vmul.f32 0.2, %v1264_v45  ;;  %vm852_vm12 = vcmp.gt.f32.partialorder %v1296_v46, 0.0  ;;  %v599_v49 = vpop.f32.mrb[13].mxu0 }
 0x10b   : > { %v727_v50 = vpop.f32.mrb[13].mxu1  ;;  %1040 = vst.msk [vmem:[%s1497_s3 + $0x148] sm:$0xff] %vm998_vm1, %v975_v47  ;;  %v916_v51 = vmul.f32 0.2, %v1296_v46  ;;  %vm818_vm13 = vcmp.gt.f32.partialorder %v599_v49, 0.0  ;;  %v1265_v55 = vpop.f32.mrb[14].mxu0 }
 0x10c   : > { %v882_v52 = vmul.f32 0.2, %v599_v49  ;;  %vm850_vm14 = vcmp.gt.f32.partialorder %v727_v50, 0.0  ;;  %v948_v53 = vsel %vm820_vm11, %v1264_v45, %v884_v48  ;;  %v914_v54 = vmul.f32 0.2, %v727_v50  ;;  %v1297_v56 = vpop.f32.mrb[14].mxu1 }
 0x10d   : > { %1013 = vst.msk [vmem:[%s1497_s3 + $0x70] sm:$0xff] %vm998_vm1, %v948_v53  ;;  %v980_v57 = vsel %vm852_vm12, %v1296_v46, %v916_v51  ;;  %vm821_vm15 = vcmp.gt.f32.partialorder %v1265_v55, 0.0  ;;  %v885_v59 = vmul.f32 0.2, %v1265_v55  ;;  %v602_v60 = vpop.f32.mrb[15].mxu0  ;;  %v730_v61 = vpop.f32.mrb[15].mxu1 }
 0x10e   : > { %v946_v58 = vsel %vm818_vm13, %v599_v49, %v882_v52  ;;  %1045 = vst.msk [vmem:[%s1497_s3 + $0x170] sm:$0xff] %vm998_vm1, %v980_v57  ;;  %v978_v62 = vsel %vm850_vm14, %v727_v50, %v914_v54  ;;  %vm853_vm0 = vcmp.gt.f32.partialorder %v1297_v56, 0.0  ;;  %v917_v63 = vmul.f32 0.2, %v1297_v56 }
 0x10f   : > { %1011 = vst.msk [vmem:[%s1497_s3 + $0x60] sm:$0xff] %vm998_vm1, %v946_v58  ;;  %vm819_vm2 = vcmp.gt.f32.partialorder %v602_v60, 0.0  ;;  %1043 = vst.msk [vmem:[%s1497_s3 + $0x160] sm:$0xff] %vm998_vm1, %v978_v62  ;;  %v949_v0 = vsel %vm821_vm15, %v1265_v55, %v885_v59  ;;  %v883_v1 = vmul.f32 0.2, %v602_v60  ;;  %vm851_vm3 = vcmp.gt.f32.partialorder %v730_v61, 0.0 }
 0x110   : > { %v915_v2 = vmul.f32 0.2, %v730_v61  ;;  %1014 = vst.msk [vmem:[%s1497_s3 + $0x78] sm:$0xff] %vm998_vm1, %v949_v0  ;;  %v981_v3 = vsel %vm853_vm0, %v1297_v56, %v917_v63 }
 0x111   : > { %1046 = vst.msk [vmem:[%s1497_s3 + $0x178] sm:$0xff] %vm998_vm1, %v981_v3  ;;  %v947_v4 = vsel %vm819_vm2, %v602_v60, %v883_v1  ;;  %v1268_v6 = vpop.f32.mrb[16].mxu0  ;;  %v1300_v7 = vpop.f32.mrb[16].mxu1 }
 0x112   : > { %v979_v5 = vsel %vm851_vm3, %v730_v61, %v915_v2  ;;  %1012 = vst.msk [vmem:[%s1497_s3 + $0x68] sm:$0xff] %vm998_vm1, %v947_v4  ;;  %vm824_vm4 = vcmp.gt.f32.partialorder %v1268_v6, 0.0  ;;  %v888_v8 = vmul.f32 0.2, %v1268_v6  ;;  %vm856_vm5 = vcmp.gt.f32.partialorder %v1300_v7, 0.0  ;;  %v615_v10 = vpop.f32.mrb[17].mxu0 }
 0x113   : > { %1044 = vst.msk [vmem:[%s1497_s3 + $0x168] sm:$0xff] %vm998_vm1, %v979_v5  ;;  %v920_v9 = vmul.f32 0.2, %v1300_v7  ;;  %v743_v11 = vpop.f32.mrb[17].mxu1  ;;  %vm822_vm6 = vcmp.gt.f32.partialorder %v615_v10, 0.0  ;;  %v1269_v15 = vpop.f32.mrb[18].mxu0 }
 0x114   : > { %v952_v12 = vsel %vm824_vm4, %v1268_v6, %v888_v8  ;;  %v886_v14 = vmul.f32 0.2, %v615_v10  ;;  %v1301_v16 = vpop.f32.mrb[18].mxu1  ;;  %vm854_vm7 = vcmp.gt.f32.partialorder %v743_v11, 0.0  ;;  %v918_v17 = vmul.f32 0.2, %v743_v11 }
 0x115   : > { %v984_v13 = vsel %vm856_vm5, %v1300_v7, %v920_v9  ;;  %1017 = vst.msk [vmem:[%s1497_s3 + $0x90] sm:$0xff] %vm998_vm1, %v952_v12  ;;  %vm825_vm8 = vcmp.gt.f32.partialorder %v1269_v15, 0.0  ;;  %v889_v18 = vmul.f32 0.2, %v1269_v15  ;;  %vm857_vm9 = vcmp.gt.f32.partialorder %v1301_v16, 0.0  ;;  %v618_v21 = vpop.f32.mrb[19].mxu0 }
 0x116   : > { %1049 = vst.msk [vmem:[%s1497_s3 + $0x190] sm:$0xff] %vm998_vm1, %v984_v13  ;;  %v950_v19 = vsel %vm822_vm6, %v615_v10, %v886_v14  ;;  %v921_v20 = vmul.f32 0.2, %v1301_v16  ;;  %v746_v22 = vpop.f32.mrb[19].mxu1  ;;  %v982_v23 = vsel %vm854_vm7, %v743_v11, %v918_v17  ;;  %vm823_vm10 = vcmp.gt.f32.partialorder %v618_v21, 0.0 }
 0x117   : > { %1015 = vst.msk [vmem:[%s1497_s3 + $0x80] sm:$0xff] %vm998_vm1, %v950_v19  ;;  %v953_v24 = vsel %vm825_vm8, %v1269_v15, %v889_v18  ;;  %v887_v25 = vmul.f32 0.2, %v618_v21  ;;  %1047 = vst.msk [vmem:[%s1497_s3 + $0x180] sm:$0xff] %vm998_vm1, %v982_v23  ;;  %vm855_vm11 = vcmp.gt.f32.partialorder %v746_v22, 0.0 }
 0x118   : > { %1018 = vst.msk [vmem:[%s1497_s3 + $0x98] sm:$0xff] %vm998_vm1, %v953_v24  ;;  %v985_v26 = vsel %vm857_vm9, %v1301_v16, %v921_v20  ;;  %v919_v27 = vmul.f32 0.2, %v746_v22 }
 0x119   : > { %1050 = vst.msk [vmem:[%s1497_s3 + $0x198] sm:$0xff] %vm998_vm1, %v985_v26  ;;  %v951_v28 = vsel %vm823_vm10, %v618_v21, %v887_v25  ;;  %v1272_v29 = vpop.f32.mrb[20].mxu0  ;;  %v1304_v30 = vpop.f32.mrb[20].mxu1 }
 0x11a   : > { %1016 = vst.msk [vmem:[%s1497_s3 + $0x88] sm:$0xff] %vm998_vm1, %v951_v28  ;;  %v983_v31 = vsel %vm855_vm11, %v746_v22, %v919_v27  ;;  %vm828_vm12 = vcmp.gt.f32.partialorder %v1272_v29, 0.0  ;;  %v892_v32 = vmul.f32 0.2, %v1272_v29  ;;  %vm860_vm13 = vcmp.gt.f32.partialorder %v1304_v30, 0.0  ;;  %v631_v33 = vpop.f32.mrb[21].mxu0 }
 0x11b   : > { %v759_v34 = vpop.f32.mrb[21].mxu1  ;;  %1048 = vst.msk [vmem:[%s1497_s3 + $0x188] sm:$0xff] %vm998_vm1, %v983_v31  ;;  %v924_v35 = vmul.f32 0.2, %v1304_v30  ;;  %vm826_vm14 = vcmp.gt.f32.partialorder %v631_v33, 0.0  ;;  %v1273_v39 = vpop.f32.mrb[22].mxu0 }
 0x11c   : > { %v890_v36 = vmul.f32 0.2, %v631_v33  ;;  %vm858_vm15 = vcmp.gt.f32.partialorder %v759_v34, 0.0  ;;  %v956_v37 = vsel %vm828_vm12, %v1272_v29, %v892_v32  ;;  %v922_v38 = vmul.f32 0.2, %v759_v34  ;;  %v1305_v40 = vpop.f32.mrb[22].mxu1 }
 0x11d   : > { %1021 = vst.msk [vmem:[%s1497_s3 + $0xb0] sm:$0xff] %vm998_vm1, %v956_v37  ;;  %v988_v41 = vsel %vm860_vm13, %v1304_v30, %v924_v35  ;;  %vm829_vm0 = vcmp.gt.f32.partialorder %v1273_v39, 0.0  ;;  %v893_v43 = vmul.f32 0.2, %v1273_v39  ;;  %v634_v44 = vpop.f32.mrb[23].mxu0  ;;  %v762_v45 = vpop.f32.mrb[23].mxu1 }
 0x11e   : > { %v954_v42 = vsel %vm826_vm14, %v631_v33, %v890_v36  ;;  %1053 = vst.msk [vmem:[%s1497_s3 + $0x1b0] sm:$0xff] %vm998_vm1, %v988_v41  ;;  %v986_v46 = vsel %vm858_vm15, %v759_v34, %v922_v38  ;;  %vm861_vm2 = vcmp.gt.f32.partialorder %v1305_v40, 0.0  ;;  %v925_v47 = vmul.f32 0.2, %v1305_v40 }
 0x11f   : > { %1019 = vst.msk [vmem:[%s1497_s3 + $0xa0] sm:$0xff] %vm998_vm1, %v954_v42  ;;  %vm827_vm3 = vcmp.gt.f32.partialorder %v634_v44, 0.0  ;;  %1051 = vst.msk [vmem:[%s1497_s3 + $0x1a0] sm:$0xff] %vm998_vm1, %v986_v46  ;;  %v957_v48 = vsel %vm829_vm0, %v1273_v39, %v893_v43  ;;  %v891_v49 = vmul.f32 0.2, %v634_v44  ;;  %vm859_vm4 = vcmp.gt.f32.partialorder %v762_v45, 0.0 }
 0x120   : > { %v923_v50 = vmul.f32 0.2, %v762_v45  ;;  %1022 = vst.msk [vmem:[%s1497_s3 + $0xb8] sm:$0xff] %vm998_vm1, %v957_v48  ;;  %v989_v51 = vsel %vm861_vm2, %v1305_v40, %v925_v47 }
 0x121   : > { %1054 = vst.msk [vmem:[%s1497_s3 + $0x1b8] sm:$0xff] %vm998_vm1, %v989_v51  ;;  %v955_v52 = vsel %vm827_vm3, %v634_v44, %v891_v49  ;;  %v1276_v54 = vpop.f32.mrb[24].mxu0  ;;  %v1308_v55 = vpop.f32.mrb[24].mxu1 }
 0x122   : > { %v987_v53 = vsel %vm859_vm4, %v762_v45, %v923_v50  ;;  %1020 = vst.msk [vmem:[%s1497_s3 + $0xa8] sm:$0xff] %vm998_vm1, %v955_v52  ;;  %vm832_vm5 = vcmp.gt.f32.partialorder %v1276_v54, 0.0  ;;  %v896_v56 = vmul.f32 0.2, %v1276_v54  ;;  %vm864_vm6 = vcmp.gt.f32.partialorder %v1308_v55, 0.0  ;;  %v647_v58 = vpop.f32.mrb[25].mxu0 }
 0x123   : > { %1052 = vst.msk [vmem:[%s1497_s3 + $0x1a8] sm:$0xff] %vm998_vm1, %v987_v53  ;;  %v928_v57 = vmul.f32 0.2, %v1308_v55  ;;  %v775_v59 = vpop.f32.mrb[25].mxu1  ;;  %vm830_vm7 = vcmp.gt.f32.partialorder %v647_v58, 0.0  ;;  %v1277_v63 = vpop.f32.mrb[26].mxu0 }
 0x124   : > { %v960_v60 = vsel %vm832_vm5, %v1276_v54, %v896_v56  ;;  %v894_v62 = vmul.f32 0.2, %v647_v58  ;;  %v1309_v0 = vpop.f32.mrb[26].mxu1  ;;  %vm862_vm8 = vcmp.gt.f32.partialorder %v775_v59, 0.0  ;;  %v926_v1 = vmul.f32 0.2, %v775_v59 }
 0x125   : > { %v992_v61 = vsel %vm864_vm6, %v1308_v55, %v928_v57  ;;  %1025 = vst.msk [vmem:[%s1497_s3 + $0xd0] sm:$0xff] %vm998_vm1, %v960_v60  ;;  %vm833_vm9 = vcmp.gt.f32.partialorder %v1277_v63, 0.0  ;;  %v897_v2 = vmul.f32 0.2, %v1277_v63  ;;  %vm865_vm10 = vcmp.gt.f32.partialorder %v1309_v0, 0.0  ;;  %v650_v5 = vpop.f32.mrb[27].mxu0 }
 0x126   : > { %1057 = vst.msk [vmem:[%s1497_s3 + $0x1d0] sm:$0xff] %vm998_vm1, %v992_v61  ;;  %v958_v3 = vsel %vm830_vm7, %v647_v58, %v894_v62  ;;  %v929_v4 = vmul.f32 0.2, %v1309_v0  ;;  %v778_v6 = vpop.f32.mrb[27].mxu1  ;;  %v990_v7 = vsel %vm862_vm8, %v775_v59, %v926_v1  ;;  %vm831_vm11 = vcmp.gt.f32.partialorder %v650_v5, 0.0 }
 0x127   : > { %1023 = vst.msk [vmem:[%s1497_s3 + $0xc0] sm:$0xff] %vm998_vm1, %v958_v3  ;;  %v961_v8 = vsel %vm833_vm9, %v1277_v63, %v897_v2  ;;  %v895_v9 = vmul.f32 0.2, %v650_v5  ;;  %1055 = vst.msk [vmem:[%s1497_s3 + $0x1c0] sm:$0xff] %vm998_vm1, %v990_v7  ;;  %vm863_vm12 = vcmp.gt.f32.partialorder %v778_v6, 0.0 }
 0x128   : > { %1026 = vst.msk [vmem:[%s1497_s3 + $0xd8] sm:$0xff] %vm998_vm1, %v961_v8  ;;  %v993_v10 = vsel %vm865_vm10, %v1309_v0, %v929_v4  ;;  %v927_v11 = vmul.f32 0.2, %v778_v6 }
 0x129   : > { %1058 = vst.msk [vmem:[%s1497_s3 + $0x1d8] sm:$0xff] %vm998_vm1, %v993_v10  ;;  %v959_v12 = vsel %vm831_vm11, %v650_v5, %v895_v9  ;;  %v1280_v13 = vpop.f32.mrb[28].mxu0  ;;  %v1312_v14 = vpop.f32.mrb[28].mxu1 }
 0x12a   : > { %1024 = vst.msk [vmem:[%s1497_s3 + $0xc8] sm:$0xff] %vm998_vm1, %v959_v12  ;;  %v991_v15 = vsel %vm863_vm12, %v778_v6, %v927_v11  ;;  %vm836_vm13 = vcmp.gt.f32.partialorder %v1280_v13, 0.0  ;;  %v900_v16 = vmul.f32 0.2, %v1280_v13  ;;  %vm868_vm14 = vcmp.gt.f32.partialorder %v1312_v14, 0.0  ;;  %v663_v17 = vpop.f32.mrb[29].mxu0 }
 0x12b   : > { %v791_v18 = vpop.f32.mrb[29].mxu1  ;;  %1056 = vst.msk [vmem:[%s1497_s3 + $0x1c8] sm:$0xff] %vm998_vm1, %v991_v15  ;;  %v932_v19 = vmul.f32 0.2, %v1312_v14  ;;  %vm834_vm15 = vcmp.gt.f32.partialorder %v663_v17, 0.0  ;;  %v1281_v23 = vpop.f32.mrb[30].mxu0 }
 0x12c   : > { %v898_v20 = vmul.f32 0.2, %v663_v17  ;;  %vm866_vm0 = vcmp.gt.f32.partialorder %v791_v18, 0.0  ;;  %v964_v21 = vsel %vm836_vm13, %v1280_v13, %v900_v16  ;;  %v930_v22 = vmul.f32 0.2, %v791_v18  ;;  %v1313_v24 = vpop.f32.mrb[30].mxu1 }
 0x12d   : > { %1029 = vst.msk [vmem:[%s1497_s3 + $0xf0] sm:$0xff] %vm998_vm1, %v964_v21  ;;  %v996_v25 = vsel %vm868_vm14, %v1312_v14, %v932_v19  ;;  %vm837_vm2 = vcmp.gt.f32.partialorder %v1281_v23, 0.0  ;;  %v901_v27 = vmul.f32 0.2, %v1281_v23  ;;  %v666_v28 = vpop.f32.mrb[31].mxu0  ;;  %v794_v29 = vpop.f32.mrb[31].mxu1 }
 0x12e   : > { %v962_v26 = vsel %vm834_vm15, %v663_v17, %v898_v20  ;;  %1061 = vst.msk [vmem:[%s1497_s3 + $0x1f0] sm:$0xff] %vm998_vm1, %v996_v25  ;;  %v994_v30 = vsel %vm866_vm0, %v791_v18, %v930_v22  ;;  %vm869_vm3 = vcmp.gt.f32.partialorder %v1313_v24, 0.0  ;;  %v933_v31 = vmul.f32 0.2, %v1313_v24 }
 0x12f   : > { %1027 = vst.msk [vmem:[%s1497_s3 + $0xe0] sm:$0xff] %vm998_vm1, %v962_v26  ;;  %vm835_vm4 = vcmp.gt.f32.partialorder %v666_v28, 0.0  ;;  %1059 = vst.msk [vmem:[%s1497_s3 + $0x1e0] sm:$0xff] %vm998_vm1, %v994_v30  ;;  %v965_v32 = vsel %vm837_vm2, %v1281_v23, %v901_v27  ;;  %v899_v33 = vmul.f32 0.2, %v666_v28  ;;  %vm867_vm5 = vcmp.gt.f32.partialorder %v794_v29, 0.0 }
 0x130   : > { %v931_v34 = vmul.f32 0.2, %v794_v29  ;;  %1030 = vst.msk [vmem:[%s1497_s3 + $0xf8] sm:$0xff] %vm998_vm1, %v965_v32  ;;  %v997_v35 = vsel %vm869_vm3, %v1313_v24, %v933_v31 }
 0x131   : > { %1062 = vst.msk [vmem:[%s1497_s3 + $0x1f8] sm:$0xff] %vm998_vm1, %v997_v35  ;;  %v963_v36 = vsel %vm835_vm4, %v666_v28, %v899_v33 }
 0x132   : > { %v995_v37 = vsel %vm867_vm5, %v794_v29, %v931_v34  ;;  %1028 = vst.msk [vmem:[%s1497_s3 + $0xe8] sm:$0xff] %vm998_vm1, %v963_v36 }
 0x133   : > { %1060 = vst.msk [vmem:[%s1497_s3 + $0x1e8] sm:$0xff] %vm998_vm1, %v995_v37 }
 0x134 PF: > { %s12_s9 = sadd.s32 1, %s1378_s9  }
 0x135   : > { %p9_p4 = scmp.ge.s32.totalorder %s12_s9, 6  }
 0x137   :  { %11 = sbr.rel (!%p9_p4) target bundleno = 1 (0x1), region = 58 }

// kernel: domain_discriminator_forward.6
= control target key start
LH: loop header
LB: loop body
LE: loop exit
PB: predicated region body
PF: predicated region fallthrough
CT: control target
= control target key end

     0   :  { %vm627_vm0 = vcmask 130048   ;;  %s3760_s1 = inlined_call_operand.vmem [shape: bf16[128,16], index: 1, kind: input, shape index: {}]   ;;  %s3761_s0 = inlined_call_operand.vmem [shape: bf16[512,128], index: 0, kind: input, shape index: {}]   ;;  %s3762_s2 = inlined_call_operand.vmem [shape: f32[1,16], index: 2, kind: input, shape index: {}]   ;;  %s3763_s3 = inlined_call_operand.vmem [shape: f32[1,16], index: 3, kind: input, shape index: {}]   ;;  %s3764_s4 = inlined_call_operand.vmem [shape: f32[512,16], index: 4, kind: output, shape index: {}]  }
   0x1   :  { %v1607_v0 = vld [vmem:[%s3760_s1] sm:$0xff]   ;;  %v1608_v1 = vld [vmem:[%s3760_s1 + $0x8] sm:$0xff]   ;;  %v1609_v2 = vld [vmem:[%s3760_s1 + $0x10] sm:$0xff]  }
   0x2   :  { %1511 = vmatprep.subr.bf16.mxu0 %v1607_v0  ;;  %1591 = vmatprep.subr.bf16.mxu1 %v1607_v0  ;;  %v1610_v3 = vld [vmem:[%s3760_s1 + $0x18] sm:$0xff]   ;;  %v1615_v4 = vld [vmem:[%s3761_s0] sm:$0xff]   ;;  %v1612_v6 = vld [vmem:[%s3760_s1 + $0x28] sm:$0xff]  }
   0x3   :  { %1512 = vmatpush3.bf16.msra.mxu0 %v1607_v0  ;;  %1599 = vmatpush3.bf16.msra.mxu1 %v1607_v0  ;;  %v1611_v5 = vld [vmem:[%s3760_s1 + $0x20] sm:$0xff]   ;;  %v1613_v7 = vld [vmem:[%s3760_s1 + $0x30] sm:$0xff]   ;;  %v1614_v8 = vld [vmem:[%s3760_s1 + $0x38] sm:$0xff]  }
   0x4   :  { %1513 = vmatprep.subr.bf16.mxu0 %v1608_v1  ;;  %1592 = vmatprep.subr.bf16.mxu1 %v1608_v1  ;;  %v1631_v9 = vld [vmem:[%s3761_s0 + $0x80] sm:$0xff]   ;;  %v1616_v10 = vld [vmem:[%s3761_s0 + $0x8] sm:$0xff]   ;;  %v1617_v11 = vld [vmem:[%s3761_s0 + $0x10] sm:$0xff]  }
   0x5   :  { %1527 = vmatprep.mubr.bf16.mxu0 %v1615_v4  ;;  %1559 = vmatprep.mubr.bf16.mxu1 %v1631_v9  ;;  %v1632_v12 = vld [vmem:[%s3761_s0 + $0x88] sm:$0xff]   ;;  %v1633_v13 = vld [vmem:[%s3761_s0 + $0x90] sm:$0xff]   ;;  %v1618_v14 = vld [vmem:[%s3761_s0 + $0x18] sm:$0xff]  }
   0x6   :  { %v1619_v15 = vld [vmem:[%s3761_s0 + $0x20] sm:$0xff]   ;;  %v1634_v16 = vld [vmem:[%s3761_s0 + $0x98] sm:$0xff]   ;;  %v1620_v18 = vld [vmem:[%s3761_s0 + $0x28] sm:$0xff]  }
   0x7   :  { %1514 = vmatpush3.bf16.msra.mxu0 %v1608_v1  ;;  %1600 = vmatpush3.bf16.msra.mxu1 %v1608_v1  ;;  %v1635_v17 = vld [vmem:[%s3761_s0 + $0xa0] sm:$0xff]   ;;  %v1636_v19 = vld [vmem:[%s3761_s0 + $0xa8] sm:$0xff]   ;;  %v1621_v20 = vld [vmem:[%s3761_s0 + $0x30] sm:$0xff]  }
   0x8   :  { %1515 = vmatprep.subr.bf16.mxu0 %v1609_v2  ;;  %1593 = vmatprep.subr.bf16.mxu1 %v1609_v2  ;;  %v1637_v21 = vld [vmem:[%s3761_s0 + $0xb0] sm:$0xff]   ;;  %v1622_v22 = vld [vmem:[%s3761_s0 + $0x38] sm:$0xff]   ;;  %v1623_v24 = vld [vmem:[%s3761_s0 + $0x40] sm:$0xff]  }
   0x9   :  { %v1638_v23 = vld [vmem:[%s3761_s0 + $0xb8] sm:$0xff]   ;;  %v1639_v25 = vld [vmem:[%s3761_s0 + $0xc0] sm:$0xff]   ;;  %v1624_v26 = vld [vmem:[%s3761_s0 + $0x48] sm:$0xff]  }
   0xa   :  { %v1640_v27 = vld [vmem:[%s3761_s0 + $0xc8] sm:$0xff]   ;;  %v1625_v28 = vld [vmem:[%s3761_s0 + $0x50] sm:$0xff]   ;;  %v1626_v30 = vld [vmem:[%s3761_s0 + $0x58] sm:$0xff]  }
   0xb   :  { %1516 = vmatpush3.bf16.msra.mxu0 %v1609_v2  ;;  %1601 = vmatpush3.bf16.msra.mxu1 %v1609_v2  ;;  %v1641_v29 = vld [vmem:[%s3761_s0 + $0xd0] sm:$0xff]   ;;  %v1642_v31 = vld [vmem:[%s3761_s0 + $0xd8] sm:$0xff]   ;;  %v1627_v32 = vld [vmem:[%s3761_s0 + $0x60] sm:$0xff]  }
   0xc   :  { %1517 = vmatprep.subr.bf16.mxu0 %v1610_v3  ;;  %1594 = vmatprep.subr.bf16.mxu1 %v1610_v3  ;;  %v1643_v33 = vld [vmem:[%s3761_s0 + $0xe0] sm:$0xff]   ;;  %v1628_v34 = vld [vmem:[%s3761_s0 + $0x68] sm:$0xff]   ;;  %v1629_v36 = vld [vmem:[%s3761_s0 + $0x70] sm:$0xff]  }
   0xd   :  { %v1644_v35 = vld [vmem:[%s3761_s0 + $0xe8] sm:$0xff]   ;;  %v1645_v37 = vld [vmem:[%s3761_s0 + $0xf0] sm:$0xff]   ;;  %v1630_v38 = vld [vmem:[%s3761_s0 + $0x78] sm:$0xff]  }
   0xe   :  { %v1646_v39 = vld [vmem:[%s3761_s0 + $0xf8] sm:$0xff]  }
   0xf   :  { %1518 = vmatpush3.bf16.msra.mxu0 %v1610_v3  ;;  %1602 = vmatpush3.bf16.msra.mxu1 %v1610_v3 }
  0x10   :  { %1519 = vmatprep.subr.bf16.mxu0 %v1611_v5  ;;  %1595 = vmatprep.subr.bf16.mxu1 %v1611_v5 }
  0x13   :  { %1520 = vmatpush3.bf16.msra.mxu0 %v1611_v5  ;;  %1603 = vmatpush3.bf16.msra.mxu1 %v1611_v5 }
  0x14   :  { %1521 = vmatprep.subr.bf16.mxu0 %v1612_v6  ;;  %1596 = vmatprep.subr.bf16.mxu1 %v1612_v6 }
  0x17   :  { %1522 = vmatpush3.bf16.msra.mxu0 %v1612_v6  ;;  %1604 = vmatpush3.bf16.msra.mxu1 %v1612_v6 }
  0x18   :  { %1523 = vmatprep.subr.bf16.mxu0 %v1613_v7  ;;  %1597 = vmatprep.subr.bf16.mxu1 %v1613_v7 }
  0x1b   :  { %1524 = vmatpush3.bf16.msra.mxu0 %v1613_v7  ;;  %1605 = vmatpush3.bf16.msra.mxu1 %v1613_v7 }
  0x1c   :  { %1525 = vmatprep.subr.bf16.mxu0 %v1614_v8  ;;  %1598 = vmatprep.subr.bf16.mxu1 %v1614_v8 }
  0x1f   :  { %1526 = vmatpush3.bf16.msra.mxu0 %v1614_v8  ;;  %1606 = vmatpush3.bf16.msra.mxu1 %v1614_v8 }
  0x22   :  { %1528 = vmatmul.mubr.bf16.vlgmr.msra.gmra.mrb[0].mxu0 %v1616_v10  ;;  %1560 = vmatmul.mubr.bf16.vlgmr.msra.gmra.mrb[0].mxu1 %v1632_v12 }
  0x23   :  { %1531 = vmatprep.mubr.bf16.mxu0 %v1617_v11  ;;  %1563 = vmatprep.mubr.bf16.mxu1 %v1633_v13 }
  0x2a   :  { %1532 = vmatmul.mubr.bf16.gmra.mrb[4].mxu0 %v1618_v14  ;;  %1564 = vmatmul.mubr.bf16.gmra.mrb[4].mxu1 %v1634_v16 }
  0x2b   :  { %1535 = vmatprep.mubr.bf16.mxu0 %v1619_v15  ;;  %1567 = vmatprep.mubr.bf16.mxu1 %v1635_v17 }
  0x32   :  { %1536 = vmatmul.mubr.bf16.gmra.mrb[8].mxu0 %v1620_v18  ;;  %1568 = vmatmul.mubr.bf16.gmra.mrb[8].mxu1 %v1636_v19 }
  0x33   :  { %1539 = vmatprep.mubr.bf16.mxu0 %v1621_v20  ;;  %1571 = vmatprep.mubr.bf16.mxu1 %v1637_v21 }
  0x3a   :  { %1540 = vmatmul.mubr.bf16.gmra.mrb[12].mxu0 %v1622_v22  ;;  %1572 = vmatmul.mubr.bf16.gmra.mrb[12].mxu1 %v1638_v23 }
  0x3b   :  { %1543 = vmatprep.mubr.bf16.mxu0 %v1623_v24  ;;  %1575 = vmatprep.mubr.bf16.mxu1 %v1639_v25 }
  0x42   :  { %1544 = vmatmul.mubr.bf16.gmra.mrb[16].mxu0 %v1624_v26  ;;  %1576 = vmatmul.mubr.bf16.gmra.mrb[16].mxu1 %v1640_v27 }
  0x43   :  { %1547 = vmatprep.mubr.bf16.mxu0 %v1625_v28  ;;  %1579 = vmatprep.mubr.bf16.mxu1 %v1641_v29 }
  0x4a   :  { %1548 = vmatmul.mubr.bf16.gmra.mrb[20].mxu0 %v1626_v30  ;;  %1580 = vmatmul.mubr.bf16.gmra.mrb[20].mxu1 %v1642_v31 }
  0x4b   :  { %1551 = vmatprep.mubr.bf16.mxu0 %v1627_v32  ;;  %1583 = vmatprep.mubr.bf16.mxu1 %v1643_v33 }
  0x52   :  { %1552 = vmatmul.mubr.bf16.gmra.mrb[24].mxu0 %v1628_v34  ;;  %1584 = vmatmul.mubr.bf16.gmra.mrb[24].mxu1 %v1644_v35 }
  0x53   :  { %1555 = vmatprep.mubr.bf16.mxu0 %v1629_v36  ;;  %1587 = vmatprep.mubr.bf16.mxu1 %v1645_v37 }
  0x5a   :  { %1556 = vmatmul.mubr.bf16.gmra.mrb[28].mxu0 %v1630_v38  ;;  %1588 = vmatmul.mubr.bf16.gmra.mrb[28].mxu1 %v1646_v39 }
  0xf5   :  { %v1794_v40 = vpop.f32.mrb[0].mxu0  ;;  %v1796_v41 = vpop.f32.mrb[0].mxu1 }
  0xf6   :  { %v1798_v42 = vpop.f32.mrb[1].mxu0  ;;  %v1800_v43 = vpop.f32.mrb[1].mxu1  ;;  %v631_v51 = vsel %vm627_vm0, %v1794_v40, 0.0 }
  0xf7   :  { %v1802_v44 = vpop.f32.mrb[2].mxu0  ;;  %v1804_v45 = vpop.f32.mrb[2].mxu1  ;;  %v628_v48 = vsel %vm627_vm0, %v1798_v42, 0.0 }
  0xf8   :  { %v1806_v46 = vpop.f32.mrb[3].mxu0  ;;  %v1808_v47 = vpop.f32.mrb[3].mxu1  ;;  %v633_v53 = vsel %vm627_vm0, %v1802_v44, 0.0 }
  0xf9   :  { %v629_v49 = vsel %vm627_vm0, %v1806_v46, 0.0 }
  0xfa   :  { %v630_v50 = vadd.f32 %v629_v49, %v628_v48 }
  0xfc   :  { %v632_v52 = vadd.f32 %v631_v51, %v630_v50 }
  0xfd   :  { %v1818_v54 = vpop.f32.mrb[4].mxu0  ;;  %v1820_v55 = vpop.f32.mrb[4].mxu1 }
  0xfe   :  { %v1822_v56 = vpop.f32.mrb[5].mxu0  ;;  %v634_v57 = vadd.f32 %v633_v53, %v632_v52  ;;  %v1824_v58 = vpop.f32.mrb[5].mxu1  ;;  %v639_v3 = vsel %vm627_vm0, %v1818_v54, 0.0 }
  0xff   :  { %v635_v59 = vsel %vm627_vm0, %v1822_v56, 0.0  ;;  %v1828_v60 = vpop.f32.mrb[6].mxu0  ;;  %v1830_v61 = vpop.f32.mrb[6].mxu1 }
 0x100   :  { %v636_v62 = vadd.f32 %v635_v59, %v634_v57  ;;  %v1832_v63 = vpop.f32.mrb[7].mxu0  ;;  %v1834_v0 = vpop.f32.mrb[7].mxu1  ;;  %v641_v5 = vsel %vm627_vm0, %v1828_v60, 0.0 }
 0x101   :  { %v637_v1 = vsel %vm627_vm0, %v1832_v63, 0.0 }
 0x102   :  { %v638_v2 = vadd.f32 %v637_v1, %v636_v62 }
 0x104   :  { %v640_v4 = vadd.f32 %v639_v3, %v638_v2 }
 0x105   :  { %v1842_v6 = vpop.f32.mrb[8].mxu0  ;;  %v1844_v7 = vpop.f32.mrb[8].mxu1 }
 0x106   :  { %v1846_v8 = vpop.f32.mrb[9].mxu0  ;;  %v642_v9 = vadd.f32 %v641_v5, %v640_v4  ;;  %v1848_v10 = vpop.f32.mrb[9].mxu1  ;;  %v647_v19 = vsel %vm627_vm0, %v1842_v6, 0.0 }
 0x107   :  { %v643_v11 = vsel %vm627_vm0, %v1846_v8, 0.0  ;;  %v1852_v12 = vpop.f32.mrb[10].mxu0  ;;  %v1854_v13 = vpop.f32.mrb[10].mxu1 }
 0x108   :  { %v644_v14 = vadd.f32 %v643_v11, %v642_v9  ;;  %v1856_v15 = vpop.f32.mrb[11].mxu0  ;;  %v1858_v16 = vpop.f32.mrb[11].mxu1  ;;  %v649_v21 = vsel %vm627_vm0, %v1852_v12, 0.0 }
 0x109   :  { %v645_v17 = vsel %vm627_vm0, %v1856_v15, 0.0 }
 0x10a   :  { %v646_v18 = vadd.f32 %v645_v17, %v644_v14 }
 0x10c   :  { %v648_v20 = vadd.f32 %v647_v19, %v646_v18 }
 0x10d   :  { %v1866_v22 = vpop.f32.mrb[12].mxu0  ;;  %v1868_v23 = vpop.f32.mrb[12].mxu1 }
 0x10e   :  { %v1870_v24 = vpop.f32.mrb[13].mxu0  ;;  %v650_v25 = vadd.f32 %v649_v21, %v648_v20  ;;  %v1872_v26 = vpop.f32.mrb[13].mxu1  ;;  %v655_v35 = vsel %vm627_vm0, %v1866_v22, 0.0 }
 0x10f   :  { %v651_v27 = vsel %vm627_vm0, %v1870_v24, 0.0  ;;  %v1876_v28 = vpop.f32.mrb[14].mxu0  ;;  %v1878_v29 = vpop.f32.mrb[14].mxu1 }
 0x110   :  { %v652_v30 = vadd.f32 %v651_v27, %v650_v25  ;;  %v1880_v31 = vpop.f32.mrb[15].mxu0  ;;  %v1882_v32 = vpop.f32.mrb[15].mxu1  ;;  %v657_v37 = vsel %vm627_vm0, %v1876_v28, 0.0 }
 0x111   :  { %v653_v33 = vsel %vm627_vm0, %v1880_v31, 0.0 }
 0x112   :  { %v654_v34 = vadd.f32 %v653_v33, %v652_v30 }
 0x114   :  { %v656_v36 = vadd.f32 %v655_v35, %v654_v34 }
 0x115   :  { %v1890_v38 = vpop.f32.mrb[16].mxu0  ;;  %v1892_v39 = vpop.f32.mrb[16].mxu1 }
 0x116   :  { %3828 = vst [vmem:[#allocation2_spill] sm:$0xff] %v1890_v38  ;;  %v1894_v48 = vpop.f32.mrb[17].mxu0  ;;  %v658_v49 = vadd.f32 %v657_v37, %v656_v36  ;;  %v1896_v50 = vpop.f32.mrb[17].mxu1  ;;  %v663_v3 = vsel %vm627_vm0, %v1890_v38, 0.0 }
 0x117   :  { %v659_v51 = vsel %vm627_vm0, %v1894_v48, 0.0  ;;  %v1900_v52 = vpop.f32.mrb[18].mxu0  ;;  %v1902_v53 = vpop.f32.mrb[18].mxu1 }
 0x118   :  { %3829 = vst [vmem:[#allocation3_spill] sm:$0xff] %v1900_v52  ;;  %v660_v57 = vadd.f32 %v659_v51, %v658_v49  ;;  %v1904_v59 = vpop.f32.mrb[19].mxu0  ;;  %v1906_v62 = vpop.f32.mrb[19].mxu1  ;;  %v665_v5 = vsel %vm627_vm0, %v1900_v52, 0.0 }
 0x119   :  { %v661_v1 = vsel %vm627_vm0, %v1904_v59, 0.0 }
 0x11a   :  { %v662_v2 = vadd.f32 %v661_v1, %v660_v57 }
 0x11c   :  { %v664_v4 = vadd.f32 %v663_v3, %v662_v2 }
 0x11d   :  { %v1914_v9 = vpop.f32.mrb[20].mxu0  ;;  %v1916_v11 = vpop.f32.mrb[20].mxu1 }
 0x11e   :  { %3830 = vst [vmem:[#allocation4_spill] sm:$0xff] %v1914_v9  ;;  %v1918_v14 = vpop.f32.mrb[21].mxu0  ;;  %v666_v17 = vadd.f32 %v665_v5, %v664_v4  ;;  %v1920_v18 = vpop.f32.mrb[21].mxu1  ;;  %v671_v35 = vsel %vm627_vm0, %v1914_v9, 0.0 }
 0x11f   :  { %3831 = vst [vmem:[#allocation5_spill] sm:$0xff] %v1918_v14  ;;  %v667_v19 = vsel %vm627_vm0, %v1918_v14, 0.0  ;;  %v1924_v20 = vpop.f32.mrb[22].mxu0  ;;  %v1926_v21 = vpop.f32.mrb[22].mxu1  ;;  %v691_v14 = vsel %vm627_vm0, %v1800_v43, 0.0 }
 0x120   :  { %3832 = vst [vmem:[#allocation6_spill] sm:$0xff] %v1924_v20  ;;  %v668_v25 = vadd.f32 %v667_v19, %v666_v17  ;;  %v1928_v27 = vpop.f32.mrb[23].mxu0  ;;  %v1930_v30 = vpop.f32.mrb[23].mxu1  ;;  %v673_v37 = vsel %vm627_vm0, %v1924_v20, 0.0 }
 0x121   :  { %3833 = vst [vmem:[#allocation7_spill] sm:$0xff] %v1928_v27  ;;  %v669_v33 = vsel %vm627_vm0, %v1928_v27, 0.0 }
 0x122   :  { %v670_v34 = vadd.f32 %v669_v33, %v668_v25 }
 0x124   :  { %v672_v36 = vadd.f32 %v671_v35, %v670_v34 }
 0x125   :  { %v1938_v49 = vpop.f32.mrb[24].mxu0  ;;  %v1940_v51 = vpop.f32.mrb[24].mxu1 }
 0x126   :  { %3834 = vst [vmem:[#allocation8_spill] sm:$0xff] %v1938_v49  ;;  %3835 = vst [vmem:[#allocation9_spill] sm:$0xff] %v1940_v51  ;;  %v1942_v57 = vpop.f32.mrb[25].mxu0  ;;  %v674_v1 = vadd.f32 %v673_v37, %v672_v36  ;;  %v1944_v2 = vpop.f32.mrb[25].mxu1  ;;  %v679_v35 = vsel %vm627_vm0, %v1938_v49, 0.0 }
 0x127   :  { %3836 = vst [vmem:[#allocation10_spill] sm:$0xff] %v1942_v57  ;;  %v675_v3 = vsel %vm627_vm0, %v1942_v57, 0.0  ;;  %v1948_v4 = vpop.f32.mrb[26].mxu0  ;;  %v1950_v5 = vpop.f32.mrb[26].mxu1 }
 0x128   :  { %3837 = vst [vmem:[#allocation11_spill] sm:$0xff] %v1948_v4  ;;  %3838 = vst [vmem:[#allocation12_spill] sm:$0xff] %v1950_v5  ;;  %v676_v17 = vadd.f32 %v675_v3, %v674_v1  ;;  %v1952_v19 = vpop.f32.mrb[27].mxu0  ;;  %v1954_v25 = vpop.f32.mrb[27].mxu1  ;;  %v681_v37 = vsel %vm627_vm0, %v1948_v4, 0.0 }
 0x129   :  { %3839 = vst [vmem:[#allocation13_spill] sm:$0xff] %v1952_v19  ;;  %3840 = vst [vmem:[#allocation14_spill] sm:$0xff] %v1954_v25  ;;  %v677_v33 = vsel %vm627_vm0, %v1952_v19, 0.0 }
 0x12a   :  { %v678_v34 = vadd.f32 %v677_v33, %v676_v17 }
 0x12c   :  { %v680_v36 = vadd.f32 %v679_v35, %v678_v34 }
 0x12d   :  { %v1962_v57 = vpop.f32.mrb[28].mxu0  ;;  %v1964_v20 = vpop.f32.mrb[28].mxu1 }
 0x12e   :  { %v1966_v1 = vpop.f32.mrb[29].mxu0  ;;  %v682_v3 = vadd.f32 %v681_v37, %v680_v36  ;;  %v1968_v9 = vpop.f32.mrb[29].mxu1  ;;  %v687_v36 = vsel %vm627_vm0, %v1962_v57, 0.0 }
 0x12f   :  { %3841 = vst [vmem:[#allocation15_spill] sm:$0xff] %v1966_v1  ;;  %3842 = vst [vmem:[#allocation16_spill] sm:$0xff] %v1968_v9  ;;  %v683_v19 = vsel %vm627_vm0, %v1966_v1, 0.0  ;;  %v1972_v17 = vpop.f32.mrb[30].mxu0  ;;  %v1974_v33 = vpop.f32.mrb[30].mxu1 }
 0x130   :  { %3843 = vst [vmem:[#allocation17_spill] sm:$0xff] %v1972_v17  ;;  %v684_v34 = vadd.f32 %v683_v19, %v682_v3  ;;  %v1976_v35 = vpop.f32.mrb[31].mxu0  ;;  %v1978_v4 = vpop.f32.mrb[31].mxu1  ;;  %v689_v1 = vsel %vm627_vm0, %v1972_v17, 0.0  ;;  %v693_v3 = vsel %vm627_vm0, %v1808_v47, 0.0 }
 0x131   :  { %3844 = vst [vmem:[#allocation18_spill] sm:$0xff] %v1976_v35  ;;  %v685_v49 = vsel %vm627_vm0, %v1976_v35, 0.0  ;;  %v695_v35 = vsel %vm627_vm0, %v1796_v41, 0.0 }
 0x132   :  { %v686_v27 = vadd.f32 %v685_v49, %v684_v34  ;;  %v697_v34 = vsel %vm627_vm0, %v1804_v45, 0.0 }
 0x134   :  { %v688_v37 = vadd.f32 %v687_v36, %v686_v27  ;;  %v699_v27 = vsel %vm627_vm0, %v1824_v58, 0.0 }
 0x136   :  { %v690_v52 = vadd.f32 %v689_v1, %v688_v37  ;;  %v701_v1 = vsel %vm627_vm0, %v1834_v0, 0.0 }
 0x138   :  { %v692_v19 = vadd.f32 %v691_v14, %v690_v52  ;;  %v703_v14 = vsel %vm627_vm0, %v1820_v55, 0.0 }
 0x13a   :  { %v694_v38 = vadd.f32 %v693_v3, %v692_v19  ;;  %v705_v19 = vsel %vm627_vm0, %v1830_v61, 0.0 }
 0x13c   :  { %v696_v49 = vadd.f32 %v695_v35, %v694_v38  ;;  %v707_v38 = vsel %vm627_vm0, %v1848_v10, 0.0 }
 0x13e   :  { %v698_v36 = vadd.f32 %v697_v34, %v696_v49  ;;  %v709_v49 = vsel %vm627_vm0, %v1858_v16, 0.0 }
 0x140   :  { %v700_v17 = vadd.f32 %v699_v27, %v698_v36  ;;  %v711_v27 = vsel %vm627_vm0, %v1844_v7, 0.0  ;;  %v713_v36 = vsel %vm627_vm0, %v1854_v13, 0.0 }
 0x142   :  { %v702_v52 = vadd.f32 %v701_v1, %v700_v17  ;;  %v715_v1 = vsel %vm627_vm0, %v1872_v26, 0.0 }
 0x144   :  { %v704_v37 = vadd.f32 %v703_v14, %v702_v52 }
 0x146   :  { %v706_v35 = vadd.f32 %v705_v19, %v704_v37  ;;  %v717_v37 = vsel %vm627_vm0, %v1882_v32, 0.0 }
 0x148   :  { %v708_v3 = vadd.f32 %v707_v38, %v706_v35  ;;  %v719_v38 = vsel %vm627_vm0, %v1868_v23, 0.0 }
 0x14a   :  { %v710_v34 = vadd.f32 %v709_v49, %v708_v3  ;;  %v721_v3 = vsel %vm627_vm0, %v1878_v29, 0.0  ;;  %v723_v49 = vsel %vm627_vm0, %v1896_v50, 0.0 }
 0x14c   :  { %v712_v17 = vadd.f32 %v711_v27, %v710_v34 }
 0x14e   :  { %v714_v52 = vadd.f32 %v713_v36, %v712_v17  ;;  %v725_v17 = vsel %vm627_vm0, %v1906_v62, 0.0 }
 0x150   :  { %v716_v14 = vadd.f32 %v715_v1, %v714_v52  ;;  %v727_v1 = vsel %vm627_vm0, %v1892_v39, 0.0 }
 0x152   :  { %v718_v19 = vadd.f32 %v717_v37, %v716_v14  ;;  %v729_v14 = vsel %vm627_vm0, %v1902_v53, 0.0  ;;  %v731_v37 = vsel %vm627_vm0, %v1920_v18, 0.0 }
 0x154   :  { %v720_v35 = vadd.f32 %v719_v38, %v718_v19 }
 0x156   :  { %v722_v34 = vadd.f32 %v721_v3, %v720_v35  ;;  %v733_v35 = vsel %vm627_vm0, %v1930_v30, 0.0 }
 0x158   :  { %v724_v27 = vadd.f32 %v723_v49, %v722_v34  ;;  %v735_v49 = vsel %vm627_vm0, %v1916_v11, 0.0 }
 0x15a   :  { %v726_v36 = vadd.f32 %v725_v17, %v724_v27  ;;  %v737_v27 = vsel %vm627_vm0, %v1926_v21, 0.0  ;;  %v739_v17 = vsel %vm627_vm0, %v1944_v2, 0.0 }
 0x15c   :  { %v728_v52 = vadd.f32 %v727_v1, %v726_v36 }
 0x15e   :  { %v730_v19 = vadd.f32 %v729_v14, %v728_v52  ;;  %v741_v52 = vsel %vm627_vm0, %v1954_v25, 0.0 }
 0x160   :  { %v732_v38 = vadd.f32 %v731_v37, %v730_v19  ;;  %v743_v37 = vsel %vm627_vm0, %v1940_v51, 0.0 }
 0x162   :  { %v734_v3 = vadd.f32 %v733_v35, %v732_v38  ;;  %v745_v38 = vsel %vm627_vm0, %v1950_v5, 0.0  ;;  %v747_v35 = vsel %vm627_vm0, %v1968_v9, 0.0 }
 0x164   :  { %v736_v34 = vadd.f32 %v735_v49, %v734_v3 }
 0x166   :  { %v738_v36 = vadd.f32 %v737_v27, %v736_v34  ;;  %v749_v34 = vsel %vm627_vm0, %v1978_v4, 0.0 }
 0x168   :  { %v740_v1 = vadd.f32 %v739_v17, %v738_v36  ;;  %v751_v17 = vsel %vm627_vm0, %v1964_v20, 0.0 }
 0x16a   :  { %v742_v14 = vadd.f32 %v741_v52, %v740_v1  ;;  %v753_v1 = vsel %vm627_vm0, %v1974_v33, 0.0 }
 0x16c   :  { %v744_v19 = vadd.f32 %v743_v37, %v742_v14 }
 0x16e   :  { %v746_v3 = vadd.f32 %v745_v38, %v744_v19 }
 0x170   :  { %v748_v49 = vadd.f32 %v747_v35, %v746_v3 }
 0x172   :  { %v750_v27 = vadd.f32 %v749_v34, %v748_v49  ;;  %v3853_v34 = vld [vmem:[#allocation7_spill] sm:$0xff] }
 0x174   :  { %v752_v36 = vadd.f32 %v751_v17, %v750_v27  ;;  %v3854_v27 = vld [vmem:[#allocation4_spill] sm:$0xff]  ;;  %v3856_v17 = vld [vmem:[#allocation6_spill] sm:$0xff] }
 0x176   :  { %v754_v52 = vadd.f32 %v753_v1, %v752_v36  ;;  %v3858_v1 = vld [vmem:[#allocation10_spill] sm:$0xff] }
 0x178   :  { %v755_v14 = vrot.slane %v754_v52, 4 }
 0x17a   :  { %v756_v37 = vadd.f32 %v755_v14, %v754_v52  ;;  %v3859_v14 = vld [vmem:[#allocation13_spill] sm:$0xff] }
 0x17c   :  { %v757_v5 = vrot.slane %v756_v37, 2 }
 0x17e   :  { %v758_v51 = vadd.f32 %v757_v5, %v756_v37  ;;  %v3850_v5 = vld [vmem:[#allocation3_spill] sm:$0xff] }
 0x180   :  { %v759_v25 = vrot.slane %v758_v51, 1 }
 0x182   :  { %v760_v9 = vadd.f32 %v759_v25, %v758_v51  ;;  %v3849_v51 = vld [vmem:[#allocation2_spill] sm:$0xff]  ;;  %v3851_v25 = vld [vmem:[#allocation5_spill] sm:$0xff] }
 0x184   :  { %v2050_v19 = vmul.f32 0.001953125, %v760_v9 }
 0x186   :  { %v2054_v38 = vsub.f32 %v1798_v42, %v2050_v19  ;;  %v2058_v35 = vsub.f32 %v1806_v46, %v2050_v19  ;;  %v2062_v3 = vsub.f32 %v1794_v40, %v2050_v19  ;;  %v2066_v49 = vsub.f32 %v1802_v44, %v2050_v19 }
 0x187   :  { %v2070_v9 = vsub.f32 %v1822_v56, %v2050_v19  ;;  %v2074_v42 = vsub.f32 %v1832_v63, %v2050_v19  ;;  %v2078_v46 = vsub.f32 %v1818_v54, %v2050_v19  ;;  %v2082_v40 = vsub.f32 %v1828_v60, %v2050_v19 }
 0x188   :  { %3845 = vst [vmem:[#allocation19_spill] sm:$0xff] %v2054_v38  ;;  %3846 = vst [vmem:[#allocation20_spill] sm:$0xff] %v2058_v35  ;;  %v2086_v44 = vsub.f32 %v1846_v8, %v2050_v19  ;;  %v2090_v56 = vsub.f32 %v1856_v15, %v2050_v19  ;;  %v2094_v63 = vsub.f32 %v1842_v6, %v2050_v19 }
 0x189   :  { %3847 = vst [vmem:[#allocation21_spill] sm:$0xff] %v2062_v3  ;;  %3848 = vst [vmem:[#allocation22_spill] sm:$0xff] %v2066_v49  ;;  %v2098_v54 = vsub.f32 %v1852_v12, %v2050_v19  ;;  %v2102_v60 = vsub.f32 %v1870_v24, %v2050_v19  ;;  %v2106_v8 = vsub.f32 %v1880_v31, %v2050_v19 }
 0x18a   :  { %v2110_v15 = vsub.f32 %v1866_v22, %v2050_v19  ;;  %v2114_v6 = vsub.f32 %v1876_v28, %v2050_v19  ;;  %v2118_v12 = vsub.f32 %v1894_v48, %v2050_v19  ;;  %v2122_v24 = vsub.f32 %v1904_v59, %v2050_v19 }
 0x18b   :  { %v2126_v31 = vsub.f32 %v3849_v51, %v2050_v19  ;;  %v2130_v22 = vsub.f32 %v3850_v5, %v2050_v19  ;;  %v2134_v28 = vsub.f32 %v3851_v25, %v2050_v19  ;;  %v2138_v48 = vsub.f32 %v3853_v34, %v2050_v19  ;;  %v3861_v51 = vld [vmem:[#allocation8_spill] sm:$0xff]  ;;  %v3862_v25 = vld [vmem:[#allocation11_spill] sm:$0xff] }
 0x18c   :  { %v2142_v59 = vsub.f32 %v3854_v27, %v2050_v19  ;;  %v2146_v36 = vsub.f32 %v3856_v17, %v2050_v19  ;;  %v2150_v52 = vsub.f32 %v3858_v1, %v2050_v19  ;;  %v2154_v37 = vsub.f32 %v3859_v14, %v2050_v19  ;;  %v3863_v27 = vld [vmem:[#allocation15_spill] sm:$0xff] }
 0x18d   :  { %3852 = vst [vmem:[#allocation2_spill] sm:$0xff] %v2134_v28  ;;  %v2158_v5 = vsub.f32 %v3861_v51, %v2050_v19  ;;  %v2162_v34 = vsub.f32 %v3862_v25, %v2050_v19  ;;  %v2166_v17 = vsub.f32 %v3863_v27, %v2050_v19  ;;  %v2174_v14 = vsub.f32 %v1962_v57, %v2050_v19 }
 0x18e   :  { %3855 = vst [vmem:[#allocation3_spill] sm:$0xff] %v2142_v59  ;;  %3857 = vst [vmem:[#allocation5_spill] sm:$0xff] %v2146_v36  ;;  %v3864_v36 = vld [vmem:[#allocation18_spill] sm:$0xff]  ;;  %v2182_v25 = vsub.f32 %v1800_v43, %v2050_v19  ;;  %v2186_v27 = vsub.f32 %v1808_v47, %v2050_v19  ;;  %v2194_v57 = vsub.f32 %v1804_v45, %v2050_v19 }
 0x18f   :  { %3860 = vst [vmem:[#allocation7_spill] sm:$0xff] %v2154_v37  ;;  %v2170_v1 = vsub.f32 %v3864_v36, %v2050_v19  ;;  %v3865_v37 = vld [vmem:[#allocation17_spill] sm:$0xff]  ;;  %v2190_v36 = vsub.f32 %v1796_v41, %v2050_v19  ;;  %v2202_v43 = vsub.f32 %v1834_v0, %v2050_v19  ;;  %v2206_v47 = vsub.f32 %v1820_v55, %v2050_v19 }
 0x190   :  { %v2178_v51 = vsub.f32 %v3865_v37, %v2050_v19  ;;  %v2198_v37 = vsub.f32 %v1824_v58, %v2050_v19  ;;  %v2210_v41 = vsub.f32 %v1830_v61, %v2050_v19  ;;  %v2214_v45 = vsub.f32 %v1848_v10, %v2050_v19 }
 0x191   :  { %v2218_v58 = vsub.f32 %v1858_v16, %v2050_v19  ;;  %v2222_v0 = vsub.f32 %v1844_v7, %v2050_v19  ;;  %v2226_v55 = vsub.f32 %v1854_v13, %v2050_v19  ;;  %v2230_v61 = vsub.f32 %v1872_v26, %v2050_v19 }
 0x192   :  { %v2234_v10 = vsub.f32 %v1882_v32, %v2050_v19  ;;  %v2238_v16 = vsub.f32 %v1868_v23, %v2050_v19  ;;  %v2242_v7 = vsub.f32 %v1878_v29, %v2050_v19  ;;  %v2246_v13 = vsub.f32 %v1896_v50, %v2050_v19 }
 0x193   :  { %v2250_v26 = vsub.f32 %v1906_v62, %v2050_v19  ;;  %v2254_v32 = vsub.f32 %v1892_v39, %v2050_v19  ;;  %v2258_v23 = vsub.f32 %v1902_v53, %v2050_v19  ;;  %v2262_v29 = vsub.f32 %v1920_v18, %v2050_v19 }
 0x194   :  { %3866 = vst [vmem:[#allocation4_spill] sm:$0xff] %v2246_v13  ;;  %v2266_v50 = vsub.f32 %v1930_v30, %v2050_v19  ;;  %v2270_v62 = vsub.f32 %v1916_v11, %v2050_v19  ;;  %v2274_v39 = vsub.f32 %v1926_v21, %v2050_v19  ;;  %v2278_v53 = vsub.f32 %v1944_v2, %v2050_v19 }
 0x195   :  { %3867 = vst [vmem:[#allocation6_spill] sm:$0xff] %v2250_v26  ;;  %3868 = vst [vmem:[#allocation10_spill] sm:$0xff] %v2254_v32  ;;  %v2298_v2 = vsub.f32 %v1978_v4, %v2050_v19  ;;  %v830_v4 = vmul.f32 %v2066_v49, %v2066_v49  ;;  %v833_v49 = vmul.f32 %v2078_v46, %v2078_v46 }
 0x196   :  { %3869 = vst [vmem:[#allocation13_spill] sm:$0xff] %v2258_v23  ;;  %3870 = vst [vmem:[#allocation8_spill] sm:$0xff] %v2262_v29  ;;  %v3875_v23 = vld [vmem:[#allocation14_spill] sm:$0xff]  ;;  %v3877_v29 = vld [vmem:[#allocation9_spill] sm:$0xff] }
 0x197   :  { %3871 = vst [vmem:[#allocation11_spill] sm:$0xff] %v2266_v50  ;;  %3872 = vst [vmem:[#allocation15_spill] sm:$0xff] %v2270_v62  ;;  %v2282_v18 = vsub.f32 %v3875_v23, %v2050_v19  ;;  %v2286_v30 = vsub.f32 %v3877_v29, %v2050_v19  ;;  %v3879_v50 = vld [vmem:[#allocation12_spill] sm:$0xff]  ;;  %v2302_v23 = vsub.f32 %v1964_v20, %v2050_v19 }
 0x198   :  { %3873 = vst [vmem:[#allocation18_spill] sm:$0xff] %v2274_v39  ;;  %3874 = vst [vmem:[#allocation17_spill] sm:$0xff] %v2278_v53  ;;  %v2290_v11 = vsub.f32 %v3879_v50, %v2050_v19  ;;  %v3881_v62 = vld [vmem:[#allocation16_spill] sm:$0xff]  ;;  %v2306_v29 = vsub.f32 %v1974_v33, %v2050_v19  ;;  %v827_v50 = vmul.f32 %v2054_v38, %v2054_v38 }
 0x199   :  { %3876 = vst [vmem:[#allocation14_spill] sm:$0xff] %v2282_v18  ;;  %3878 = vst [vmem:[#allocation9_spill] sm:$0xff] %v2286_v30  ;;  %v2294_v21 = vsub.f32 %v3881_v62, %v2050_v19  ;;  %v829_v62 = vmul.f32 %v2062_v3, %v2062_v3  ;;  %v831_v33 = vmul.f32 %v2070_v9, %v2070_v9 }
 0x19a   :  { %3880 = vst [vmem:[#allocation12_spill] sm:$0xff] %v2290_v11  ;;  %3883 = vst [vmem:[#allocation23_spill] sm:$0xff] %v2298_v2  ;;  %v828_v11 = vmul.f32 %v2058_v35, %v2058_v35  ;;  %v891_v2 = vsel %vm627_vm0, %v827_v50, 0.0  ;;  %v832_v35 = vmul.f32 %v2074_v42, %v2074_v42 }
 0x19b   :  { %3882 = vst [vmem:[#allocation16_spill] sm:$0xff] %v2294_v21  ;;  %3884 = vst [vmem:[#allocation24_spill] sm:$0xff] %v2302_v23  ;;  %v894_v19 = vsel %vm627_vm0, %v829_v62, 0.0  ;;  %v898_v50 = vsel %vm627_vm0, %v831_v33, 0.0  ;;  %v902_v62 = vsel %vm627_vm0, %v833_v49, 0.0  ;;  %v839_v49 = vmul.f32 %v2102_v60, %v2102_v60 }
 0x19c   :  { %3885 = vst [vmem:[#allocation25_spill] sm:$0xff] %v2306_v29  ;;  %v892_v20 = vsel %vm627_vm0, %v828_v11, 0.0  ;;  %v896_v29 = vsel %vm627_vm0, %v830_v4, 0.0  ;;  %v834_v11 = vmul.f32 %v2082_v40, %v2082_v40 }
 0x19d   :  { %v893_v23 = vadd.f32 %v892_v20, %v891_v2  ;;  %v900_v2 = vsel %vm627_vm0, %v832_v35, 0.0  ;;  %v838_v35 = vmul.f32 %v2098_v54, %v2098_v54 }
 0x19f   :  { %v895_v38 = vadd.f32 %v894_v19, %v893_v23  ;;  %v835_v23 = vmul.f32 %v2086_v44, %v2086_v44 }
 0x1a1   :  { %v897_v3 = vadd.f32 %v896_v29, %v895_v38  ;;  %v836_v38 = vmul.f32 %v2090_v56, %v2090_v56  ;;  %v904_v29 = vsel %vm627_vm0, %v834_v11, 0.0  ;;  %v906_v33 = vsel %vm627_vm0, %v835_v23, 0.0 }
 0x1a2   :  { %v840_v11 = vmul.f32 %v2106_v8, %v2106_v8  ;;  %v841_v23 = vmul.f32 %v2110_v15, %v2110_v15 }
 0x1a3   :  { %v899_v21 = vadd.f32 %v898_v50, %v897_v3  ;;  %v837_v3 = vmul.f32 %v2094_v63, %v2094_v63 }
 0x1a5   :  { %v901_v20 = vadd.f32 %v900_v2, %v899_v21  ;;  %v908_v21 = vsel %vm627_vm0, %v836_v38, 0.0  ;;  %v842_v38 = vmul.f32 %v2114_v6, %v2114_v6 }
 0x1a7   :  { %v903_v19 = vadd.f32 %v902_v62, %v901_v20  ;;  %v910_v20 = vsel %vm627_vm0, %v837_v3, 0.0  ;;  %v843_v3 = vmul.f32 %v2118_v12, %v2118_v12 }
 0x1a9   :  { %v905_v4 = vadd.f32 %v904_v29, %v903_v19  ;;  %v912_v19 = vsel %vm627_vm0, %v838_v35, 0.0  ;;  %v844_v35 = vmul.f32 %v2122_v24, %v2122_v24 }
 0x1ab   :  { %v907_v50 = vadd.f32 %v906_v33, %v905_v4  ;;  %v914_v4 = vsel %vm627_vm0, %v839_v49, 0.0  ;;  %v845_v49 = vmul.f32 %v2126_v31, %v2126_v31 }
 0x1ad   :  { %v909_v2 = vadd.f32 %v908_v21, %v907_v50  ;;  %v916_v50 = vsel %vm627_vm0, %v840_v11, 0.0  ;;  %v846_v11 = vmul.f32 %v2130_v22, %v2130_v22 }
 0x1af   :  { %v911_v62 = vadd.f32 %v910_v20, %v909_v2  ;;  %v918_v2 = vsel %vm627_vm0, %v841_v23, 0.0  ;;  %v847_v23 = vmul.f32 %v2134_v28, %v2134_v28 }
 0x1b1   :  { %v913_v29 = vadd.f32 %v912_v19, %v911_v62  ;;  %v920_v62 = vsel %vm627_vm0, %v842_v38, 0.0  ;;  %v848_v38 = vmul.f32 %v2138_v48, %v2138_v48 }
 0x1b3   :  { %v915_v33 = vadd.f32 %v914_v4, %v913_v29  ;;  %v922_v29 = vsel %vm627_vm0, %v843_v3, 0.0  ;;  %v849_v3 = vmul.f32 %v2142_v59, %v2142_v59 }
 0x1b5   :  { %v917_v21 = vadd.f32 %v916_v50, %v915_v33  ;;  %v924_v33 = vsel %vm627_vm0, %v844_v35, 0.0  ;;  %v3886_v35 = vld [vmem:[#allocation5_spill] sm:$0xff] }
 0x1b7   :  { %v919_v20 = vadd.f32 %v918_v2, %v917_v21  ;;  %v926_v21 = vsel %vm627_vm0, %v845_v49, 0.0  ;;  %v851_v49 = vmul.f32 %v2150_v52, %v2150_v52 }
 0x1b9   :  { %v921_v19 = vadd.f32 %v920_v62, %v919_v20  ;;  %v928_v20 = vsel %vm627_vm0, %v846_v11, 0.0  ;;  %v3887_v11 = vld [vmem:[#allocation7_spill] sm:$0xff] }
 0x1bb   :  { %v923_v4 = vadd.f32 %v922_v29, %v921_v19  ;;  %v930_v19 = vsel %vm627_vm0, %v847_v23, 0.0  ;;  %v853_v23 = vmul.f32 %v2158_v5, %v2158_v5 }
 0x1bd   :  { %v925_v50 = vadd.f32 %v924_v33, %v923_v4  ;;  %v850_v4 = vmul.f32 %v3886_v35, %v3886_v35  ;;  %v932_v33 = vsel %vm627_vm0, %v848_v38, 0.0  ;;  %v854_v38 = vmul.f32 %v2162_v34, %v2162_v34 }
 0x1bf   :  { %v927_v2 = vadd.f32 %v926_v21, %v925_v50  ;;  %v934_v50 = vsel %vm627_vm0, %v849_v3, 0.0  ;;  %v942_v3 = vsel %vm627_vm0, %v853_v23, 0.0  ;;  %v859_v23 = vmul.f32 %v2182_v25, %v2182_v25 }
 0x1c1   :  { %v929_v62 = vadd.f32 %v928_v20, %v927_v2  ;;  %v852_v2 = vmul.f32 %v3887_v11, %v3887_v11  ;;  %v936_v20 = vsel %vm627_vm0, %v850_v4, 0.0  ;;  %v856_v4 = vmul.f32 %v2170_v1, %v2170_v1 }
 0x1c3   :  { %v931_v29 = vadd.f32 %v930_v19, %v929_v62  ;;  %v938_v62 = vsel %vm627_vm0, %v851_v49, 0.0 }
 0x1c5   :  { %v933_v28 = vadd.f32 %v932_v33, %v931_v29  ;;  %v940_v29 = vsel %vm627_vm0, %v852_v2, 0.0  ;;  %v858_v2 = vmul.f32 %v2178_v51, %v2178_v51 }
 0x1c7   :  { %v935_v21 = vadd.f32 %v934_v50, %v933_v28  ;;  %v855_v28 = vmul.f32 %v2166_v17, %v2166_v17 }
 0x1c9   :  { %v937_v59 = vadd.f32 %v936_v20, %v935_v21  ;;  %v944_v21 = vsel %vm627_vm0, %v854_v38, 0.0  ;;  %v946_v49 = vsel %vm627_vm0, %v855_v28, 0.0  ;;  %v860_v38 = vmul.f32 %v2186_v27, %v2186_v27 }
 0x1ca   :  { %v861_v28 = vmul.f32 %v2190_v36, %v2190_v36 }
 0x1cb   :  { %v939_v19 = vadd.f32 %v938_v62, %v937_v59  ;;  %v857_v59 = vmul.f32 %v2174_v14, %v2174_v14 }
 0x1cd   :  { %v941_v33 = vadd.f32 %v940_v29, %v939_v19  ;;  %v948_v19 = vsel %vm627_vm0, %v856_v4, 0.0  ;;  %v862_v4 = vmul.f32 %v2194_v57, %v2194_v57 }
 0x1cf   :  { %v943_v50 = vadd.f32 %v942_v3, %v941_v33  ;;  %v950_v33 = vsel %vm627_vm0, %v857_v59, 0.0  ;;  %v863_v59 = vmul.f32 %v2198_v37, %v2198_v37 }
 0x1d1   :  { %v945_v20 = vadd.f32 %v944_v21, %v943_v50  ;;  %v952_v50 = vsel %vm627_vm0, %v858_v2, 0.0  ;;  %v864_v2 = vmul.f32 %v2202_v43, %v2202_v43 }
 0x1d3   :  { %v947_v62 = vadd.f32 %v946_v49, %v945_v20  ;;  %v954_v20 = vsel %vm627_vm0, %v859_v23, 0.0  ;;  %v865_v23 = vmul.f32 %v2206_v47, %v2206_v47 }
 0x1d5   :  { %v949_v29 = vadd.f32 %v948_v19, %v947_v62  ;;  %v956_v62 = vsel %vm627_vm0, %v860_v38, 0.0  ;;  %v866_v38 = vmul.f32 %v2210_v41, %v2210_v41 }
 0x1d7   :  { %v951_v3 = vadd.f32 %v950_v33, %v949_v29  ;;  %v958_v29 = vsel %vm627_vm0, %v861_v28, 0.0  ;;  %v867_v28 = vmul.f32 %v2214_v45, %v2214_v45 }
 0x1d9   :  { %v953_v21 = vadd.f32 %v952_v50, %v951_v3  ;;  %v960_v3 = vsel %vm627_vm0, %v862_v4, 0.0  ;;  %v868_v4 = vmul.f32 %v2218_v58, %v2218_v58 }
 0x1db   :  { %v955_v49 = vadd.f32 %v954_v20, %v953_v21  ;;  %v962_v21 = vsel %vm627_vm0, %v863_v59, 0.0  ;;  %v869_v59 = vmul.f32 %v2222_v0, %v2222_v0 }
 0x1dd   :  { %v957_v19 = vadd.f32 %v956_v62, %v955_v49  ;;  %v964_v49 = vsel %vm627_vm0, %v864_v2, 0.0  ;;  %v870_v2 = vmul.f32 %v2226_v55, %v2226_v55 }
 0x1df   :  { %v959_v33 = vadd.f32 %v958_v29, %v957_v19  ;;  %v966_v19 = vsel %vm627_vm0, %v865_v23, 0.0  ;;  %v871_v23 = vmul.f32 %v2230_v61, %v2230_v61 }
 0x1e1   :  { %v961_v50 = vadd.f32 %v960_v3, %v959_v33  ;;  %v968_v33 = vsel %vm627_vm0, %v866_v38, 0.0  ;;  %v872_v38 = vmul.f32 %v2234_v10, %v2234_v10 }
 0x1e3   :  { %v963_v20 = vadd.f32 %v962_v21, %v961_v50  ;;  %v970_v50 = vsel %vm627_vm0, %v867_v28, 0.0  ;;  %v873_v28 = vmul.f32 %v2238_v16, %v2238_v16 }
 0x1e5   :  { %v965_v62 = vadd.f32 %v964_v49, %v963_v20  ;;  %v972_v20 = vsel %vm627_vm0, %v868_v4, 0.0  ;;  %v874_v4 = vmul.f32 %v2242_v7, %v2242_v7 }
 0x1e7   :  { %v967_v29 = vadd.f32 %v966_v19, %v965_v62  ;;  %v974_v62 = vsel %vm627_vm0, %v869_v59, 0.0  ;;  %v875_v59 = vmul.f32 %v2246_v13, %v2246_v13 }
 0x1e9   :  { %v969_v3 = vadd.f32 %v968_v33, %v967_v29  ;;  %v976_v29 = vsel %vm627_vm0, %v870_v2, 0.0  ;;  %v876_v2 = vmul.f32 %v2250_v26, %v2250_v26 }
 0x1eb   :  { %v971_v21 = vadd.f32 %v970_v50, %v969_v3  ;;  %v978_v3 = vsel %vm627_vm0, %v871_v23, 0.0  ;;  %v877_v23 = vmul.f32 %v2254_v32, %v2254_v32 }
 0x1ed   :  { %v973_v49 = vadd.f32 %v972_v20, %v971_v21  ;;  %v980_v21 = vsel %vm627_vm0, %v872_v38, 0.0  ;;  %v3888_v38 = vld [vmem:[#allocation13_spill] sm:$0xff] }
 0x1ef   :  { %v975_v19 = vadd.f32 %v974_v62, %v973_v49  ;;  %v982_v49 = vsel %vm627_vm0, %v873_v28, 0.0  ;;  %v3889_v28 = vld [vmem:[#allocation8_spill] sm:$0xff] }
 0x1f1   :  { %v977_v33 = vadd.f32 %v976_v29, %v975_v19  ;;  %v984_v19 = vsel %vm627_vm0, %v874_v4, 0.0  ;;  %v3890_v4 = vld [vmem:[#allocation11_spill] sm:$0xff] }
 0x1f3   :  { %v979_v50 = vadd.f32 %v978_v3, %v977_v33  ;;  %v986_v33 = vsel %vm627_vm0, %v875_v59, 0.0  ;;  %v3891_v59 = vld [vmem:[#allocation15_spill] sm:$0xff] }
 0x1f5   :  { %v981_v20 = vadd.f32 %v980_v21, %v979_v50  ;;  %v878_v50 = vmul.f32 %v3888_v38, %v3888_v38  ;;  %v988_v21 = vsel %vm627_vm0, %v876_v2, 0.0  ;;  %v882_v2 = vmul.f32 %v2274_v39, %v2274_v39 }
 0x1f7   :  { %v983_v62 = vadd.f32 %v982_v49, %v981_v20  ;;  %v879_v20 = vmul.f32 %v3889_v28, %v3889_v28  ;;  %v990_v49 = vsel %vm627_vm0, %v877_v23, 0.0 }
 0x1f9   :  { %v985_v29 = vadd.f32 %v984_v19, %v983_v62  ;;  %v880_v62 = vmul.f32 %v3890_v4, %v3890_v4  ;;  %v992_v19 = vsel %vm627_vm0, %v878_v50, 0.0  ;;  %v1000_v50 = vsel %vm627_vm0, %v882_v2, 0.0  ;;  %v3894_v2 = vld [vmem:[#allocation23_spill] sm:$0xff] }
 0x1fb   :  { %v987_v3 = vadd.f32 %v986_v33, %v985_v29  ;;  %v881_v29 = vmul.f32 %v3891_v59, %v3891_v59  ;;  %v994_v33 = vsel %vm627_vm0, %v879_v20, 0.0 }
 0x1fd   :  { %v989_v13 = vadd.f32 %v988_v21, %v987_v3  ;;  %v996_v3 = vsel %vm627_vm0, %v880_v62, 0.0  ;;  %v998_v23 = vsel %vm627_vm0, %v881_v29, 0.0  ;;  %v3892_v62 = vld [vmem:[#allocation12_spill] sm:$0xff] }
 0x1fe   :  { %v3893_v29 = vld [vmem:[#allocation16_spill] sm:$0xff] }
 0x1ff   :  { %v991_v26 = vadd.f32 %v990_v49, %v989_v13  ;;  %v883_v13 = vmul.f32 %v2278_v53, %v2278_v53 }
 0x201   :  { %v993_v32 = vadd.f32 %v992_v19, %v991_v26  ;;  %v884_v26 = vmul.f32 %v2282_v18, %v2282_v18  ;;  %v1002_v20 = vsel %vm627_vm0, %v883_v13, 0.0  ;;  %v3895_v13 = vld [vmem:[#allocation24_spill] sm:$0xff] }
 0x203   :  { %v995_v38 = vadd.f32 %v994_v33, %v993_v32  ;;  %v885_v32 = vmul.f32 %v2286_v30, %v2286_v30 }
 0x205   :  { %v997_v21 = vadd.f32 %v996_v3, %v995_v38  ;;  %v886_v38 = vmul.f32 %v3892_v62, %v3892_v62  ;;  %v1004_v3 = vsel %vm627_vm0, %v884_v26, 0.0  ;;  %v3896_v26 = vld [vmem:[#allocation25_spill] sm:$0xff] }
 0x207   :  { %v999_v49 = vadd.f32 %v998_v23, %v997_v21  ;;  %v887_v21 = vmul.f32 %v3893_v29, %v3893_v29  ;;  %v1006_v23 = vsel %vm627_vm0, %v885_v32, 0.0 }
 0x209   :  { %v1001_v19 = vadd.f32 %v1000_v50, %v999_v49  ;;  %v888_v49 = vmul.f32 %v3894_v2, %v3894_v2  ;;  %v1008_v50 = vsel %vm627_vm0, %v886_v38, 0.0 }
 0x20b   :  { %v1003_v33 = vadd.f32 %v1002_v20, %v1001_v19  ;;  %v889_v19 = vmul.f32 %v3895_v13, %v3895_v13  ;;  %v1010_v20 = vsel %vm627_vm0, %v887_v21, 0.0 }
 0x20d   :  { %v1005_v53 = vadd.f32 %v1004_v3, %v1003_v33  ;;  %v890_v33 = vmul.f32 %v3896_v26, %v3896_v26  ;;  %v1012_v3 = vsel %vm627_vm0, %v888_v49, 0.0 }
 0x20f   :  { %v1007_v18 = vadd.f32 %v1006_v23, %v1005_v53  ;;  %v1014_v53 = vsel %vm627_vm0, %v889_v19, 0.0  ;;  %v1016_v23 = vsel %vm627_vm0, %v890_v33, 0.0  ;;  %v3897_v33 = vld [vmem:[#allocation19_spill] sm:$0xff] }
 0x211   :  { %v1009_v30 = vadd.f32 %v1008_v50, %v1007_v18 }
 0x213   :  { %v1011_v62 = vadd.f32 %v1010_v20, %v1009_v30  ;;  %v1030_v20 = vlaneseq }
 0x215   :  { %v1013_v29 = vadd.f32 %v1012_v3, %v1011_v62  ;;  %v1031_v26 = vshrl.u32 %v1030_v20, 7  ;;  %v1025_v62 = vld [vmem:[%s3762_s2] sm:$0x1]  ;;  %v3898_v3 = vld [vmem:[#allocation20_spill] sm:$0xff] }
 0x217   :  { %v1015_v32 = vadd.f32 %v1014_v53, %v1013_v29  ;;  %v1032_v49 = vsub.s32 0, %v1031_v26  ;;  %v3900_v53 = vld [vmem:[#allocation22_spill] sm:$0xff] }
 0x219   :  { %v1017_v2 = vadd.f32 %v1016_v23, %v1015_v32 }
 0x21b   :  { %v1018_v38 = vrot.slane %v1017_v2, 4 }
 0x21d   :  { %v1019_v18 = vadd.f32 %v1018_v38, %v1017_v2 }
 0x21f   :  { %v1020_v50 = vrot.slane %v1019_v18, 2 }
 0x221   :  { %v1021_v39 = vadd.f32 %v1020_v50, %v1019_v18  ;;  %v3901_v50 = vld [vmem:[#allocation2_spill] sm:$0xff] }
 0x223   :  { %v1022_v13 = vrot.slane %v1021_v39, 1 }
 0x225   :  { %v1023_v59 = vadd.f32 %v1022_v13, %v1021_v39 }
 0x227   :  { %v1024_v21 = vmul.f32 0.001953125, %v1023_v59  ;;  %v3899_v59 = vld [vmem:[#allocation21_spill] sm:$0xff] }
 0x229   :  { %v1026_v30 = vadd.f32 1e-05, %v1024_v21  ;;  %v3902_v21 = vld [vmem:[#allocation3_spill] sm:$0xff] }
 0x22b   :  { %1647 = vrsqrt.f32 %v1026_v30 }
 0x235   :  { %v1648_v4 = vpop.eup %1647 }
 0x236   :  { %v1028_v29 = vmul.f32 %v1648_v4, %v1025_v62  ;;  %v3903_v62 = vld [vmem:[#allocation4_spill] sm:$0xff] }
 0x238   :  { %v2503_v19 = vrot.slane %v1028_v29, %v1032_v49  ;;  %v3904_v29 = vld [vmem:[#allocation6_spill] sm:$0xff] }
 0x239   :  { %v3905_v49 = vld [vmem:[#allocation10_spill] sm:$0xff] }
 0x23a   :  { %v2507_v2 = vmul.f32 %v2503_v19, %v3897_v33  ;;  %v2511_v39 = vmul.f32 %v2503_v19, %v3898_v3  ;;  %v2515_v13 = vmul.f32 %v2503_v19, %v3899_v59  ;;  %v2519_v32 = vmul.f32 %v2503_v19, %v3900_v53  ;;  %v3906_v33 = vld [vmem:[#allocation13_spill] sm:$0xff]  ;;  %v3909_v3 = vld [vmem:[#allocation11_spill] sm:$0xff] }
 0x23b   :  { %v2523_v4 = vmul.f32 %v2503_v19, %v2070_v9  ;;  %v2527_v26 = vmul.f32 %v2503_v19, %v2074_v42  ;;  %v2531_v23 = vmul.f32 %v2503_v19, %v2078_v46  ;;  %v2535_v38 = vmul.f32 %v2503_v19, %v2082_v40  ;;  %v3911_v53 = vld [vmem:[#allocation15_spill] sm:$0xff] }
 0x23c   :  { %v2539_v18 = vmul.f32 %v2503_v19, %v2086_v44  ;;  %v2543_v9 = vmul.f32 %v2503_v19, %v2090_v56  ;;  %v2547_v42 = vmul.f32 %v2503_v19, %v2094_v63  ;;  %v2551_v46 = vmul.f32 %v2503_v19, %v2098_v54 }
 0x23d   :  { %v2555_v40 = vmul.f32 %v2503_v19, %v2102_v60  ;;  %v2559_v44 = vmul.f32 %v2503_v19, %v2106_v8  ;;  %v2563_v56 = vmul.f32 %v2503_v19, %v2110_v15  ;;  %v2567_v63 = vmul.f32 %v2503_v19, %v2114_v6 }
 0x23e   :  { %v2571_v54 = vmul.f32 %v2503_v19, %v2118_v12  ;;  %v2575_v60 = vmul.f32 %v2503_v19, %v2122_v24  ;;  %v2579_v8 = vmul.f32 %v2503_v19, %v2126_v31  ;;  %v2583_v15 = vmul.f32 %v2503_v19, %v2130_v22 }
 0x23f   :  { %v2587_v6 = vmul.f32 %v2503_v19, %v3901_v50  ;;  %v2591_v12 = vmul.f32 %v2503_v19, %v2138_v48  ;;  %v2595_v24 = vmul.f32 %v2503_v19, %v3902_v21  ;;  %v2599_v31 = vmul.f32 %v2503_v19, %v3886_v35  ;;  %v2728_v21 = vld [vmem:[%s3763_s3] ss:$0 sm:$0xff] }
 0x240   :  { %v2603_v22 = vmul.f32 %v2503_v19, %v2150_v52  ;;  %v2607_v30 = vmul.f32 %v2503_v19, %v3887_v11  ;;  %v2611_v48 = vmul.f32 %v2503_v19, %v2158_v5  ;;  %v2615_v20 = vmul.f32 %v2503_v19, %v2162_v34 }
 0x241   :  { %v2619_v35 = vmul.f32 %v2503_v19, %v2166_v17  ;;  %v2623_v52 = vmul.f32 %v2503_v19, %v2170_v1  ;;  %v2627_v11 = vmul.f32 %v2503_v19, %v2174_v14  ;;  %v2631_v5 = vmul.f32 %v2503_v19, %v2178_v51 }
 0x242   :  { %v2635_v34 = vmul.f32 %v2503_v19, %v2182_v25  ;;  %v2639_v17 = vmul.f32 %v2503_v19, %v2186_v27  ;;  %v2643_v1 = vmul.f32 %v2503_v19, %v2190_v36  ;;  %v2647_v14 = vmul.f32 %v2503_v19, %v2194_v57 }
 0x243   :  { %v2651_v51 = vmul.f32 %v2503_v19, %v2198_v37  ;;  %v2655_v25 = vmul.f32 %v2503_v19, %v2202_v43  ;;  %v2659_v27 = vmul.f32 %v2503_v19, %v2206_v47  ;;  %v2663_v36 = vmul.f32 %v2503_v19, %v2210_v41 }
 0x244   :  { %v2667_v57 = vmul.f32 %v2503_v19, %v2214_v45  ;;  %v2671_v37 = vmul.f32 %v2503_v19, %v2218_v58  ;;  %v2675_v43 = vmul.f32 %v2503_v19, %v2222_v0  ;;  %v2679_v47 = vmul.f32 %v2503_v19, %v2226_v55 }
 0x245   :  { %v2683_v41 = vmul.f32 %v2503_v19, %v2230_v61  ;;  %v2687_v45 = vmul.f32 %v2503_v19, %v2234_v10  ;;  %v2691_v58 = vmul.f32 %v2503_v19, %v2238_v16  ;;  %v2695_v0 = vmul.f32 %v2503_v19, %v2242_v7 }
 0x246   :  { %v2699_v55 = vmul.f32 %v2503_v19, %v3903_v62  ;;  %v2703_v61 = vmul.f32 %v2503_v19, %v3904_v29  ;;  %v2707_v10 = vmul.f32 %v2503_v19, %v3905_v49  ;;  %v2711_v16 = vmul.f32 %v2503_v19, %v3906_v33  ;;  %v3913_v62 = vld [vmem:[#allocation18_spill] sm:$0xff]  ;;  %v3915_v49 = vld [vmem:[#allocation17_spill] sm:$0xff] }
 0x247   :  { %v2715_v7 = vmul.f32 %v2503_v19, %v3889_v28  ;;  %v2719_v59 = vmul.f32 %v2503_v19, %v3909_v3  ;;  %v2723_v50 = vmul.f32 %v2503_v19, %v3911_v53  ;;  %v2732_v29 = vmul.f32 %v2503_v19, %v3913_v62  ;;  %v3917_v33 = vld [vmem:[#allocation14_spill] sm:$0xff] }
 0x248   :  { %3907 = vst [vmem:[#allocation5_spill] sm:$0xff] %v2711_v16  ;;  %v2736_v28 = vmul.f32 %v2503_v19, %v3915_v49  ;;  %v2740_v3 = vmul.f32 %v2503_v19, %v3917_v33  ;;  %v3921_v16 = vld [vmem:[#allocation16_spill] sm:$0xff] }
 0x249   :  { %3908 = vst [vmem:[#allocation7_spill] sm:$0xff] %v2715_v7  ;;  %3910 = vst [vmem:[#allocation8_spill] sm:$0xff] %v2719_v59  ;;  %v3919_v59 = vld [vmem:[#allocation9_spill] sm:$0xff]  ;;  %v2752_v62 = vmul.f32 %v2503_v19, %v3921_v16  ;;  %v2772_v16 = vadd.f32 %v2728_v21, %v2511_v39  ;;  %v2792_v39 = vadd.f32 %v2728_v21, %v2531_v23 }
 0x24a   :  { %3912 = vst [vmem:[#allocation19_spill] sm:$0xff] %v2723_v50  ;;  %3914 = vst [vmem:[#allocation20_spill] sm:$0xff] %v2732_v29  ;;  %v2744_v53 = vmul.f32 %v2503_v19, %v3919_v59  ;;  %v3920_v50 = vld [vmem:[#allocation12_spill] sm:$0xff]  ;;  %v3922_v29 = vld [vmem:[#allocation23_spill] sm:$0xff]  ;;  %v2812_v23 = vadd.f32 %v2728_v21, %v2551_v46  ;;  %v2832_v46 = vadd.f32 %v2728_v21, %v2571_v54 }
 0x24b   :  { %3916 = vst [vmem:[#allocation21_spill] sm:$0xff] %v2736_v28  ;;  %3918 = vst [vmem:[#allocation22_spill] sm:$0xff] %v2740_v3  ;;  %v2748_v7 = vmul.f32 %v2503_v19, %v3920_v50  ;;  %v2756_v49 = vmul.f32 %v2503_v19, %v3922_v29  ;;  %v3923_v28 = vld [vmem:[#allocation24_spill] sm:$0xff]  ;;  %v3924_v3 = vld [vmem:[#allocation25_spill] sm:$0xff]  ;;  %v2768_v50 = vadd.f32 %v2728_v21, %v2507_v2  ;;  %vm1171_vm2 = vcmp.gt.f32.partialorder %v2772_v16, 0.0 }
 0x24c   :  { %v2760_v33 = vmul.f32 %v2503_v19, %v3923_v28  ;;  %v2764_v59 = vmul.f32 %v2503_v19, %v3924_v3  ;;  %v2776_v29 = vadd.f32 %v2728_v21, %v2515_v13  ;;  %v2780_v28 = vadd.f32 %v2728_v21, %v2519_v32 }
 0x24d   :  { %v2784_v19 = vadd.f32 %v2728_v21, %v2523_v4  ;;  %v2788_v2 = vadd.f32 %v2728_v21, %v2527_v26  ;;  %v2796_v13 = vadd.f32 %v2728_v21, %v2535_v38  ;;  %v2800_v32 = vadd.f32 %v2728_v21, %v2539_v18 }
 0x24e   :  { %v2804_v4 = vadd.f32 %v2728_v21, %v2543_v9  ;;  %v2808_v26 = vadd.f32 %v2728_v21, %v2547_v42  ;;  %v2816_v38 = vadd.f32 %v2728_v21, %v2555_v40  ;;  %v2820_v18 = vadd.f32 %v2728_v21, %v2559_v44 }
 0x24f   :  { %v2824_v9 = vadd.f32 %v2728_v21, %v2563_v56  ;;  %v2828_v42 = vadd.f32 %v2728_v21, %v2567_v63  ;;  %v2836_v40 = vadd.f32 %v2728_v21, %v2575_v60  ;;  %v2840_v44 = vadd.f32 %v2728_v21, %v2579_v8  ;;  %v3930_v3 = vld [vmem:[#allocation5_spill] sm:$0xff] }
 0x250   :  { %v2844_v56 = vadd.f32 %v2728_v21, %v2583_v15  ;;  %v2848_v63 = vadd.f32 %v2728_v21, %v2587_v6  ;;  %v2852_v54 = vadd.f32 %v2728_v21, %v2591_v12  ;;  %v2856_v60 = vadd.f32 %v2728_v21, %v2595_v24 }
 0x251   :  { %v2860_v8 = vadd.f32 %v2728_v21, %v2599_v31  ;;  %v2864_v15 = vadd.f32 %v2728_v21, %v2603_v22  ;;  %v2868_v6 = vadd.f32 %v2728_v21, %v2607_v30  ;;  %v2872_v12 = vadd.f32 %v2728_v21, %v2611_v48 }
 0x252   :  { %v2876_v24 = vadd.f32 %v2728_v21, %v2615_v20  ;;  %v2880_v31 = vadd.f32 %v2728_v21, %v2619_v35  ;;  %v2884_v22 = vadd.f32 %v2728_v21, %v2623_v52  ;;  %v2888_v30 = vadd.f32 %v2728_v21, %v2627_v11 }
 0x253   :  { %v2892_v48 = vadd.f32 %v2728_v21, %v2631_v5  ;;  %v2896_v20 = vadd.f32 %v2728_v21, %v2635_v34  ;;  %v2900_v35 = vadd.f32 %v2728_v21, %v2639_v17  ;;  %v2904_v52 = vadd.f32 %v2728_v21, %v2643_v1 }
 0x254   :  { %v2908_v11 = vadd.f32 %v2728_v21, %v2647_v14  ;;  %v2912_v5 = vadd.f32 %v2728_v21, %v2651_v51  ;;  %v2916_v34 = vadd.f32 %v2728_v21, %v2655_v25  ;;  %v2920_v17 = vadd.f32 %v2728_v21, %v2659_v27 }
 0x255   :  { %v2924_v1 = vadd.f32 %v2728_v21, %v2663_v36  ;;  %v2928_v14 = vadd.f32 %v2728_v21, %v2667_v57  ;;  %v2932_v51 = vadd.f32 %v2728_v21, %v2671_v37  ;;  %v2936_v25 = vadd.f32 %v2728_v21, %v2675_v43 }
 0x256   :  { %v2940_v27 = vadd.f32 %v2728_v21, %v2679_v47  ;;  %v2944_v36 = vadd.f32 %v2728_v21, %v2683_v41  ;;  %v2948_v57 = vadd.f32 %v2728_v21, %v2687_v45  ;;  %v2952_v37 = vadd.f32 %v2728_v21, %v2691_v58 }
 0x257   :  { %v2956_v43 = vadd.f32 %v2728_v21, %v2695_v0  ;;  %v2960_v47 = vadd.f32 %v2728_v21, %v2699_v55  ;;  %v2964_v41 = vadd.f32 %v2728_v21, %v2703_v61  ;;  %v2968_v45 = vadd.f32 %v2728_v21, %v2707_v10 }
 0x258   :  { %3925 = vst [vmem:[#allocation2_spill] sm:$0xff] %v2952_v37  ;;  %v2972_v58 = vadd.f32 %v2728_v21, %v3930_v3  ;;  %v3932_v37 = vld [vmem:[#allocation7_spill] sm:$0xff]  ;;  %vm1170_vm1 = vcmp.gt.f32.partialorder %v2768_v50, 0.0  ;;  %vm1172_vm3 = vcmp.gt.f32.partialorder %v2776_v29, 0.0  ;;  %vm1173_vm4 = vcmp.gt.f32.partialorder %v2780_v28, 0.0 }
 0x259   :  { %3926 = vst [vmem:[#allocation3_spill] sm:$0xff] %v2956_v43  ;;  %3927 = vst [vmem:[#allocation4_spill] sm:$0xff] %v2960_v47  ;;  %v2976_v0 = vadd.f32 %v2728_v21, %v3932_v37  ;;  %v3933_v43 = vld [vmem:[#allocation8_spill] sm:$0xff]  ;;  %v3935_v47 = vld [vmem:[#allocation19_spill] sm:$0xff]  ;;  %vm1174_vm5 = vcmp.gt.f32.partialorder %v2784_v19, 0.0  ;;  %vm1175_vm6 = vcmp.gt.f32.partialorder %v2788_v2, 0.0 }
 0x25a   :  { %3928 = vst [vmem:[#allocation6_spill] sm:$0xff] %v2964_v41  ;;  %3929 = vst [vmem:[#allocation10_spill] sm:$0xff] %v2968_v45  ;;  %v2980_v55 = vadd.f32 %v2728_v21, %v3933_v43  ;;  %v2984_v61 = vadd.f32 %v2728_v21, %v3935_v47  ;;  %v3937_v41 = vld [vmem:[#allocation20_spill] sm:$0xff]  ;;  %v3939_v45 = vld [vmem:[#allocation21_spill] sm:$0xff]  ;;  %v3000_v43 = vadd.f32 %v2728_v21, %v2744_v53  ;;  %vm1176_vm7 = vcmp.gt.f32.partialorder %v2792_v39, 0.0 }
 0x25b   :  { %3931 = vst [vmem:[#allocation13_spill] sm:$0xff] %v2972_v58  ;;  %v2988_v10 = vadd.f32 %v2728_v21, %v3937_v41  ;;  %v2992_v3 = vadd.f32 %v2728_v21, %v3939_v45  ;;  %v3941_v58 = vld [vmem:[#allocation22_spill] sm:$0xff]  ;;  %v3004_v47 = vadd.f32 %v2728_v21, %v2748_v7  ;;  %v3008_v41 = vadd.f32 %v2728_v21, %v2752_v62 }
 0x25c   :  { %3934 = vst [vmem:[#allocation11_spill] sm:$0xff] %v2980_v55  ;;  %3936 = vst [vmem:[#allocation15_spill] sm:$0xff] %v2984_v61  ;;  %v2996_v37 = vadd.f32 %v2728_v21, %v3941_v58  ;;  %v3012_v45 = vadd.f32 %v2728_v21, %v2756_v49  ;;  %vm1177_vm8 = vcmp.gt.f32.partialorder %v2796_v13, 0.0  ;;  %vm1178_vm9 = vcmp.gt.f32.partialorder %v2800_v32, 0.0 }
 0x25d   :  { %3938 = vst [vmem:[#allocation18_spill] sm:$0xff] %v2988_v10  ;;  %3940 = vst [vmem:[#allocation17_spill] sm:$0xff] %v2992_v3  ;;  %v3025_v7 = vadd.f32 %v2728_v21, %v2760_v33  ;;  %vm1179_vm10 = vcmp.gt.f32.partialorder %v2804_v4, 0.0  ;;  %v1234_v53 = vmul.f32 0.2, %v2768_v50  ;;  %v3033_v58 = vadd.f32 %v2728_v21, %v2764_v59 }
 0x25e   :  { %3942 = vst [vmem:[#allocation14_spill] sm:$0xff] %v2996_v37  ;;  %3943 = vst [vmem:[#allocation9_spill] sm:$0xff] %v3000_v43  ;;  %v1235_v62 = vmul.f32 0.2, %v2772_v16  ;;  %v1236_v49 = vmul.f32 0.2, %v2776_v29 }
 0x25f   :  { %3944 = vst [vmem:[#allocation12_spill] sm:$0xff] %v3004_v47  ;;  %3945 = vst [vmem:[#allocation16_spill] sm:$0xff] %v3008_v41  ;;  %vm1180_vm11 = vcmp.gt.f32.partialorder %v2808_v26, 0.0  ;;  %v1238_v41 = vmul.f32 0.2, %v2784_v19  ;;  %vm1181_vm12 = vcmp.gt.f32.partialorder %v2812_v23, 0.0  ;;  %v1298_v21 = vsel %vm1170_vm1, %v2768_v50, %v1234_v53 }
 0x260   :  { %3946 = vst [vmem:[#allocation23_spill] sm:$0xff] %v3012_v45  ;;  %3947 = vst [vmem:[#allocation24_spill] sm:$0xff] %v3025_v7  ;;  %v1237_v45 = vmul.f32 0.2, %v2780_v28  ;;  %v1239_v33 = vmul.f32 0.2, %v2788_v2  ;;  %v1299_v3 = vsel %vm1171_vm2, %v2772_v16, %v1235_v62  ;;  %v1300_v16 = vsel %vm1172_vm3, %v2776_v29, %v1236_v49 }
 0x261   :  { %3948 = vst [vmem:[#allocation25_spill] sm:$0xff] %v3033_v58  ;;  %v1240_v7 = vmul.f32 0.2, %v2792_v39  ;;  %v1241_v47 = vmul.f32 0.2, %v2796_v13  ;;  %vm1182_vm13 = vcmp.gt.f32.partialorder %v2816_v38, 0.0 }
 0x262   :  { %v1242_v43 = vmul.f32 0.2, %v2800_v32  ;;  %v1243_v59 = vmul.f32 0.2, %v2804_v4  ;;  %v3049_v58 = vmul.f32 0.2, %v2808_v26  ;;  %v1301_v29 = vsel %vm1173_vm4, %v2780_v28, %v1237_v45 }
 0x263   :  { %v3052_v37 = vmul.f32 0.2, %v2812_v23  ;;  %1362 = vst.msk [vmem:[%s3764_s4] sm:$0xff] %vm627_vm0, %v1298_v21  ;;  %vm1183_vm14 = vcmp.gt.f32.partialorder %v2820_v18, 0.0  ;;  %v3063_v50 = vmul.f32 0.2, %v2816_v38  ;;  %v1302_v28 = vsel %vm1174_vm5, %v2784_v19, %v1238_v41 }
 0x264   :  { %v3066_v53 = vmul.f32 0.2, %v2820_v18  ;;  %v3069_v10 = vmul.f32 0.2, %v2824_v9  ;;  %1363 = vst.msk [vmem:[%s3764_s4 + $0x8] sm:$0xff] %vm627_vm0, %v1299_v3  ;;  %vm1184_vm15 = vcmp.gt.f32.partialorder %v2824_v9, 0.0  ;;  %v1303_v19 = vsel %vm1175_vm6, %v2788_v2, %v1239_v33 }
 0x265   :  { %v3080_v62 = vmul.f32 0.2, %v2828_v42  ;;  %v3083_v21 = vmul.f32 0.2, %v2832_v46  ;;  %v3086_v61 = vmul.f32 0.2, %v2836_v40  ;;  %v1304_v2 = vsel %vm1176_vm7, %v2792_v39, %v1240_v7 }
 0x266   :  { %1364 = vst.msk [vmem:[%s3764_s4 + $0x10] sm:$0xff] %vm627_vm0, %v1300_v16  ;;  %vm1185_vm1 = vcmp.gt.f32.partialorder %v2828_v42, 0.0  ;;  %v3097_v3 = vmul.f32 0.2, %v2840_v44  ;;  %v3100_v49 = vmul.f32 0.2, %v2844_v56  ;;  %v1305_v39 = vsel %vm1177_vm8, %v2796_v13, %v1241_v47 }
 0x267   :  { %3949 = vst [vmem:[#allocation5_spill] sm:$0xff] %v3083_v21  ;;  %v3103_v21 = vmul.f32 0.2, %v2848_v63  ;;  %1365 = vst.msk [vmem:[%s3764_s4 + $0x18] sm:$0xff] %vm627_vm0, %v1301_v29  ;;  %vm1186_vm2 = vcmp.gt.f32.partialorder %v2832_v46, 0.0  ;;  %vm1187_vm3 = vcmp.gt.f32.partialorder %v2836_v40, 0.0  ;;  %v1306_v13 = vsel %vm1178_vm9, %v2800_v32, %v1242_v43 }
 0x268   :  { %3950 = vst [vmem:[#allocation7_spill] sm:$0xff] %v3100_v49  ;;  %v3114_v45 = vmul.f32 0.2, %v2852_v54  ;;  %v3117_v16 = vmul.f32 0.2, %v2856_v60  ;;  %1366 = vst.msk [vmem:[%s3764_s4 + $0x20] sm:$0xff] %vm627_vm0, %v1302_v28  ;;  %v1307_v43 = vsel %vm1179_vm10, %v2804_v4, %v1243_v59  ;;  %v1308_v59 = vsel %vm1180_vm11, %v2808_v26, %v3049_v58 }
 0x269   :  { %v3120_v49 = vmul.f32 0.2, %v2860_v8  ;;  %v3131_v41 = vmul.f32 0.2, %v2864_v15  ;;  %v3134_v29 = vmul.f32 0.2, %v2868_v6  ;;  %v1309_v58 = vsel %vm1181_vm12, %v2812_v23, %v3052_v37 }
 0x26a   :  { %3951 = vst [vmem:[#allocation8_spill] sm:$0xff] %v3117_v16  ;;  %v3137_v16 = vmul.f32 0.2, %v2872_v12  ;;  %1367 = vst.msk [vmem:[%s3764_s4 + $0x28] sm:$0xff] %vm627_vm0, %v1303_v19  ;;  %vm1188_vm4 = vcmp.gt.f32.partialorder %v2840_v44, 0.0  ;;  %vm1192_vm8 = vcmp.gt.f32.partialorder %v2856_v60, 0.0  ;;  %v1310_v37 = vsel %vm1182_vm13, %v2816_v38, %v3063_v50 }
 0x26b   :  { %3952 = vst [vmem:[#allocation19_spill] sm:$0xff] %v3134_v29  ;;  %v3148_v33 = vmul.f32 0.2, %v2876_v24  ;;  %v3151_v28 = vmul.f32 0.2, %v2880_v31  ;;  %1368 = vst.msk [vmem:[%s3764_s4 + $0x30] sm:$0xff] %vm627_vm0, %v1304_v2 }
 0x26c   :  { %v3154_v29 = vmul.f32 0.2, %v2884_v22  ;;  %v3167_v7 = vmul.f32 0.2, %v2888_v30  ;;  %v3170_v19 = vmul.f32 0.2, %v2892_v48 }
 0x26d   :  { %1369 = vst.msk [vmem:[%s3764_s4 + $0x38] sm:$0xff] %vm627_vm0, %v1305_v39  ;;  %v3187_v47 = vmul.f32 0.2, %v2900_v35  ;;  %v3190_v2 = vmul.f32 0.2, %v2904_v52  ;;  %1370 = vst.msk [vmem:[%s3764_s4 + $0x40] sm:$0xff] %vm627_vm0, %v1306_v13 }
 0x26e   :  { %3953 = vst [vmem:[#allocation20_spill] sm:$0xff] %v3154_v29  ;;  %v3173_v29 = vmul.f32 0.2, %v2896_v20  ;;  %v3193_v32 = vmul.f32 0.2, %v2908_v11  ;;  %vm1196_vm9 = vcmp.gt.f32.partialorder %v2872_v12, 0.0 }
 0x26f   :  { %v3207_v39 = vmul.f32 0.2, %v2912_v5  ;;  %v3213_v4 = vmul.f32 0.2, %v2920_v17  ;;  %1371 = vst.msk [vmem:[%s3764_s4 + $0x48] sm:$0xff] %vm627_vm0, %v1307_v43  ;;  %vm1200_vm10 = vcmp.gt.f32.partialorder %v2888_v30, 0.0 }
 0x270   :  { %3954 = vst [vmem:[#allocation21_spill] sm:$0xff] %v3193_v32  ;;  %v3210_v32 = vmul.f32 0.2, %v2916_v34  ;;  %v3228_v13 = vmul.f32 0.2, %v2924_v1  ;;  %1372 = vst.msk [vmem:[%s3764_s4 + $0x50] sm:$0xff] %vm627_vm0, %v1308_v59 }
 0x271   :  { %3955 = vst [vmem:[#allocation22_spill] sm:$0xff] %v3213_v4  ;;  %v3231_v4 = vmul.f32 0.2, %v2928_v14  ;;  %v3234_v26 = vmul.f32 0.2, %v2932_v51  ;;  %vm1204_vm11 = vcmp.gt.f32.partialorder %v2904_v52, 0.0 }
 0x272   :  { %v3249_v43 = vmul.f32 0.2, %v2936_v25  ;;  %v3255_v23 = vmul.f32 0.2, %v2944_v36  ;;  %1373 = vst.msk [vmem:[%s3764_s4 + $0x58] sm:$0xff] %vm627_vm0, %v1309_v58  ;;  %vm1208_vm12 = vcmp.gt.f32.partialorder %v2920_v17, 0.0  ;;  %v1311_v58 = vsel %vm1183_vm14, %v2820_v18, %v3066_v53 }
 0x273   :  { %3956 = vst [vmem:[#allocation26_spill] sm:$0xff] %v3234_v26  ;;  %v3252_v26 = vmul.f32 0.2, %v2940_v27  ;;  %v3270_v59 = vmul.f32 0.2, %v2948_v57  ;;  %v3963_v38 = vld [vmem:[#allocation3_spill] sm:$0xff] }
 0x274   :  { %3957 = vst [vmem:[#allocation27_spill] sm:$0xff] %v3249_v43  ;;  %3959 = vst [vmem:[#allocation29_spill] sm:$0xff] %v3255_v23  ;;  %v3961_v23 = vld [vmem:[#allocation2_spill] sm:$0xff]  ;;  %v3276_v50 = vmul.f32 0.2, %v3963_v38  ;;  %vm1212_vm13 = vcmp.gt.f32.partialorder %v2936_v25, 0.0 }
 0x275   :  { %3958 = vst [vmem:[#allocation28_spill] sm:$0xff] %v3252_v26  ;;  %3960 = vst [vmem:[#allocation30_spill] sm:$0xff] %v3270_v59  ;;  %v3273_v26 = vmul.f32 0.2, %v3961_v23  ;;  %v3967_v59 = vld [vmem:[#allocation6_spill] sm:$0xff]  ;;  %vm1216_vm14 = vcmp.gt.f32.partialorder %v3961_v23, 0.0 }
 0x276   :  { %3964 = vst [vmem:[#allocation3_spill] sm:$0xff] %v3276_v50  ;;  %1374 = vst.msk [vmem:[%s3764_s4 + $0x60] sm:$0xff] %vm627_vm0, %v1310_v37  ;;  %v3294_v43 = vmul.f32 0.2, %v3967_v59  ;;  %v3969_v18 = vld [vmem:[#allocation10_spill] sm:$0xff]  ;;  %v1312_v37 = vsel %vm1184_vm15, %v2824_v9, %v3069_v10  ;;  %v1313_v10 = vsel %vm1185_vm1, %v2828_v42, %v3080_v62  ;;  %v3979_v42 = vld [vmem:[#allocation17_spill] sm:$0xff] }
 0x277   :  { %3962 = vst [vmem:[#allocation2_spill] sm:$0xff] %v3273_v26  ;;  %v3965_v26 = vld [vmem:[#allocation4_spill] sm:$0xff]  ;;  %v3297_v53 = vmul.f32 0.2, %v3969_v18  ;;  %1375 = vst.msk [vmem:[%s3764_s4 + $0x68] sm:$0xff] %vm627_vm0, %v1311_v58  ;;  %vm1220_vm15 = vcmp.gt.f32.partialorder %v3969_v18, 0.0 }
 0x278   :  { %v3291_v50 = vmul.f32 0.2, %v3965_v26  ;;  %3968 = vst [vmem:[#allocation31_spill] sm:$0xff] %v3294_v43  ;;  %v3971_v43 = vld [vmem:[#allocation13_spill] sm:$0xff]  ;;  %v3318_v9 = vmul.f32 0.2, %v2980_v55 }
 0x279   :  { %3970 = vst [vmem:[#allocation10_spill] sm:$0xff] %v3297_v53  ;;  %v3312_v53 = vmul.f32 0.2, %v3971_v43  ;;  %1376 = vst.msk [vmem:[%s3764_s4 + $0x70] sm:$0xff] %vm627_vm0, %v1312_v37  ;;  %v3975_v58 = vld [vmem:[#allocation15_spill] sm:$0xff]  ;;  %v3981_v59 = vld [vmem:[#allocation5_spill] sm:$0xff] }
 0x27a   :  { %3966 = vst [vmem:[#allocation4_spill] sm:$0xff] %v3291_v50  ;;  %v3315_v50 = vmul.f32 0.2, %v2976_v0  ;;  %3974 = vst [vmem:[#allocation33_spill] sm:$0xff] %v3318_v9  ;;  %v3333_v9 = vmul.f32 0.2, %v3975_v58  ;;  %v1314_v37 = vsel %vm1186_vm2, %v2832_v46, %v3981_v59 }
 0x27b   :  { %3972 = vst [vmem:[#allocation13_spill] sm:$0xff] %v3312_v53  ;;  %v3339_v62 = vmul.f32 0.2, %v3979_v42  ;;  %1377 = vst.msk [vmem:[%s3764_s4 + $0x78] sm:$0xff] %vm627_vm0, %v1313_v10  ;;  %vm1224_vm1 = vcmp.gt.f32.partialorder %v3975_v58, 0.0  ;;  %v3986_v46 = vld [vmem:[#allocation12_spill] sm:$0xff]  ;;  %v1315_v10 = vsel %vm1187_vm3, %v2836_v40, %v3086_v61 }
 0x27c   :  { %3973 = vst [vmem:[#allocation32_spill] sm:$0xff] %v3315_v50  ;;  %3976 = vst [vmem:[#allocation15_spill] sm:$0xff] %v3333_v9  ;;  %v3977_v50 = vld [vmem:[#allocation18_spill] sm:$0xff]  ;;  %v3984_v9 = vld [vmem:[#allocation9_spill] sm:$0xff]  ;;  %v3360_v59 = vmul.f32 0.2, %v3986_v46 }
 0x27d   :  { %v3336_v53 = vmul.f32 0.2, %v3977_v50  ;;  %3980 = vst [vmem:[#allocation17_spill] sm:$0xff] %v3339_v62  ;;  %v3357_v55 = vmul.f32 0.2, %v3984_v9  ;;  %1378 = vst.msk [vmem:[%s3764_s4 + $0x80] sm:$0xff] %vm627_vm0, %v1314_v37  ;;  %v1316_v37 = vsel %vm1188_vm4, %v2840_v44, %v3097_v3 }
 0x27e   :  { %3987 = vst [vmem:[#allocation12_spill] sm:$0xff] %v3360_v59  ;;  %vm1228_vm2 = vcmp.gt.f32.partialorder %v3984_v9, 0.0  ;;  %v3991_v40 = vld [vmem:[#allocation24_spill] sm:$0xff]  ;;  %1379 = vst.msk [vmem:[%s3764_s4 + $0x88] sm:$0xff] %vm627_vm0, %v1315_v10  ;;  %vm3995_vm6 = vcmp.gt.f32.partialorder %v2844_v56, 0.0  ;;  %vm3996_vm4 = vcmp.gt.f32.partialorder %v2848_v63, 0.0 }
 0x27f   :  { %3978 = vst [vmem:[#allocation18_spill] sm:$0xff] %v3336_v53  ;;  %v3982_v53 = vld [vmem:[#allocation14_spill] sm:$0xff]  ;;  %3985 = vst [vmem:[#allocation9_spill] sm:$0xff] %v3357_v55  ;;  %v3989_v55 = vld [vmem:[#allocation23_spill] sm:$0xff]  ;;  %v3381_v61 = vmul.f32 0.2, %v3991_v40  ;;  %v1318_v44 = vsel %vm3996_vm4, %v2848_v63, %v3103_v21 }
 0x280   :  { %v3354_v62 = vmul.f32 0.2, %v3982_v53  ;;  %v3988_v53 = vld [vmem:[#allocation16_spill] sm:$0xff]  ;;  %vm1232_vm3 = vcmp.gt.f32.partialorder %v3991_v40, 0.0  ;;  %vm3997_vm5 = vcmp.gt.f32.partialorder %v2852_v54, 0.0  ;;  %1380 = vst.msk [vmem:[%s3764_s4 + $0x90] sm:$0xff] %vm627_vm0, %v1316_v37 }
 0x281   :  { %v3375_v59 = vmul.f32 0.2, %v3988_v53  ;;  %3992 = vst [vmem:[#allocation24_spill] sm:$0xff] %v3381_v61  ;;  %v3993_v53 = vld [vmem:[#allocation25_spill] sm:$0xff]  ;;  %v1319_v3 = vsel %vm3997_vm5, %v2852_v54, %v3114_v45  ;;  %v3998_v10 = vld [vmem:[#allocation8_spill] sm:$0xff]  ;;  %vm4000_vm4 = vcmp.gt.f32.partialorder %v2864_v15, 0.0 }
 0x282   :  { %3983 = vst [vmem:[#allocation5_spill] sm:$0xff] %v3354_v62  ;;  %v3378_v62 = vmul.f32 0.2, %v3989_v55  ;;  %vm1233_vm7 = vcmp.gt.f32.partialorder %v3993_v53, 0.0  ;;  %v3394_v55 = vmul.f32 0.2, %v3993_v53  ;;  %v1322_v54 = vsel %vm4000_vm4, %v2864_v15, %v3131_v41 }
 0x283   :  { %v4001_v21 = vld [vmem:[#allocation19_spill] sm:$0xff]  ;;  %vm4002_vm5 = vcmp.gt.f32.partialorder %v2868_v6, 0.0  ;;  %1382 = vst.msk [vmem:[%s3764_s4 + $0xa0] sm:$0xff] %vm627_vm0, %v1318_v44  ;;  %1383 = vst.msk [vmem:[%s3764_s4 + $0xa8] sm:$0xff] %vm627_vm0, %v1319_v3  ;;  %vm4006_vm4 = vcmp.gt.f32.partialorder %v2884_v22, 0.0  ;;  %v4017_v41 = vld [vmem:[#allocation26_spill] sm:$0xff] }
 0x284   :  { %3990 = vst [vmem:[#allocation34_spill] sm:$0xff] %v3378_v62  ;;  %v3994_v62 = vld [vmem:[#allocation7_spill] sm:$0xff]  ;;  %v1323_v45 = vsel %vm4002_vm5, %v2868_v6, %v4001_v21  ;;  %v4005_v6 = vld [vmem:[#allocation20_spill] sm:$0xff]  ;;  %1386 = vst.msk [vmem:[%s3764_s4 + $0xc0] sm:$0xff] %vm627_vm0, %v1322_v54  ;;  %vm4008_vm5 = vcmp.gt.f32.partialorder %v2896_v20, 0.0 }
 0x285   :  { %v1317_v61 = vsel %vm3995_vm6, %v2844_v56, %v3994_v62  ;;  %v1320_v56 = vsel %vm1192_vm8, %v2856_v60, %v3998_v10  ;;  %vm3999_vm6 = vcmp.gt.f32.partialorder %v2860_v8, 0.0  ;;  %v1324_v60 = vsel %vm1196_vm9, %v2872_v12, %v3137_v16  ;;  %1387 = vst.msk [vmem:[%s3764_s4 + $0xc8] sm:$0xff] %vm627_vm0, %v1323_v45  ;;  %v4037_v62 = vld [vmem:[#allocation32_spill] sm:$0xff]  ;;  %v4039_v37 = vld [vmem:[#allocation33_spill] sm:$0xff]  ;;  %v4040_v44 = vld [vmem:[#allocation11_spill] sm:$0xff] }
 0x286   :  { %v1321_v63 = vsel %vm3999_vm6, %v2860_v8, %v3120_v49  ;;  %1381 = vst.msk [vmem:[%s3764_s4 + $0x98] sm:$0xff] %vm627_vm0, %v1317_v61  ;;  %vm4003_vm8 = vcmp.gt.f32.partialorder %v2876_v24, 0.0  ;;  %vm4004_vm6 = vcmp.gt.f32.partialorder %v2880_v31, 0.0  ;;  %v1327_v49 = vsel %vm4006_vm4, %v2884_v22, %v4005_v6  ;;  %1384 = vst.msk [vmem:[%s3764_s4 + $0xb0] sm:$0xff] %vm627_vm0, %v1320_v56  ;;  %v4045_v56 = vld [vmem:[#allocation17_spill] sm:$0xff]  ;;  %v4048_v21 = vld [vmem:[#allocation14_spill] sm:$0xff] }
 0x287   :  { %v1325_v8 = vsel %vm4003_vm8, %v2876_v24, %v3148_v33  ;;  %v1326_v15 = vsel %vm4004_vm6, %v2880_v31, %v3151_v28  ;;  %1385 = vst.msk [vmem:[%s3764_s4 + $0xb8] sm:$0xff] %vm627_vm0, %v1321_v63  ;;  %v1328_v12 = vsel %vm1200_vm10, %v2888_v30, %v3167_v7  ;;  %vm4007_vm9 = vcmp.gt.f32.partialorder %v2892_v48, 0.0  ;;  %1388 = vst.msk [vmem:[%s3764_s4 + $0xd0] sm:$0xff] %vm627_vm0, %v1324_v60  ;;  %v4022_v33 = vld [vmem:[#allocation29_spill] sm:$0xff]  ;;  %v4024_v7 = vld [vmem:[#allocation30_spill] sm:$0xff] }
 0x288   :  { %v1329_v24 = vsel %vm4007_vm9, %v2892_v48, %v3170_v19  ;;  %v1330_v31 = vsel %vm4008_vm5, %v2896_v20, %v3173_v29  ;;  %vm4009_vm8 = vcmp.gt.f32.partialorder %v2900_v35, 0.0  ;;  %1389 = vst.msk [vmem:[%s3764_s4 + $0xd8] sm:$0xff] %vm627_vm0, %v1325_v8  ;;  %1390 = vst.msk [vmem:[%s3764_s4 + $0xe0] sm:$0xff] %vm627_vm0, %v1326_v15  ;;  %v1332_v30 = vsel %vm1204_vm11, %v2904_v52, %v3190_v2  ;;  %v4010_v48 = vld [vmem:[#allocation21_spill] sm:$0xff]  ;;  %v4014_v52 = vld [vmem:[#allocation22_spill] sm:$0xff] }
 0x289   :  { %v1331_v22 = vsel %vm4009_vm8, %v2900_v35, %v3187_v47  ;;  %1391 = vst.msk [vmem:[%s3764_s4 + $0xe8] sm:$0xff] %vm627_vm0, %v1327_v49  ;;  %vm4011_vm10 = vcmp.gt.f32.partialorder %v2908_v11, 0.0  ;;  %vm4012_vm6 = vcmp.gt.f32.partialorder %v2912_v5, 0.0  ;;  %vm4013_vm4 = vcmp.gt.f32.partialorder %v2916_v34, 0.0  ;;  %1392 = vst.msk [vmem:[%s3764_s4 + $0xf0] sm:$0xff] %vm627_vm0, %v1328_v12  ;;  %v4029_v47 = vld [vmem:[#allocation4_spill] sm:$0xff] }
 0x28a   :  { %v1333_v20 = vsel %vm4011_vm10, %v2908_v11, %v4010_v48  ;;  %v1334_v35 = vsel %vm4012_vm6, %v2912_v5, %v3207_v39  ;;  %v1335_v16 = vsel %vm4013_vm4, %v2916_v34, %v3210_v32  ;;  %1393 = vst.msk [vmem:[%s3764_s4 + $0xf8] sm:$0xff] %vm627_vm0, %v1329_v24  ;;  %1394 = vst.msk [vmem:[%s3764_s4 + $0x100] sm:$0xff] %vm627_vm0, %v1330_v31  ;;  %vm4015_vm11 = vcmp.gt.f32.partialorder %v2924_v1, 0.0  ;;  %v4031_v32 = vld [vmem:[#allocation31_spill] sm:$0xff]  ;;  %v4032_v39 = vld [vmem:[#allocation6_spill] sm:$0xff] }
 0x28b   :  { %1395 = vst.msk [vmem:[%s3764_s4 + $0x108] sm:$0xff] %vm627_vm0, %v1331_v22  ;;  %v1336_v11 = vsel %vm1208_vm12, %v2920_v17, %v4014_v52  ;;  %v1337_v5 = vsel %vm4015_vm11, %v2924_v1, %v3228_v13  ;;  %vm4016_vm9 = vcmp.gt.f32.partialorder %v2928_v14, 0.0  ;;  %vm4018_vm5 = vcmp.gt.f32.partialorder %v2932_v51, 0.0  ;;  %1396 = vst.msk [vmem:[%s3764_s4 + $0x110] sm:$0xff] %vm627_vm0, %v1332_v30  ;;  %v4019_v17 = vld [vmem:[#allocation27_spill] sm:$0xff]  ;;  %v4034_v13 = vld [vmem:[#allocation10_spill] sm:$0xff] }
 0x28c   :  { %v1338_v34 = vsel %vm4016_vm9, %v2928_v14, %v3231_v4  ;;  %v1339_v29 = vsel %vm4018_vm5, %v2932_v51, %v4017_v41  ;;  %1397 = vst.msk [vmem:[%s3764_s4 + $0x118] sm:$0xff] %vm627_vm0, %v1333_v20  ;;  %1398 = vst.msk [vmem:[%s3764_s4 + $0x120] sm:$0xff] %vm627_vm0, %v1334_v35  ;;  %v1340_v1 = vsel %vm1212_vm13, %v2936_v25, %v4019_v17  ;;  %v4020_v14 = vld [vmem:[#allocation28_spill] sm:$0xff]  ;;  %vm4021_vm12 = vcmp.gt.f32.partialorder %v2940_v27, 0.0  ;;  %v4026_v25 = vld [vmem:[#allocation2_spill] sm:$0xff] }
 0x28d   :  { %1399 = vst.msk [vmem:[%s3764_s4 + $0x128] sm:$0xff] %vm627_vm0, %v1335_v16  ;;  %v1341_v51 = vsel %vm4021_vm12, %v2940_v27, %v4020_v14  ;;  %vm4023_vm8 = vcmp.gt.f32.partialorder %v2944_v36, 0.0  ;;  %vm4025_vm10 = vcmp.gt.f32.partialorder %v2948_v57, 0.0  ;;  %1400 = vst.msk [vmem:[%s3764_s4 + $0x130] sm:$0xff] %vm627_vm0, %v1336_v11  ;;  %v1344_v27 = vsel %vm1216_vm14, %v3961_v23, %v4026_v25  ;;  %v4035_v23 = vld [vmem:[#allocation13_spill] sm:$0xff]  ;;  %v4053_v8 = vld [vmem:[#allocation16_spill] sm:$0xff] }
 0x28e   :  { %v1342_v28 = vsel %vm4023_vm8, %v2944_v36, %v4022_v33  ;;  %v1343_v19 = vsel %vm4025_vm10, %v2948_v57, %v4024_v7  ;;  %1401 = vst.msk [vmem:[%s3764_s4 + $0x138] sm:$0xff] %vm627_vm0, %v1337_v5  ;;  %1402 = vst.msk [vmem:[%s3764_s4 + $0x140] sm:$0xff] %vm627_vm0, %v1338_v34  ;;  %v4027_v36 = vld [vmem:[#allocation3_spill] sm:$0xff]  ;;  %vm4028_vm13 = vcmp.gt.f32.partialorder %v3963_v38, 0.0  ;;  %vm4030_vm6 = vcmp.gt.f32.partialorder %v3965_v26, 0.0  ;;  %v4047_v54 = vld [vmem:[#allocation5_spill] sm:$0xff] }
 0x28f   :  { %1403 = vst.msk [vmem:[%s3764_s4 + $0x148] sm:$0xff] %vm627_vm0, %v1339_v29  ;;  %v1345_v57 = vsel %vm4028_vm13, %v3963_v38, %v4027_v36  ;;  %v1346_v2 = vsel %vm4030_vm6, %v3965_v26, %v4029_v47  ;;  %vm4033_vm4 = vcmp.gt.f32.partialorder %v4032_v39, 0.0  ;;  %1404 = vst.msk [vmem:[%s3764_s4 + $0x150] sm:$0xff] %vm627_vm0, %v1340_v1  ;;  %v1348_v26 = vsel %vm1220_vm15, %v3969_v18, %v4034_v13  ;;  %v4043_v18 = vld [vmem:[#allocation18_spill] sm:$0xff]  ;;  %v4056_v49 = vld [vmem:[#allocation23_spill] sm:$0xff] }
 0x290   :  { %v1347_v4 = vsel %vm4033_vm4, %v4032_v39, %v4031_v32  ;;  %1405 = vst.msk [vmem:[%s3764_s4 + $0x158] sm:$0xff] %vm627_vm0, %v1341_v51  ;;  %1406 = vst.msk [vmem:[%s3764_s4 + $0x160] sm:$0xff] %vm627_vm0, %v1342_v28  ;;  %vm4036_vm14 = vcmp.gt.f32.partialorder %v3971_v43, 0.0  ;;  %vm4038_vm11 = vcmp.gt.f32.partialorder %v2976_v0, 0.0  ;;  %vm4041_vm9 = vcmp.gt.f32.partialorder %v4040_v44, 0.0  ;;  %v4055_v6 = vld [vmem:[#allocation34_spill] sm:$0xff] }
 0x291   :  { %1407 = vst.msk [vmem:[%s3764_s4 + $0x168] sm:$0xff] %vm627_vm0, %v1343_v19  ;;  %v1349_v38 = vsel %vm4036_vm14, %v3971_v43, %v4035_v23  ;;  %v1350_v61 = vsel %vm4038_vm11, %v2976_v0, %v4037_v62  ;;  %v1351_v3 = vsel %vm4041_vm9, %v4040_v44, %v4039_v37  ;;  %1408 = vst.msk [vmem:[%s3764_s4 + $0x170] sm:$0xff] %vm627_vm0, %v1344_v27  ;;  %v4042_v0 = vld [vmem:[#allocation15_spill] sm:$0xff]  ;;  %vm4044_vm15 = vcmp.gt.f32.partialorder %v3977_v50, 0.0 }
 0x292   :  { %1409 = vst.msk [vmem:[%s3764_s4 + $0x178] sm:$0xff] %vm627_vm0, %v1345_v57  ;;  %1410 = vst.msk [vmem:[%s3764_s4 + $0x180] sm:$0xff] %vm627_vm0, %v1346_v2  ;;  %v1352_v43 = vsel %vm1224_vm1, %v3975_v58, %v4042_v0  ;;  %v1353_v10 = vsel %vm4044_vm15, %v3977_v50, %v4043_v18  ;;  %vm4046_vm5 = vcmp.gt.f32.partialorder %v3979_v42, 0.0  ;;  %vm4049_vm12 = vcmp.gt.f32.partialorder %v4048_v21, 0.0  ;;  %v4050_v50 = vld [vmem:[#allocation9_spill] sm:$0xff] }
 0x293   :  { %1411 = vst.msk [vmem:[%s3764_s4 + $0x188] sm:$0xff] %vm627_vm0, %v1347_v4  ;;  %v1354_v63 = vsel %vm4046_vm5, %v3979_v42, %v4045_v56  ;;  %v1355_v45 = vsel %vm4049_vm12, %v4048_v21, %v4047_v54  ;;  %1412 = vst.msk [vmem:[%s3764_s4 + $0x190] sm:$0xff] %vm627_vm0, %v1348_v26  ;;  %v1356_v58 = vsel %vm1228_vm2, %v3984_v9, %v4050_v50  ;;  %v4051_v42 = vld [vmem:[#allocation12_spill] sm:$0xff]  ;;  %vm4052_vm1 = vcmp.gt.f32.partialorder %v3986_v46, 0.0 }
 0x294   :  { %1413 = vst.msk [vmem:[%s3764_s4 + $0x198] sm:$0xff] %vm627_vm0, %v1349_v38  ;;  %1414 = vst.msk [vmem:[%s3764_s4 + $0x1a0] sm:$0xff] %vm627_vm0, %v1350_v61  ;;  %v1357_v60 = vsel %vm4052_vm1, %v3986_v46, %v4051_v42  ;;  %vm4054_vm8 = vcmp.gt.f32.partialorder %v4053_v8, 0.0  ;;  %vm4057_vm10 = vcmp.gt.f32.partialorder %v4056_v49, 0.0  ;;  %v4058_v9 = vld [vmem:[#allocation24_spill] sm:$0xff] }
 0x295   :  { %1415 = vst.msk [vmem:[%s3764_s4 + $0x1a8] sm:$0xff] %vm627_vm0, %v1351_v3  ;;  %v1358_v15 = vsel %vm4054_vm8, %v4053_v8, %v3375_v59  ;;  %v1359_v12 = vsel %vm4057_vm10, %v4056_v49, %v4055_v6  ;;  %1416 = vst.msk [vmem:[%s3764_s4 + $0x1b0] sm:$0xff] %vm627_vm0, %v1352_v43  ;;  %v1360_v46 = vsel %vm1232_vm3, %v3991_v40, %v4058_v9 }
 0x296   :  { %1417 = vst.msk [vmem:[%s3764_s4 + $0x1b8] sm:$0xff] %vm627_vm0, %v1353_v10  ;;  %1418 = vst.msk [vmem:[%s3764_s4 + $0x1c0] sm:$0xff] %vm627_vm0, %v1354_v63  ;;  %v1361_v59 = vsel %vm1233_vm7, %v3993_v53, %v3394_v55 }
 0x297   :  { %1419 = vst.msk [vmem:[%s3764_s4 + $0x1c8] sm:$0xff] %vm627_vm0, %v1355_v45  ;;  %1420 = vst.msk [vmem:[%s3764_s4 + $0x1d0] sm:$0xff] %vm627_vm0, %v1356_v58 }
 0x298   :  { %1421 = vst.msk [vmem:[%s3764_s4 + $0x1d8] sm:$0xff] %vm627_vm0, %v1357_v60  ;;  %1422 = vst.msk [vmem:[%s3764_s4 + $0x1e0] sm:$0xff] %vm627_vm0, %v1358_v15 }
 0x299   :  { %1423 = vst.msk [vmem:[%s3764_s4 + $0x1e8] sm:$0xff] %vm627_vm0, %v1359_v12  ;;  %1424 = vst.msk [vmem:[%s3764_s4 + $0x1f0] sm:$0xff] %vm627_vm0, %v1360_v46 }
 0x29a   :  { %1425 = vst.msk [vmem:[%s3764_s4 + $0x1f8] sm:$0xff] %vm627_vm0, %v1361_v59 }

// kernel: domain_discriminator_forward.7
= control target key start
LH: loop header
LB: loop body
LE: loop exit
PB: predicated region body
PF: predicated region fallthrough
CT: control target
= control target key end

     0   :  { %vm1077_vm0 = vcmask 261120   ;;  %vm1078_vm13 = vcmask 261120   ;;  %s1072_s1 = inlined_call_operand.vmem [shape: bf16[256,32], index: 1, kind: input, shape index: {}]   ;;  %s1073_s0 = inlined_call_operand.vmem [shape: bf16[128,256], index: 0, kind: input, shape index: {}]   ;;  %s1074_s2 = inlined_call_operand.vmem [shape: f32[1,32], index: 2, kind: input, shape index: {}]   ;;  %s1075_s3 = inlined_call_operand.vmem [shape: f32[1,32], index: 3, kind: input, shape index: {}]   ;;  %s1076_s4 = inlined_call_operand.vmem [shape: f32[128,32], index: 4, kind: output, shape index: {}]  }
   0x1   :  { %v679_v0 = vld [vmem:[%s1072_s1 + $0x40] sm:$0xff]   ;;  %v681_v2 = vld [vmem:[%s1072_s1 + $0x48] sm:$0xff]   ;;  %v683_v4 = vld [vmem:[%s1072_s1 + $0x50] sm:$0xff]  }
   0x2   :  { %v680_v1 = vld [vmem:[%s1072_s1] sm:$0xff]   ;;  %599 = vmatprep.subr.bf16.mxu0 %v679_v0  ;;  %663 = vmatprep.subr.bf16.mxu1 %v679_v0  ;;  %v682_v3 = vld [vmem:[%s1072_s1 + $0x8] sm:$0xff]   ;;  %v684_v5 = vld [vmem:[%s1072_s1 + $0x10] sm:$0xff]  }
   0x3   :  { %600 = vmatpush3.bf16.msra.mxu0 %v680_v1  ;;  %671 = vmatpush3.bf16.msra.mxu1 %v680_v1  ;;  %v685_v6 = vld [vmem:[%s1072_s1 + $0x58] sm:$0xff]   ;;  %v687_v8 = vld [vmem:[%s1072_s1 + $0x60] sm:$0xff]   ;;  %v689_v10 = vld [vmem:[%s1072_s1 + $0x68] sm:$0xff]  }
   0x4   :  { %601 = vmatprep.subr.bf16.mxu0 %v681_v2  ;;  %664 = vmatprep.subr.bf16.mxu1 %v681_v2  ;;  %v686_v7 = vld [vmem:[%s1072_s1 + $0x18] sm:$0xff]   ;;  %v688_v9 = vld [vmem:[%s1072_s1 + $0x20] sm:$0xff]   ;;  %v690_v12 = vld [vmem:[%s1072_s1 + $0x28] sm:$0xff]  }
   0x5   :  { %v697_v11 = vld [vmem:[%s1073_s0 + $0x4] ss:$8 sps:$4 sm:$0xff]   ;;  %v691_v14 = vld [vmem:[%s1072_s1 + $0x70] sm:$0xff]   ;;  %v693_v16 = vld [vmem:[%s1072_s1 + $0x78] sm:$0xff]  }
   0x6   :  { %v703_v13 = vld [vmem:[%s1073_s0 + $0x44] ss:$8 sps:$4 sm:$0xff]   ;;  %274 = vmatprep.mubr.bf16.mxu0 %v697_v11  ;;  %v692_v15 = vld [vmem:[%s1072_s1 + $0x30] sm:$0xff]   ;;  %v694_v17 = vld [vmem:[%s1072_s1 + $0x38] sm:$0xff]  }
   0x7   :  { %602 = vmatpush3.bf16.msra.mxu0 %v682_v3  ;;  %672 = vmatpush3.bf16.msra.mxu1 %v682_v3  ;;  %v695_v18 = vld [vmem:[%s1073_s0] ss:$8 sps:$4 sm:$0xff]   ;;  %v698_v20 = vld [vmem:[%s1073_s0 + $0x14] ss:$8 sps:$4 sm:$0xff]   ;;  %v700_v22 = vld [vmem:[%s1073_s0 + $0x10] ss:$8 sps:$4 sm:$0xff]  }
   0x8   :  { %603 = vmatprep.subr.bf16.mxu0 %v683_v4  ;;  %665 = vmatprep.subr.bf16.mxu1 %v683_v4  ;;  %v701_v19 = vld [vmem:[%s1073_s0 + $0x40] ss:$8 sps:$4 sm:$0xff]   ;;  %v707_v21 = vld [vmem:[%s1073_s0 + $0x54] ss:$8 sps:$4 sm:$0xff]   ;;  %v709_v23 = vld [vmem:[%s1073_s0 + $0x50] ss:$8 sps:$4 sm:$0xff]  }
   0x9   :  { %306 = vmatprep.mubr.bf16.mxu1 %v703_v13  ;;  %v704_v24 = vld [vmem:[%s1073_s0 + $0x24] ss:$8 sps:$4 sm:$0xff]   ;;  %v706_v26 = vld [vmem:[%s1073_s0 + $0x20] ss:$8 sps:$4 sm:$0xff]   ;;  %v710_v28 = vld [vmem:[%s1073_s0 + $0x34] ss:$8 sps:$4 sm:$0xff]  }
   0xa   :  { %v713_v25 = vld [vmem:[%s1073_s0 + $0x64] ss:$8 sps:$4 sm:$0xff]   ;;  %v715_v27 = vld [vmem:[%s1073_s0 + $0x60] ss:$8 sps:$4 sm:$0xff]   ;;  %v716_v29 = vld [vmem:[%s1073_s0 + $0x74] ss:$8 sps:$4 sm:$0xff]  }
   0xb   :  { %604 = vmatpush3.bf16.msra.mxu0 %v684_v5  ;;  %673 = vmatpush3.bf16.msra.mxu1 %v684_v5  ;;  %v712_v30 = vld [vmem:[%s1073_s0 + $0x30] ss:$8 sps:$4 sm:$0xff]  }
   0xc   :  { %605 = vmatprep.subr.bf16.mxu0 %v685_v6  ;;  %666 = vmatprep.subr.bf16.mxu1 %v685_v6  ;;  %v718_v31 = vld [vmem:[%s1073_s0 + $0x70] ss:$8 sps:$4 sm:$0xff]  }
   0xf   :  { %606 = vmatpush3.bf16.msra.mxu0 %v686_v7  ;;  %674 = vmatpush3.bf16.msra.mxu1 %v686_v7 }
  0x10   :  { %607 = vmatprep.subr.bf16.mxu0 %v687_v8  ;;  %667 = vmatprep.subr.bf16.mxu1 %v687_v8 }
  0x13   :  { %608 = vmatpush3.bf16.msra.mxu0 %v688_v9  ;;  %675 = vmatpush3.bf16.msra.mxu1 %v688_v9 }
  0x14   :  { %609 = vmatprep.subr.bf16.mxu0 %v689_v10  ;;  %668 = vmatprep.subr.bf16.mxu1 %v689_v10 }
  0x17   :  { %610 = vmatpush3.bf16.msra.mxu0 %v690_v12  ;;  %676 = vmatpush3.bf16.msra.mxu1 %v690_v12 }
  0x18   :  { %611 = vmatprep.subr.bf16.mxu0 %v691_v14  ;;  %669 = vmatprep.subr.bf16.mxu1 %v691_v14 }
  0x1b   :  { %612 = vmatpush3.bf16.msra.mxu0 %v692_v15  ;;  %677 = vmatpush3.bf16.msra.mxu1 %v692_v15 }
  0x1c   :  { %613 = vmatprep.subr.bf16.mxu0 %v693_v16  ;;  %670 = vmatprep.subr.bf16.mxu1 %v693_v16 }
  0x1f   :  { %614 = vmatpush3.bf16.msra.mxu0 %v694_v17  ;;  %678 = vmatpush3.bf16.msra.mxu1 %v694_v17 }
  0x22   :  { %275 = vmatmul.mubr.bf16.vlgmr.msra.gmra.mrb[0].mxu0 %v695_v18  ;;  %307 = vmatmul.mubr.bf16.vlgmr.msra.gmra.mrb[0].mxu1 %v701_v19 }
  0x23   :  { %282 = vmatprep.mubr.bf16.mxu0 %v698_v20  ;;  %314 = vmatprep.mubr.bf16.mxu1 %v707_v21 }
  0x2a   :  { %283 = vmatmul.mubr.bf16.gmra.mrb[4].mxu0 %v700_v22  ;;  %315 = vmatmul.mubr.bf16.gmra.mrb[4].mxu1 %v709_v23 }
  0x2b   :  { %290 = vmatprep.mubr.bf16.mxu0 %v704_v24  ;;  %322 = vmatprep.mubr.bf16.mxu1 %v713_v25 }
  0x32   :  { %291 = vmatmul.mubr.bf16.gmra.mrb[8].mxu0 %v706_v26  ;;  %323 = vmatmul.mubr.bf16.gmra.mrb[8].mxu1 %v715_v27 }
  0x33   :  { %298 = vmatprep.mubr.bf16.mxu0 %v710_v28  ;;  %330 = vmatprep.mubr.bf16.mxu1 %v716_v29 }
  0x3a   :  { %299 = vmatmul.mubr.bf16.gmra.mrb[12].mxu0 %v712_v30  ;;  %331 = vmatmul.mubr.bf16.gmra.mrb[12].mxu1 %v718_v31 }
  0xf5   :  { %v615_v32 = vpop.f32.mrb[0].mxu0  ;;  %v639_v33 = vpop.f32.mrb[0].mxu1 }
  0xf6   :  { %v616_v34 = vpop.f32.mrb[1].mxu0  ;;  %v640_v35 = vpop.f32.mrb[1].mxu1 }
  0xf7   :  { %v842_v36 = vadd.f32 %v616_v34, %v615_v32  ;;  %v618_v37 = vpop.f32.mrb[2].mxu0  ;;  %v844_v38 = vadd.f32 %v640_v35, %v639_v33  ;;  %v642_v39 = vpop.f32.mrb[2].mxu1 }
  0xf8   :  { %v619_v40 = vpop.f32.mrb[3].mxu0  ;;  %v643_v41 = vpop.f32.mrb[3].mxu1 }
  0xf9   :  { %v846_v42 = vadd.f32 %v619_v40, %v618_v37  ;;  %v848_v43 = vadd.f32 %v643_v41, %v642_v39  ;;  %v340_v44 = vsel %vm1077_vm0, %v842_v36, 0.0  ;;  %v355_v31 = vsel %vm1077_vm0, %v844_v38, 0.0 }
  0xfb   :  { %v341_v45 = vsel %vm1077_vm0, %v846_v42, 0.0  ;;  %v357_v33 = vsel %vm1077_vm0, %v848_v43, 0.0 }
  0xfc   :  { %v342_v46 = vadd.f32 %v341_v45, %v340_v44 }
  0xfd   :  { %v621_v47 = vpop.f32.mrb[4].mxu0  ;;  %v645_v48 = vpop.f32.mrb[4].mxu1 }
  0xfe   :  { %v622_v49 = vpop.f32.mrb[5].mxu0  ;;  %v646_v50 = vpop.f32.mrb[5].mxu1 }
  0xff   :  { %v854_v51 = vadd.f32 %v622_v49, %v621_v47  ;;  %v624_v52 = vpop.f32.mrb[6].mxu0  ;;  %v856_v53 = vadd.f32 %v646_v50, %v645_v48  ;;  %v648_v54 = vpop.f32.mrb[6].mxu1 }
 0x100   :  { %v625_v55 = vpop.f32.mrb[7].mxu0  ;;  %v649_v56 = vpop.f32.mrb[7].mxu1 }
 0x101   :  { %v343_v57 = vsel %vm1077_vm0, %v854_v51, 0.0  ;;  %v860_v58 = vadd.f32 %v625_v55, %v624_v52  ;;  %v862_v59 = vadd.f32 %v649_v56, %v648_v54  ;;  %v359_v35 = vsel %vm1077_vm0, %v856_v53, 0.0 }
 0x102   :  { %v344_v60 = vadd.f32 %v343_v57, %v342_v46 }
 0x103   :  { %v345_v61 = vsel %vm1077_vm0, %v860_v58, 0.0  ;;  %v361_v39 = vsel %vm1077_vm0, %v862_v59, 0.0 }
 0x104   :  { %v346_v62 = vadd.f32 %v345_v61, %v344_v60 }
 0x105   :  { %v627_v63 = vpop.f32.mrb[8].mxu0  ;;  %v651_v0 = vpop.f32.mrb[8].mxu1 }
 0x106   :  { %v628_v1 = vpop.f32.mrb[9].mxu0  ;;  %v652_v2 = vpop.f32.mrb[9].mxu1 }
 0x107   :  { %v629_v3 = vadd.f32 %v628_v1, %v627_v63  ;;  %v630_v4 = vpop.f32.mrb[10].mxu0  ;;  %v653_v5 = vadd.f32 %v652_v2, %v651_v0  ;;  %v654_v6 = vpop.f32.mrb[10].mxu1 }
 0x108   :  { %v631_v7 = vpop.f32.mrb[11].mxu0  ;;  %v655_v8 = vpop.f32.mrb[11].mxu1 }
 0x109   :  { %v347_v9 = vsel %vm1077_vm0, %v629_v3, 0.0  ;;  %v632_v10 = vadd.f32 %v631_v7, %v630_v4  ;;  %v656_v11 = vadd.f32 %v655_v8, %v654_v6  ;;  %v363_v41 = vsel %vm1077_vm0, %v653_v5, 0.0 }
 0x10a   :  { %v348_v12 = vadd.f32 %v347_v9, %v346_v62 }
 0x10b   :  { %v349_v13 = vsel %vm1077_vm0, %v632_v10, 0.0  ;;  %v365_v45 = vsel %vm1077_vm0, %v656_v11, 0.0 }
 0x10c   :  { %v350_v14 = vadd.f32 %v349_v13, %v348_v12 }
 0x10d   :  { %v633_v15 = vpop.f32.mrb[12].mxu0  ;;  %v657_v16 = vpop.f32.mrb[12].mxu1 }
 0x10e   :  { %v634_v17 = vpop.f32.mrb[13].mxu0  ;;  %v658_v18 = vpop.f32.mrb[13].mxu1 }
 0x10f   :  { %v635_v19 = vadd.f32 %v634_v17, %v633_v15  ;;  %v636_v20 = vpop.f32.mrb[14].mxu0  ;;  %v659_v21 = vadd.f32 %v658_v18, %v657_v16  ;;  %v660_v22 = vpop.f32.mrb[14].mxu1 }
 0x110   :  { %v637_v23 = vpop.f32.mrb[15].mxu0  ;;  %v661_v24 = vpop.f32.mrb[15].mxu1 }
 0x111   :  { %v351_v25 = vsel %vm1077_vm0, %v635_v19, 0.0  ;;  %v638_v26 = vadd.f32 %v637_v23, %v636_v20  ;;  %v662_v27 = vadd.f32 %v661_v24, %v660_v22  ;;  %v367_v46 = vsel %vm1077_vm0, %v659_v21, 0.0 }
 0x112   :  { %v352_v28 = vadd.f32 %v351_v25, %v350_v14 }
 0x113   :  { %v353_v29 = vsel %vm1077_vm0, %v638_v26, 0.0  ;;  %v369_v49 = vsel %vm1077_vm0, %v662_v27, 0.0 }
 0x114   :  { %v354_v30 = vadd.f32 %v353_v29, %v352_v28 }
 0x116   :  { %v356_v32 = vadd.f32 %v355_v31, %v354_v30 }
 0x118   :  { %v358_v34 = vadd.f32 %v357_v33, %v356_v32 }
 0x11a   :  { %v360_v37 = vadd.f32 %v359_v35, %v358_v34 }
 0x11c   :  { %v362_v40 = vadd.f32 %v361_v39, %v360_v37 }
 0x11e   :  { %v364_v44 = vadd.f32 %v363_v41, %v362_v40 }
 0x120   :  { %v366_v47 = vadd.f32 %v365_v45, %v364_v44 }
 0x122   :  { %v368_v48 = vadd.f32 %v367_v46, %v366_v47 }
 0x124   :  { %v370_v50 = vadd.f32 %v369_v49, %v368_v48 }
 0x126   :  { %v371_v52 = vrot.slane %v370_v50, 4 }
 0x128   :  { %v372_v54 = vadd.f32 %v371_v52, %v370_v50 }
 0x12a   :  { %v373_v55 = vrot.slane %v372_v54, 2 }
 0x12c   :  { %v374_v56 = vadd.f32 %v373_v55, %v372_v54 }
 0x12e   :  { %v375_v57 = vrot.slane %v374_v56, 1 }
 0x130   :  { %v376_v60 = vadd.f32 %v375_v57, %v374_v56 }
 0x132   :  { %v378_v61 = vmul.f32 0.0078125, %v376_v60 }
 0x134   :  { %v883_v62 = vsub.f32 %v842_v36, %v378_v61  ;;  %v886_v63 = vsub.f32 %v846_v42, %v378_v61  ;;  %v889_v0 = vsub.f32 %v854_v51, %v378_v61  ;;  %v892_v1 = vsub.f32 %v860_v58, %v378_v61 }
 0x135   :  { %v894_v2 = vsub.f32 %v629_v3, %v378_v61  ;;  %v896_v4 = vsub.f32 %v632_v10, %v378_v61  ;;  %v898_v6 = vsub.f32 %v635_v19, %v378_v61  ;;  %v900_v7 = vsub.f32 %v638_v26, %v378_v61 }
 0x136   :  { %v903_v36 = vsub.f32 %v844_v38, %v378_v61  ;;  %v906_v42 = vsub.f32 %v848_v43, %v378_v61  ;;  %v909_v51 = vsub.f32 %v856_v53, %v378_v61  ;;  %v912_v58 = vsub.f32 %v862_v59, %v378_v61 }
 0x137   :  { %v914_v3 = vsub.f32 %v653_v5, %v378_v61  ;;  %v916_v8 = vsub.f32 %v656_v11, %v378_v61  ;;  %v918_v9 = vsub.f32 %v659_v21, %v378_v61  ;;  %v920_v10 = vsub.f32 %v662_v27, %v378_v61 }
 0x138   :  { %v395_v38 = vmul.f32 %v883_v62, %v883_v62  ;;  %v396_v43 = vmul.f32 %v886_v63, %v886_v63  ;;  %v397_v53 = vmul.f32 %v889_v0, %v889_v0  ;;  %v398_v59 = vmul.f32 %v892_v1, %v892_v1 }
 0x139   :  { %v399_v13 = vmul.f32 %v894_v2, %v894_v2  ;;  %v400_v16 = vmul.f32 %v896_v4, %v896_v4  ;;  %v401_v19 = vmul.f32 %v898_v6, %v898_v6  ;;  %v402_v22 = vmul.f32 %v900_v7, %v900_v7 }
 0x13a   :  { %v411_v5 = vsel %vm1077_vm0, %v395_v38, 0.0  ;;  %v412_v11 = vsel %vm1077_vm0, %v396_v43, 0.0  ;;  %v414_v14 = vsel %vm1077_vm0, %v397_v53, 0.0  ;;  %v416_v17 = vsel %vm1077_vm0, %v398_v59, 0.0 }
 0x13b   :  { %v413_v12 = vadd.f32 %v412_v11, %v411_v5  ;;  %v418_v20 = vsel %vm1077_vm0, %v399_v13, 0.0  ;;  %v420_v23 = vsel %vm1077_vm0, %v400_v16, 0.0  ;;  %v403_v25 = vmul.f32 %v903_v36, %v903_v36 }
 0x13c   :  { %v422_v26 = vsel %vm1077_vm0, %v401_v19, 0.0  ;;  %v404_v28 = vmul.f32 %v906_v42, %v906_v42  ;;  %v424_v29 = vsel %vm1077_vm0, %v402_v22, 0.0  ;;  %v405_v31 = vmul.f32 %v909_v51, %v909_v51 }
 0x13d   :  { %v415_v15 = vadd.f32 %v414_v14, %v413_v12  ;;  %v426_v32 = vsel %vm1077_vm0, %v403_v25, 0.0  ;;  %v406_v34 = vmul.f32 %v912_v58, %v912_v58  ;;  %v407_v39 = vmul.f32 %v914_v3, %v914_v3 }
 0x13e   :  { %v428_v35 = vsel %vm1077_vm0, %v404_v28, 0.0  ;;  %v430_v40 = vsel %vm1077_vm0, %v405_v31, 0.0  ;;  %v408_v44 = vmul.f32 %v916_v8, %v916_v8  ;;  %v409_v47 = vmul.f32 %v918_v9, %v918_v9  ;;  %v598_v28 = vld [vmem:[%s1075_s3] ss:$0 sm:$0xff] }
 0x13f   :  { %v417_v18 = vadd.f32 %v416_v17, %v415_v15  ;;  %v432_v45 = vsel %vm1077_vm0, %v406_v34, 0.0  ;;  %v434_v48 = vsel %vm1077_vm0, %v407_v39, 0.0  ;;  %v410_v50 = vmul.f32 %v920_v10, %v920_v10  ;;  %v449_v15 = vld [vmem:[%s1074_s2] sm:$0x1] }
 0x140   :  { %v436_v52 = vsel %vm1077_vm0, %v408_v44, 0.0  ;;  %v438_v55 = vsel %vm1077_vm0, %v409_v47, 0.0  ;;  %v454_v13 = vlaneseq }
 0x141   :  { %v419_v21 = vadd.f32 %v418_v20, %v417_v18  ;;  %v440_v57 = vsel %vm1077_vm0, %v410_v50, 0.0  ;;  %vm1079_vm0 = vmmov %vm1078_vm13 }
 0x142   :  { %v455_v14 = vshrl.u32 %v454_v13, 7 }
 0x143   :  { %v421_v24 = vadd.f32 %v420_v23, %v419_v21 }
 0x144   :  { %v456_v16 = vsub.s32 0, %v455_v14 }
 0x145   :  { %v423_v27 = vadd.f32 %v422_v26, %v421_v24 }
 0x147   :  { %v425_v30 = vadd.f32 %v424_v29, %v423_v27 }
 0x149   :  { %v427_v33 = vadd.f32 %v426_v32, %v425_v30 }
 0x14b   :  { %v429_v37 = vadd.f32 %v428_v35, %v427_v33 }
 0x14d   :  { %v431_v41 = vadd.f32 %v430_v40, %v429_v37 }
 0x14f   :  { %v433_v46 = vadd.f32 %v432_v45, %v431_v41 }
 0x151   :  { %v435_v49 = vadd.f32 %v434_v48, %v433_v46 }
 0x153   :  { %v437_v54 = vadd.f32 %v436_v52, %v435_v49 }
 0x155   :  { %v439_v56 = vadd.f32 %v438_v55, %v437_v54 }
 0x157   :  { %v441_v60 = vadd.f32 %v440_v57, %v439_v56 }
 0x159   :  { %v442_v61 = vrot.slane %v441_v60, 4 }
 0x15b   :  { %v443_v38 = vadd.f32 %v442_v61, %v441_v60 }
 0x15d   :  { %v444_v43 = vrot.slane %v443_v38, 2 }
 0x15f   :  { %v445_v53 = vadd.f32 %v444_v43, %v443_v38 }
 0x161   :  { %v446_v59 = vrot.slane %v445_v53, 1 }
 0x163   :  { %v447_v5 = vadd.f32 %v446_v59, %v445_v53 }
 0x165   :  { %v448_v11 = vmul.f32 0.0078125, %v447_v5 }
 0x167   :  { %v450_v12 = vadd.f32 1e-05, %v448_v11 }
 0x169   :  { %719 = vrsqrt.f32 %v450_v12 }
 0x173   :  { %v720_v17 = vpop.eup %719 }
 0x174   :  { %v452_v18 = vmul.f32 %v720_v17, %v449_v15 }
 0x176   :  { %v457_v19 = vrot.slane %v452_v18, %v456_v16 }
 0x178   :  { %v459_v20 = vmul.f32 %v457_v19, %v883_v62  ;;  %v460_v21 = vmul.f32 %v457_v19, %v886_v63  ;;  %v461_v22 = vmul.f32 %v457_v19, %v889_v0  ;;  %v462_v23 = vmul.f32 %v457_v19, %v892_v1 }
 0x179   :  { %v463_v24 = vmul.f32 %v457_v19, %v894_v2  ;;  %v464_v25 = vmul.f32 %v457_v19, %v896_v4  ;;  %v465_v26 = vmul.f32 %v457_v19, %v898_v6  ;;  %v466_v27 = vmul.f32 %v457_v19, %v900_v7 }
 0x17a   :  { %v467_v62 = vmul.f32 %v457_v19, %v903_v36  ;;  %v468_v63 = vmul.f32 %v457_v19, %v906_v42  ;;  %v469_v0 = vmul.f32 %v457_v19, %v909_v51  ;;  %v470_v1 = vmul.f32 %v457_v19, %v912_v58 }
 0x17b   :  { %v471_v2 = vmul.f32 %v457_v19, %v914_v3  ;;  %v472_v4 = vmul.f32 %v457_v19, %v916_v8  ;;  %v473_v6 = vmul.f32 %v457_v19, %v918_v9  ;;  %v474_v7 = vmul.f32 %v457_v19, %v920_v10 }
 0x17c   :  { %v482_v29 = vadd.f32 %v598_v28, %v459_v20  ;;  %v483_v30 = vadd.f32 %v598_v28, %v460_v21  ;;  %v484_v31 = vadd.f32 %v598_v28, %v461_v22  ;;  %v485_v32 = vadd.f32 %v598_v28, %v462_v23 }
 0x17d   :  { %v486_v33 = vadd.f32 %v598_v28, %v463_v24  ;;  %v487_v36 = vadd.f32 %v598_v28, %v464_v25  ;;  %v488_v34 = vadd.f32 %v598_v28, %v465_v26  ;;  %v489_v42 = vadd.f32 %v598_v28, %v466_v27 }
 0x17e   :  { %v490_v35 = vadd.f32 %v598_v28, %v467_v62  ;;  %v491_v51 = vadd.f32 %v598_v28, %v468_v63  ;;  %v492_v37 = vadd.f32 %v598_v28, %v469_v0  ;;  %v493_v58 = vadd.f32 %v598_v28, %v470_v1 }
 0x17f   :  { %v494_v39 = vadd.f32 %v598_v28, %v471_v2  ;;  %v495_v3 = vadd.f32 %v598_v28, %v472_v4  ;;  %v496_v40 = vadd.f32 %v598_v28, %v473_v6  ;;  %v497_v8 = vadd.f32 %v598_v28, %v474_v7 }
 0x180   :  { %vm498_vm1 = vcmp.gt.f32.partialorder %v482_v29, 0.0  ;;  %vm499_vm2 = vcmp.gt.f32.partialorder %v483_v30, 0.0  ;;  %vm500_vm3 = vcmp.gt.f32.partialorder %v484_v31, 0.0  ;;  %vm501_vm4 = vcmp.gt.f32.partialorder %v485_v32, 0.0 }
 0x181   :  { %vm502_vm5 = vcmp.gt.f32.partialorder %v486_v33, 0.0  ;;  %vm503_vm6 = vcmp.gt.f32.partialorder %v487_v36, 0.0  ;;  %vm504_vm7 = vcmp.gt.f32.partialorder %v488_v34, 0.0  ;;  %vm505_vm8 = vcmp.gt.f32.partialorder %v489_v42, 0.0 }
 0x182   :  { %vm506_vm9 = vcmp.gt.f32.partialorder %v490_v35, 0.0  ;;  %vm507_vm10 = vcmp.gt.f32.partialorder %v491_v51, 0.0  ;;  %vm508_vm11 = vcmp.gt.f32.partialorder %v492_v37, 0.0  ;;  %vm509_vm12 = vcmp.gt.f32.partialorder %v493_v58, 0.0 }
 0x183   :  { %vm511_vm14 = vcmp.gt.f32.partialorder %v495_v3, 0.0  ;;  %vm512_vm15 = vcmp.gt.f32.partialorder %v496_v40, 0.0  ;;  %v514_v9 = vmul.f32 0.2, %v482_v29  ;;  %v515_v10 = vmul.f32 0.2, %v483_v30 }
 0x184   :  { %v516_v41 = vmul.f32 0.2, %v484_v31  ;;  %v517_v44 = vmul.f32 0.2, %v485_v32  ;;  %v518_v45 = vmul.f32 0.2, %v486_v33 }
 0x185   :  { %v519_v46 = vmul.f32 0.2, %v487_v36  ;;  %v520_v47 = vmul.f32 0.2, %v488_v34  ;;  %v521_v48 = vmul.f32 0.2, %v489_v42  ;;  %v530_v50 = vsel %vm498_vm1, %v482_v29, %v514_v9  ;;  %vm1080_vm1 = vmmov %vm1079_vm0 }
 0x186   :  { %v522_v49 = vmul.f32 0.2, %v490_v35  ;;  %v523_v52 = vmul.f32 0.2, %v491_v51  ;;  %v524_v54 = vmul.f32 0.2, %v492_v37  ;;  %v531_v56 = vsel %vm499_vm2, %v483_v30, %v515_v10  ;;  %vm1081_vm2 = vmmov %vm1079_vm0 }
 0x187   :  { %v525_v55 = vmul.f32 0.2, %v493_v58  ;;  %546 = vst.msk [vmem:[%s1076_s4] sm:$0xff] %vm1078_vm13, %v530_v50  ;;  %v526_v57 = vmul.f32 0.2, %v494_v39  ;;  %v532_v38 = vsel %vm500_vm3, %v484_v31, %v516_v41  ;;  %v533_v53 = vsel %vm501_vm4, %v485_v32, %v517_v44  ;;  %vm1082_vm3 = vmmov %vm1079_vm0 }
 0x188   :  { %v527_v60 = vmul.f32 0.2, %v495_v3  ;;  %v528_v61 = vmul.f32 0.2, %v496_v40  ;;  %547 = vst.msk [vmem:[%s1076_s4 + $0x8] sm:$0xff] %vm1079_vm0, %v531_v56  ;;  %v534_v59 = vsel %vm502_vm5, %v486_v33, %v518_v45  ;;  %v535_v5 = vsel %vm503_vm6, %v487_v36, %v519_v46  ;;  %549 = vst.msk [vmem:[%s1076_s4 + $0x18] sm:$0xff] %vm1079_vm0, %v533_v53 }
 0x189   :  { %v529_v43 = vmul.f32 0.2, %v497_v8  ;;  %548 = vst.msk [vmem:[%s1076_s4 + $0x10] sm:$0xff] %vm1080_vm1, %v532_v38  ;;  %v536_v11 = vsel %vm504_vm7, %v488_v34, %v520_v47  ;;  %v537_v12 = vsel %vm505_vm8, %v489_v42, %v521_v48  ;;  %v538_v13 = vsel %vm506_vm9, %v490_v35, %v522_v49  ;;  %vm1084_vm5 = vmmov %vm1079_vm0 }
 0x18a   :  { %v539_v14 = vsel %vm507_vm10, %v491_v51, %v523_v52  ;;  %550 = vst.msk [vmem:[%s1076_s4 + $0x20] sm:$0xff] %vm1081_vm2, %v534_v59  ;;  %v540_v15 = vsel %vm508_vm11, %v492_v37, %v524_v54  ;;  %v541_v16 = vsel %vm509_vm12, %v493_v58, %v525_v55  ;;  %vm1083_vm4 = vcmp.gt.f32.partialorder %v494_v39, 0.0  ;;  %vm1085_vm6 = vmmov %vm1079_vm0 }
 0x18b   :  { %551 = vst.msk [vmem:[%s1076_s4 + $0x28] sm:$0xff] %vm1082_vm3, %v535_v5  ;;  %v542_v17 = vsel %vm1083_vm4, %v494_v39, %v526_v57  ;;  %v543_v18 = vsel %vm511_vm14, %v495_v3, %v527_v60  ;;  %vm1086_vm7 = vmmov %vm1079_vm0  ;;  %v544_v19 = vsel %vm512_vm15, %v496_v40, %v528_v61  ;;  %vm1088_vm9 = vcmp.gt.f32.partialorder %v497_v8, 0.0 }
 0x18c   :  { %552 = vst.msk [vmem:[%s1076_s4 + $0x30] sm:$0xff] %vm1084_vm5, %v536_v11  ;;  %vm1087_vm8 = vmmov %vm1079_vm0  ;;  %v545_v20 = vsel %vm1088_vm9, %v497_v8, %v529_v43 }
 0x18d   :  { %553 = vst.msk [vmem:[%s1076_s4 + $0x38] sm:$0xff] %vm1085_vm6, %v537_v12  ;;  %vm1089_vm10 = vmmov %vm1079_vm0 }
 0x18e   :  { %554 = vst.msk [vmem:[%s1076_s4 + $0x40] sm:$0xff] %vm1086_vm7, %v538_v13  ;;  %vm1090_vm11 = vmmov %vm1079_vm0 }
 0x18f   :  { %555 = vst.msk [vmem:[%s1076_s4 + $0x48] sm:$0xff] %vm1087_vm8, %v539_v14  ;;  %vm1091_vm12 = vmmov %vm1079_vm0 }
 0x190   :  { %556 = vst.msk [vmem:[%s1076_s4 + $0x50] sm:$0xff] %vm1089_vm10, %v540_v15  ;;  %vm1092_vm13 = vmmov %vm1079_vm0 }
 0x191   :  { %557 = vst.msk [vmem:[%s1076_s4 + $0x58] sm:$0xff] %vm1090_vm11, %v541_v16  ;;  %vm1093_vm14 = vmmov %vm1079_vm0 }
 0x192   :  { %558 = vst.msk [vmem:[%s1076_s4 + $0x60] sm:$0xff] %vm1091_vm12, %v542_v17  ;;  %vm1094_vm15 = vmmov %vm1079_vm0 }
 0x193   :  { %559 = vst.msk [vmem:[%s1076_s4 + $0x68] sm:$0xff] %vm1092_vm13, %v543_v18 }
 0x194   :  { %560 = vst.msk [vmem:[%s1076_s4 + $0x70] sm:$0xff] %vm1093_vm14, %v544_v19 }
 0x195   :  { %561 = vst.msk [vmem:[%s1076_s4 + $0x78] sm:$0xff] %vm1094_vm15, %v545_v20 }

// kernel: domain_discriminator_forward.8
= control target key start
LH: loop header
LB: loop body
LE: loop exit
PB: predicated region body
PF: predicated region fallthrough
CT: control target
= control target key end

     0   :  { %vm420_vm0 = vcmask 523264   ;;  %s821_s1 = inlined_call_operand.vmem [shape: bf16[512,64], index: 1, kind: input, shape index: {}]   ;;  %s822_s0 = inlined_call_operand.vmem [shape: bf16[32,512], index: 0, kind: input, shape index: {}]   ;;  %s823_s2 = inlined_call_operand.vmem [shape: f32[1,64], index: 2, kind: input, shape index: {}]   ;;  %s824_s3 = inlined_call_operand.vmem [shape: f32[1,64], index: 3, kind: input, shape index: {}]   ;;  %s825_s4 = inlined_call_operand.vmem [shape: f32[32,64], index: 4, kind: output, shape index: {}]  }
   0x1   :  { %v600_v0 = vld [vmem:[%s821_s1 + $0x40] sm:$0xff]   ;;  %v604_v4 = vld [vmem:[%s821_s1 + $0x48] sm:$0xff]   ;;  %v608_v8 = vld [vmem:[%s821_s1 + $0x50] sm:$0xff]  }
   0x2   :  { %v601_v1 = vld [vmem:[%s821_s1 + $0xc0] sm:$0xff]   ;;  %544 = vmatprep.subr.bf16.mxu0 %v600_v0  ;;  %v605_v5 = vld [vmem:[%s821_s1 + $0xc8] sm:$0xff]   ;;  %v609_v9 = vld [vmem:[%s821_s1 + $0xd0] sm:$0xff]  }
   0x3   :  { %v602_v2 = vld [vmem:[%s821_s1] sm:$0xff]   ;;  %572 = vmatprep.subr.bf16.mxu1 %v601_v1  ;;  %v606_v6 = vld [vmem:[%s821_s1 + $0x8] sm:$0xff]   ;;  %v610_v10 = vld [vmem:[%s821_s1 + $0x10] sm:$0xff]  }
   0x4   :  { %v603_v3 = vld [vmem:[%s821_s1 + $0x80] sm:$0xff]   ;;  %545 = vmatpush3.bf16.msra.mxu0 %v602_v2  ;;  %v607_v7 = vld [vmem:[%s821_s1 + $0x88] sm:$0xff]   ;;  %v611_v11 = vld [vmem:[%s821_s1 + $0x90] sm:$0xff]  }
   0x5   :  { %573 = vmatpush3.bf16.msra.mxu1 %v603_v3  ;;  %546 = vmatprep.subr.bf16.mxu0 %v604_v4  ;;  %v612_v12 = vld [vmem:[%s821_s1 + $0x58] sm:$0xff]   ;;  %v616_v16 = vld [vmem:[%s821_s1 + $0x60] sm:$0xff]   ;;  %v620_v20 = vld [vmem:[%s821_s1 + $0x68] sm:$0xff]  }
   0x6   :  { %574 = vmatprep.subr.bf16.mxu1 %v605_v5  ;;  %v613_v13 = vld [vmem:[%s821_s1 + $0xd8] sm:$0xff]   ;;  %v617_v17 = vld [vmem:[%s821_s1 + $0xe0] sm:$0xff]   ;;  %v621_v21 = vld [vmem:[%s821_s1 + $0xe8] sm:$0xff]  }
   0x7   :  { %v614_v14 = vld [vmem:[%s821_s1 + $0x18] sm:$0xff]   ;;  %v618_v18 = vld [vmem:[%s821_s1 + $0x20] sm:$0xff]   ;;  %v622_v22 = vld [vmem:[%s821_s1 + $0x28] sm:$0xff]  }
   0x8   :  { %547 = vmatpush3.bf16.msra.mxu0 %v606_v6  ;;  %v615_v15 = vld [vmem:[%s821_s1 + $0x98] sm:$0xff]   ;;  %v619_v19 = vld [vmem:[%s821_s1 + $0xa0] sm:$0xff]   ;;  %v623_v23 = vld [vmem:[%s821_s1 + $0xa8] sm:$0xff]  }
   0x9   :  { %575 = vmatpush3.bf16.msra.mxu1 %v607_v7  ;;  %548 = vmatprep.subr.bf16.mxu0 %v608_v8  ;;  %v624_v24 = vld [vmem:[%s821_s1 + $0x70] sm:$0xff]   ;;  %v628_v28 = vld [vmem:[%s821_s1 + $0x78] sm:$0xff]  }
   0xa   :  { %576 = vmatprep.subr.bf16.mxu1 %v609_v9  ;;  %v625_v25 = vld [vmem:[%s821_s1 + $0xf0] sm:$0xff]   ;;  %v629_v29 = vld [vmem:[%s821_s1 + $0xf8] sm:$0xff]  }
   0xb   :  { %v626_v26 = vld [vmem:[%s821_s1 + $0x30] sm:$0xff]   ;;  %v630_v30 = vld [vmem:[%s821_s1 + $0x38] sm:$0xff]  }
   0xc   :  { %549 = vmatpush3.bf16.msra.mxu0 %v610_v10  ;;  %v627_v27 = vld [vmem:[%s821_s1 + $0xb0] sm:$0xff]   ;;  %v631_v31 = vld [vmem:[%s821_s1 + $0xb8] sm:$0xff]  }
   0xd   :  { %577 = vmatpush3.bf16.msra.mxu1 %v611_v11  ;;  %550 = vmatprep.subr.bf16.mxu0 %v612_v12  ;;  %v632_v32 = vld [vmem:[%s822_s0] ss:$16 sps:$4 sm:$0xff]   ;;  %v634_v33 = vld [vmem:[%s822_s0 + $0x4] ss:$16 sps:$4 sm:$0xff]   ;;  %v635_v34 = vld [vmem:[%s822_s0 + $0x8] ss:$16 sps:$4 sm:$0xff]  }
   0xe   :  { %578 = vmatprep.subr.bf16.mxu1 %v613_v13  ;;  %v637_v35 = vld [vmem:[%s822_s0 + $0xc] ss:$16 sps:$4 sm:$0xff]   ;;  %354 = vmatprep.mubr.bf16.mxu0 %v634_v33  ;;  %v638_v36 = vld [vmem:[%s822_s0 + $0x24] ss:$16 sps:$4 sm:$0xff]   ;;  %v642_v38 = vld [vmem:[%s822_s0 + $0x20] ss:$16 sps:$4 sm:$0xff]  }
   0xf   :  { %403 = vmatprep.mubr.bf16.mxu1 %v637_v35  ;;  %v640_v37 = vld [vmem:[%s822_s0 + $0x2c] ss:$16 sps:$4 sm:$0xff]   ;;  %v643_v39 = vld [vmem:[%s822_s0 + $0x28] ss:$16 sps:$4 sm:$0xff]  }
  0x10   :  { %551 = vmatpush3.bf16.msra.mxu0 %v614_v14 }
  0x11   :  { %579 = vmatpush3.bf16.msra.mxu1 %v615_v15  ;;  %552 = vmatprep.subr.bf16.mxu0 %v616_v16 }
  0x12   :  { %580 = vmatprep.subr.bf16.mxu1 %v617_v17 }
  0x14   :  { %553 = vmatpush3.bf16.msra.mxu0 %v618_v18 }
  0x15   :  { %581 = vmatpush3.bf16.msra.mxu1 %v619_v19  ;;  %554 = vmatprep.subr.bf16.mxu0 %v620_v20 }
  0x16   :  { %582 = vmatprep.subr.bf16.mxu1 %v621_v21 }
  0x18   :  { %555 = vmatpush3.bf16.msra.mxu0 %v622_v22 }
  0x19   :  { %583 = vmatpush3.bf16.msra.mxu1 %v623_v23  ;;  %556 = vmatprep.subr.bf16.mxu0 %v624_v24 }
  0x1a   :  { %584 = vmatprep.subr.bf16.mxu1 %v625_v25 }
  0x1c   :  { %557 = vmatpush3.bf16.msra.mxu0 %v626_v26 }
  0x1d   :  { %585 = vmatpush3.bf16.msra.mxu1 %v627_v27  ;;  %558 = vmatprep.subr.bf16.mxu0 %v628_v28 }
  0x1e   :  { %586 = vmatprep.subr.bf16.mxu1 %v629_v29 }
  0x20   :  { %559 = vmatpush3.bf16.msra.mxu0 %v630_v30 }
  0x21   :  { %587 = vmatpush3.bf16.msra.mxu1 %v631_v31 }
  0x23   :  { %355 = vmatmul.mubr.bf16.vlgmr.msra.gmra.mrb[0].mxu0 %v632_v32 }
  0x24   :  { %404 = vmatmul.mubr.bf16.vlgmr.msra.gmra.mrb[0].mxu1 %v635_v34  ;;  %362 = vmatprep.mubr.bf16.mxu0 %v638_v36 }
  0x25   :  { %411 = vmatprep.mubr.bf16.mxu1 %v640_v37 }
  0x2b   :  { %363 = vmatmul.mubr.bf16.gmra.mrb[4].mxu0 %v642_v38 }
  0x2c   :  { %412 = vmatmul.mubr.bf16.gmra.mrb[4].mxu1 %v643_v39 }
  0xf6   :  { %v560_v40 = vpop.f32.mrb[0].mxu0 }
  0xf7   :  { %v588_v41 = vpop.f32.mrb[0].mxu1  ;;  %v561_v42 = vpop.f32.mrb[1].mxu0 }
  0xf8   :  { %v562_v43 = vadd.f32 %v561_v42, %v560_v40  ;;  %v589_v44 = vpop.f32.mrb[1].mxu1  ;;  %v563_v45 = vpop.f32.mrb[2].mxu0 }
  0xf9   :  { %v590_v46 = vadd.f32 %v589_v44, %v588_v41  ;;  %v591_v47 = vpop.f32.mrb[2].mxu1  ;;  %v564_v48 = vpop.f32.mrb[3].mxu0  ;;  %v463_v41 = vlaneseq }
  0xfa   :  { %v565_v49 = vadd.f32 %v564_v48, %v563_v45  ;;  %v592_v50 = vpop.f32.mrb[3].mxu1  ;;  %v543_v48 = vld [vmem:[%s824_s3] ss:$0 sm:$0xff] }
  0xfb   :  { %v406_v51 = vadd.f32 %v590_v46, %v562_v43  ;;  %v593_v52 = vadd.f32 %v592_v50, %v591_v47  ;;  %v464_v42 = vshrl.u32 %v463_v41, 7  ;;  %v458_v43 = vld [vmem:[%s823_s2] sm:$0x1] }
  0xfd   :  { %v409_v53 = vadd.f32 %v593_v52, %v565_v49  ;;  %v421_v55 = vsel %vm420_vm0, %v406_v51, 0.0  ;;  %v465_v44 = vsub.s32 0, %v464_v42 }
  0xfe   :  { %v566_v54 = vpop.f32.mrb[4].mxu0 }
  0xff   :  { %v422_v56 = vsel %vm420_vm0, %v409_v53, 0.0  ;;  %v594_v57 = vpop.f32.mrb[4].mxu1  ;;  %v567_v58 = vpop.f32.mrb[5].mxu0 }
 0x100   :  { %v423_v59 = vadd.f32 %v422_v56, %v421_v55  ;;  %v568_v60 = vadd.f32 %v567_v58, %v566_v54  ;;  %v595_v61 = vpop.f32.mrb[5].mxu1  ;;  %v569_v62 = vpop.f32.mrb[6].mxu0 }
 0x101   :  { %v596_v63 = vadd.f32 %v595_v61, %v594_v57  ;;  %v597_v0 = vpop.f32.mrb[6].mxu1  ;;  %v570_v1 = vpop.f32.mrb[7].mxu0 }
 0x102   :  { %v571_v2 = vadd.f32 %v570_v1, %v569_v62  ;;  %v598_v3 = vpop.f32.mrb[7].mxu1 }
 0x103   :  { %v414_v4 = vadd.f32 %v596_v63, %v568_v60  ;;  %v599_v5 = vadd.f32 %v598_v3, %v597_v0 }
 0x105   :  { %v424_v6 = vsel %vm420_vm0, %v414_v4, 0.0  ;;  %v417_v7 = vadd.f32 %v599_v5, %v571_v2 }
 0x106   :  { %v425_v8 = vadd.f32 %v424_v6, %v423_v59 }
 0x107   :  { %v426_v9 = vsel %vm420_vm0, %v417_v7, 0.0 }
 0x108   :  { %v427_v10 = vadd.f32 %v426_v9, %v425_v8 }
 0x10a   :  { %v428_v11 = vrot.slane %v427_v10, 4 }
 0x10c   :  { %v429_v12 = vadd.f32 %v428_v11, %v427_v10 }
 0x10e   :  { %v430_v13 = vrot.slane %v429_v12, 2 }
 0x110   :  { %v431_v14 = vadd.f32 %v430_v13, %v429_v12 }
 0x112   :  { %v432_v15 = vrot.slane %v431_v14, 1 }
 0x114   :  { %v433_v16 = vadd.f32 %v432_v15, %v431_v14 }
 0x116   :  { %v435_v17 = vmul.f32 0.03125, %v433_v16 }
 0x118   :  { %v436_v18 = vsub.f32 %v406_v51, %v435_v17  ;;  %v437_v19 = vsub.f32 %v409_v53, %v435_v17  ;;  %v438_v20 = vsub.f32 %v414_v4, %v435_v17  ;;  %v439_v21 = vsub.f32 %v417_v7, %v435_v17 }
 0x11a   :  { %v440_v22 = vmul.f32 %v436_v18, %v436_v18  ;;  %v441_v23 = vmul.f32 %v437_v19, %v437_v19  ;;  %v442_v24 = vmul.f32 %v438_v20, %v438_v20  ;;  %v443_v25 = vmul.f32 %v439_v21, %v439_v21 }
 0x11c   :  { %v444_v26 = vsel %vm420_vm0, %v440_v22, 0.0  ;;  %v445_v27 = vsel %vm420_vm0, %v441_v23, 0.0  ;;  %v447_v29 = vsel %vm420_vm0, %v442_v24, 0.0  ;;  %v449_v31 = vsel %vm420_vm0, %v443_v25, 0.0 }
 0x11d   :  { %v446_v28 = vadd.f32 %v445_v27, %v444_v26 }
 0x11f   :  { %v448_v30 = vadd.f32 %v447_v29, %v446_v28 }
 0x121   :  { %v450_v32 = vadd.f32 %v449_v31, %v448_v30 }
 0x123   :  { %v451_v33 = vrot.slane %v450_v32, 4 }
 0x125   :  { %v452_v34 = vadd.f32 %v451_v33, %v450_v32 }
 0x127   :  { %v453_v35 = vrot.slane %v452_v34, 2 }
 0x129   :  { %v454_v36 = vadd.f32 %v453_v35, %v452_v34 }
 0x12b   :  { %v455_v37 = vrot.slane %v454_v36, 1 }
 0x12d   :  { %v456_v38 = vadd.f32 %v455_v37, %v454_v36 }
 0x12f   :  { %v457_v39 = vmul.f32 0.03125, %v456_v38 }
 0x131   :  { %v459_v40 = vadd.f32 1e-05, %v457_v39 }
 0x133   :  { %644 = vrsqrt.f32 %v459_v40 }
 0x13d   :  { %v645_v45 = vpop.eup %644 }
 0x13e   :  { %v461_v46 = vmul.f32 %v645_v45, %v458_v43 }
 0x140   :  { %v466_v47 = vrot.slane %v461_v46, %v465_v44 }
 0x142   :  { %v468_v49 = vmul.f32 %v466_v47, %v436_v18  ;;  %v469_v50 = vmul.f32 %v466_v47, %v437_v19  ;;  %v470_v51 = vmul.f32 %v466_v47, %v438_v20  ;;  %v471_v52 = vmul.f32 %v466_v47, %v439_v21 }
 0x144   :  { %v479_v53 = vadd.f32 %v543_v48, %v468_v49  ;;  %v480_v54 = vadd.f32 %v543_v48, %v469_v50  ;;  %v481_v55 = vadd.f32 %v543_v48, %v470_v51  ;;  %v482_v56 = vadd.f32 %v543_v48, %v471_v52 }
 0x146   :  { %vm483_vm1 = vcmp.gt.f32.partialorder %v479_v53, 0.0  ;;  %vm484_vm2 = vcmp.gt.f32.partialorder %v480_v54, 0.0  ;;  %vm485_vm3 = vcmp.gt.f32.partialorder %v481_v55, 0.0  ;;  %vm486_vm4 = vcmp.gt.f32.partialorder %v482_v56, 0.0 }
 0x147   :  { %v487_v57 = vmul.f32 0.2, %v479_v53  ;;  %v488_v58 = vmul.f32 0.2, %v480_v54  ;;  %v489_v59 = vmul.f32 0.2, %v481_v55 }
 0x148   :  { %v490_v60 = vmul.f32 0.2, %v482_v56 }
 0x149   :  { %v491_v61 = vsel %vm483_vm1, %v479_v53, %v487_v57  ;;  %v492_v62 = vsel %vm484_vm2, %v480_v54, %v488_v58  ;;  %v493_v63 = vsel %vm485_vm3, %v481_v55, %v489_v59 }
 0x14a   :  { %v494_v0 = vsel %vm486_vm4, %v482_v56, %v490_v60  ;;  %495 = vst.msk [vmem:[%s825_s4] sm:$0xff] %vm420_vm0, %v491_v61  ;;  %496 = vst.msk [vmem:[%s825_s4 + $0x8] sm:$0xff] %vm420_vm0, %v492_v62 }
 0x14b   :  { %497 = vst.msk [vmem:[%s825_s4 + $0x10] sm:$0xff] %vm420_vm0, %v493_v63  ;;  %498 = vst.msk [vmem:[%s825_s4 + $0x18] sm:$0xff] %vm420_vm0, %v494_v0 }

// kernel: domain_discriminator_forward.9
= control target key start
LH: loop header
LB: loop body
LE: loop exit
PB: predicated region body
PF: predicated region fallthrough
CT: control target
= control target key end

     0   :  { %vm648_vm0 = vcmask 1041408   ;;  %vm672_vm1 = vcmask 1024   ;;  %s1372_s1 = inlined_call_operand.vmem [shape: bf16[1024,1], index: 1, kind: input, shape index: {}]   ;;  %s1373_s0 = inlined_call_operand.vmem [shape: bf16[2,1024], index: 0, kind: input, shape index: {}]   ;;  %s1374_s2 = inlined_call_operand.vmem [shape: f32[2,1], index: 2, kind: output, shape index: {}]  }
   0x1   :  { %v949_v0 = vld [vmem:[%s1372_s1 + $0x80] sm:$0xff]   ;;  %v950_v12 = vld [vmem:[%s1372_s1 + $0x88] sm:$0xff]   ;;  %v951_v30 = vld [vmem:[%s1372_s1 + $0x90] sm:$0xff]  }
   0x2   :  { %v957_v1 = vld [vmem:[%s1372_s1 + $0xc0] sm:$0xff]   ;;  %v744_v3 = vunpack.c.l.bf16 %v949_v0  ;;  %v745_v7 = vunpack.c.h.bf16 %v949_v0  ;;  %v958_v13 = vld [vmem:[%s1372_s1 + $0xc8] sm:$0xff]   ;;  %v748_v19 = vunpack.c.l.bf16 %v950_v12  ;;  %v749_v25 = vunpack.c.h.bf16 %v950_v12  ;;  %v959_v31 = vld [vmem:[%s1372_s1 + $0xd0] sm:$0xff]  }
   0x3   :  { %v679_v2 = vld [vmem:[%s1372_s1] sm:$0xff]   ;;  %v776_v4 = vunpack.c.l.bf16 %v957_v1  ;;  %v777_v9 = vunpack.c.h.bf16 %v957_v1  ;;  %v934_v15 = vld [vmem:[%s1372_s1 + $0x8] sm:$0xff]   ;;  %v780_v20 = vunpack.c.l.bf16 %v958_v13  ;;  %v781_v26 = vunpack.c.h.bf16 %v958_v13  ;;  %v935_v32 = vld [vmem:[%s1372_s1 + $0x10] sm:$0xff]  }
   0x4   :  { %v680_v5 = vunpack.c.l.bf16 %v679_v2  ;;  %v941_v6 = vld [vmem:[%s1372_s1 + $0x40] sm:$0xff]   ;;  %v681_v10 = vunpack.c.h.bf16 %v679_v2  ;;  %v942_v16 = vld [vmem:[%s1372_s1 + $0x48] sm:$0xff]   ;;  %v684_v22 = vunpack.c.l.bf16 %v934_v15  ;;  %v685_v28 = vunpack.c.h.bf16 %v934_v15  ;;  %v943_v33 = vld [vmem:[%s1372_s1 + $0x50] sm:$0xff]  }
   0x5   :  { %v712_v8 = vunpack.c.l.bf16 %v941_v6  ;;  %v713_v11 = vunpack.c.h.bf16 %v941_v6  ;;  %v1035_v14 = vpack.i.bf16 %v776_v4, %v744_v3  ;;  %v1037_v18 = vpack.i.bf16 %v777_v9, %v745_v7  ;;  %v952_v46 = vld [vmem:[%s1372_s1 + $0x98] sm:$0xff]   ;;  %v953_v62 = vld [vmem:[%s1372_s1 + $0xa0] sm:$0xff]   ;;  %v962_v15 = vld [vmem:[%s1372_s1 + $0xe8] sm:$0xff]  }
   0x6   :  { %v716_v23 = vunpack.c.l.bf16 %v942_v16  ;;  %v1039_v24 = vpack.i.bf16 %v780_v20, %v748_v19  ;;  %v717_v29 = vunpack.c.h.bf16 %v942_v16  ;;  %v1041_v34 = vpack.i.bf16 %v781_v26, %v749_v25  ;;  %v960_v47 = vld [vmem:[%s1372_s1 + $0xd8] sm:$0xff]   ;;  %v961_v63 = vld [vmem:[%s1372_s1 + $0xe0] sm:$0xff]   ;;  %v938_v16 = vld [vmem:[%s1372_s1 + $0x28] sm:$0xff]  }
   0x7   :  { %v998_v17 = vpack.i.bf16 %v712_v8, %v680_v5  ;;  %1036 = vxpose.xlu1.b32.start [1/16] (narrow) %v1035_v14, 8  ;;  %v1000_v21 = vpack.i.bf16 %v713_v11, %v681_v10  ;;  %v752_v35 = vunpack.c.l.bf16 %v951_v30  ;;  %v784_v36 = vunpack.c.l.bf16 %v959_v31  ;;  %v936_v48 = vld [vmem:[%s1372_s1 + $0x18] sm:$0xff]   ;;  %v937_v0 = vld [vmem:[%s1372_s1 + $0x20] sm:$0xff]   ;;  %v954_v14 = vld [vmem:[%s1372_s1 + $0xa8] sm:$0xff]  }
   0x8   :  { %v1002_v27 = vpack.i.bf16 %v716_v23, %v684_v22  ;;  %v1004_v37 = vpack.i.bf16 %v717_v29, %v685_v28  ;;  %v688_v38 = vunpack.c.l.bf16 %v935_v32  ;;  %v720_v39 = vunpack.c.l.bf16 %v943_v33  ;;  %v944_v49 = vld [vmem:[%s1372_s1 + $0x58] sm:$0xff]   ;;  %v945_v1 = vld [vmem:[%s1372_s1 + $0x60] sm:$0xff]  }
   0x9   :  { %999 = vxpose.xlu0.b32.start [1/16] (narrow) %v998_v17, 8  ;;  %v1043_v40 = vpack.i.bf16 %v784_v36, %v752_v35  ;;  %v753_v41 = vunpack.c.h.bf16 %v951_v30  ;;  %v785_v42 = vunpack.c.h.bf16 %v959_v31  ;;  %v689_v44 = vunpack.c.h.bf16 %v935_v32  ;;  %v946_v17 = vld [vmem:[%s1372_s1 + $0x68] sm:$0xff]   ;;  %v955_v30 = vld [vmem:[%s1372_s1 + $0xb0] sm:$0xff]  }
   0xa   :  { %v1006_v43 = vpack.i.bf16 %v720_v39, %v688_v38  ;;  %v721_v45 = vunpack.c.h.bf16 %v943_v33  ;;  %v756_v51 = vunpack.c.l.bf16 %v952_v46  ;;  %v788_v52 = vunpack.c.l.bf16 %v960_v47  ;;  %v963_v31 = vld [vmem:[%s1372_s1 + $0xf0] sm:$0xff]  }
   0xb   :  { %1038 = vxpose.xlu1.b32.cont [2/16] (narrow) %v1037_v18, 8  ;;  %v1045_v50 = vpack.i.bf16 %v785_v42, %v753_v41  ;;  %v692_v54 = vunpack.c.l.bf16 %v936_v48  ;;  %v724_v55 = vunpack.c.l.bf16 %v944_v49  ;;  %v757_v57 = vunpack.c.h.bf16 %v952_v46  ;;  %v939_v32 = vld [vmem:[%s1372_s1 + $0x30] sm:$0xff]   ;;  %v956_v46 = vld [vmem:[%s1372_s1 + $0xb8] sm:$0xff]  }
   0xc   :  { %v1008_v53 = vpack.i.bf16 %v721_v45, %v689_v44  ;;  %v1047_v56 = vpack.i.bf16 %v788_v52, %v756_v51  ;;  %v789_v58 = vunpack.c.h.bf16 %v960_v47  ;;  %v693_v60 = vunpack.c.h.bf16 %v936_v48  ;;  %v947_v33 = vld [vmem:[%s1372_s1 + $0x70] sm:$0xff]   ;;  %v964_v47 = vld [vmem:[%s1372_s1 + $0xf8] sm:$0xff]  }
   0xd   :  { %1001 = vxpose.xlu0.b32.cont [2/16] (narrow) %v1000_v21, 8  ;;  %v1010_v59 = vpack.i.bf16 %v724_v55, %v692_v54  ;;  %v725_v61 = vunpack.c.h.bf16 %v944_v49  ;;  %v760_v3 = vunpack.c.l.bf16 %v953_v62  ;;  %v792_v4 = vunpack.c.l.bf16 %v961_v63  ;;  %v940_v48 = vld [vmem:[%s1372_s1 + $0x38] sm:$0xff]  }
   0xe   :  { %v1049_v2 = vpack.i.bf16 %v789_v58, %v757_v57  ;;  %v696_v6 = vunpack.c.l.bf16 %v937_v0  ;;  %v728_v7 = vunpack.c.l.bf16 %v945_v1  ;;  %v761_v9 = vunpack.c.h.bf16 %v953_v62  ;;  %v948_v49 = vld [vmem:[%s1372_s1 + $0x78] sm:$0xff]   ;;  %v981_v62 = vld [vmem:[%s1372_s1 + $0x180] sm:$0xff]  }
   0xf   :  { %1040 = vxpose.xlu1.b32.cont [3/16] (narrow) %v1039_v24, 8  ;;  %v1012_v5 = vpack.i.bf16 %v725_v61, %v693_v60  ;;  %v1051_v8 = vpack.i.bf16 %v792_v4, %v760_v3  ;;  %v793_v10 = vunpack.c.h.bf16 %v961_v63  ;;  %v697_v12 = vunpack.c.h.bf16 %v937_v0  ;;  %v989_v63 = vld [vmem:[%s1372_s1 + $0x1c0] sm:$0xff]  }
  0x10   :  { %v1014_v11 = vpack.i.bf16 %v728_v7, %v696_v6  ;;  %v729_v13 = vunpack.c.h.bf16 %v945_v1  ;;  %v764_v19 = vunpack.c.l.bf16 %v954_v14  ;;  %v796_v20 = vunpack.c.l.bf16 %v962_v15  ;;  %v965_v0 = vld [vmem:[%s1372_s1 + $0x100] sm:$0xff]  }
  0x11   :  { %1003 = vxpose.xlu0.b32.cont [3/16] (narrow) %v1002_v27, 8  ;;  %v1053_v18 = vpack.i.bf16 %v793_v10, %v761_v9  ;;  %v700_v22 = vunpack.c.l.bf16 %v938_v16  ;;  %v732_v23 = vunpack.c.l.bf16 %v946_v17  ;;  %v765_v25 = vunpack.c.h.bf16 %v954_v14  ;;  %v973_v1 = vld [vmem:[%s1372_s1 + $0x140] sm:$0xff]   ;;  %v982_v14 = vld [vmem:[%s1372_s1 + $0x188] sm:$0xff]  }
  0x12   :  { %v1016_v21 = vpack.i.bf16 %v729_v13, %v697_v12  ;;  %v1055_v24 = vpack.i.bf16 %v796_v20, %v764_v19  ;;  %v797_v26 = vunpack.c.h.bf16 %v962_v15  ;;  %v701_v28 = vunpack.c.h.bf16 %v938_v16  ;;  %v990_v15 = vld [vmem:[%s1372_s1 + $0x1c8] sm:$0xff]  }
  0x13   :  { %1042 = vxpose.xlu1.b32.cont [4/16] (narrow) %v1041_v34, 8  ;;  %v1018_v27 = vpack.i.bf16 %v732_v23, %v700_v22  ;;  %v733_v29 = vunpack.c.h.bf16 %v946_v17  ;;  %v768_v35 = vunpack.c.l.bf16 %v955_v30  ;;  %v800_v36 = vunpack.c.l.bf16 %v963_v31  ;;  %v966_v16 = vld [vmem:[%s1372_s1 + $0x108] sm:$0xff]  }
  0x14   :  { %v1057_v34 = vpack.i.bf16 %v797_v26, %v765_v25  ;;  %v704_v38 = vunpack.c.l.bf16 %v939_v32  ;;  %v736_v39 = vunpack.c.l.bf16 %v947_v33  ;;  %v769_v41 = vunpack.c.h.bf16 %v955_v30  ;;  %v974_v17 = vld [vmem:[%s1372_s1 + $0x148] sm:$0xff]   ;;  %v983_v30 = vld [vmem:[%s1372_s1 + $0x190] sm:$0xff]  }
  0x15   :  { %1005 = vxpose.xlu0.b32.cont [4/16] (narrow) %v1004_v37, 8  ;;  %v1020_v37 = vpack.i.bf16 %v733_v29, %v701_v28  ;;  %v801_v42 = vunpack.c.h.bf16 %v963_v31  ;;  %v705_v44 = vunpack.c.h.bf16 %v939_v32  ;;  %v737_v45 = vunpack.c.h.bf16 %v947_v33  ;;  %v991_v31 = vld [vmem:[%s1372_s1 + $0x1d0] sm:$0xff]  }
  0x16   :  { %v772_v51 = vunpack.c.l.bf16 %v956_v46  ;;  %v804_v52 = vunpack.c.l.bf16 %v964_v47  ;;  %v708_v54 = vunpack.c.l.bf16 %v940_v48  ;;  %v740_v55 = vunpack.c.l.bf16 %v948_v49  ;;  %v967_v32 = vld [vmem:[%s1372_s1 + $0x110] sm:$0xff]  }
  0x17   :  { %1044 = vxpose.xlu1.b32.cont [5/16] (narrow) %v1043_v40, 8  ;;  %v1059_v40 = vpack.i.bf16 %v800_v36, %v768_v35  ;;  %v773_v57 = vunpack.c.h.bf16 %v956_v46  ;;  %v805_v58 = vunpack.c.h.bf16 %v964_v47  ;;  %v709_v60 = vunpack.c.h.bf16 %v940_v48  ;;  %v975_v33 = vld [vmem:[%s1372_s1 + $0x150] sm:$0xff]   ;;  %v984_v46 = vld [vmem:[%s1372_s1 + $0x198] sm:$0xff]  }
  0x18   :  { %v741_v61 = vunpack.c.h.bf16 %v948_v49  ;;  %v872_v3 = vunpack.c.l.bf16 %v981_v62  ;;  %v904_v4 = vunpack.c.l.bf16 %v989_v63  ;;  %v808_v6 = vunpack.c.l.bf16 %v965_v0  ;;  %v992_v47 = vld [vmem:[%s1372_s1 + $0x1d8] sm:$0xff]  }
  0x19   :  { %1007 = vxpose.xlu0.b32.cont [5/16] (narrow) %v1006_v43, 8  ;;  %v1022_v43 = vpack.i.bf16 %v736_v39, %v704_v38  ;;  %v840_v7 = vunpack.c.l.bf16 %v973_v1  ;;  %v905_v9 = vunpack.c.h.bf16 %v989_v63  ;;  %v841_v12 = vunpack.c.h.bf16 %v973_v1  ;;  %v968_v48 = vld [vmem:[%s1372_s1 + $0x118] sm:$0xff]   ;;  %v993_v63 = vld [vmem:[%s1372_s1 + $0x1e0] sm:$0xff]  }
  0x1a   :  { %v1109_v10 = vpack.i.bf16 %v904_v4, %v872_v3  ;;  %v876_v19 = vunpack.c.l.bf16 %v982_v14  ;;  %v908_v20 = vunpack.c.l.bf16 %v990_v15  ;;  %v812_v22 = vunpack.c.l.bf16 %v966_v16  ;;  %v976_v49 = vld [vmem:[%s1372_s1 + $0x158] sm:$0xff]   ;;  %v977_v1 = vld [vmem:[%s1372_s1 + $0x160] sm:$0xff]  }
  0x1b   :  { %1046 = vxpose.xlu1.b32.cont [6/16] (narrow) %v1045_v50, 8  ;;  %v1061_v50 = vpack.i.bf16 %v801_v42, %v769_v41  ;;  %v1072_v13 = vpack.i.bf16 %v840_v7, %v808_v6  ;;  %v844_v23 = vunpack.c.l.bf16 %v974_v17  ;;  %v877_v25 = vunpack.c.h.bf16 %v982_v14  ;;  %v986_v14 = vld [vmem:[%s1372_s1 + $0x1a8] sm:$0xff]  }
  0x1c   :  { %v909_v26 = vunpack.c.h.bf16 %v990_v15  ;;  %v813_v28 = vunpack.c.h.bf16 %v966_v16  ;;  %v845_v29 = vunpack.c.h.bf16 %v974_v17  ;;  %v880_v35 = vunpack.c.l.bf16 %v983_v30  ;;  %v994_v15 = vld [vmem:[%s1372_s1 + $0x1e8] sm:$0xff]  }
  0x1d   :  { %1009 = vxpose.xlu0.b32.cont [6/16] (narrow) %v1008_v53, 8  ;;  %v1024_v53 = vpack.i.bf16 %v737_v45, %v705_v44  ;;  %v912_v36 = vunpack.c.l.bf16 %v991_v31  ;;  %v816_v38 = vunpack.c.l.bf16 %v967_v32  ;;  %v848_v39 = vunpack.c.l.bf16 %v975_v33  ;;  %v970_v16 = vld [vmem:[%s1372_s1 + $0x128] sm:$0xff]  }
  0x1e   :  { %v881_v41 = vunpack.c.h.bf16 %v983_v30  ;;  %v913_v42 = vunpack.c.h.bf16 %v991_v31  ;;  %v817_v44 = vunpack.c.h.bf16 %v967_v32  ;;  %v849_v45 = vunpack.c.h.bf16 %v975_v33  ;;  %v978_v17 = vld [vmem:[%s1372_s1 + $0x168] sm:$0xff]   ;;  %v987_v30 = vld [vmem:[%s1372_s1 + $0x1b0] sm:$0xff]  }
  0x1f   :  { %1048 = vxpose.xlu1.b32.cont [7/16] (narrow) %v1047_v56, 8  ;;  %v1063_v56 = vpack.i.bf16 %v804_v52, %v772_v51  ;;  %v884_v51 = vunpack.c.l.bf16 %v984_v46  ;;  %v916_v52 = vunpack.c.l.bf16 %v992_v47  ;;  %v920_v4 = vunpack.c.l.bf16 %v993_v63  ;;  %v995_v31 = vld [vmem:[%s1372_s1 + $0x1f0] sm:$0xff]  }
  0x20   :  { %v856_v7 = vunpack.c.l.bf16 %v977_v1  ;;  %v971_v32 = vld [vmem:[%s1372_s1 + $0x130] sm:$0xff]  }
  0x21   :  { %1011 = vxpose.xlu0.b32.cont [7/16] (narrow) %v1010_v59, 8  ;;  %v1026_v59 = vpack.i.bf16 %v740_v55, %v708_v54  ;;  %v820_v54 = vunpack.c.l.bf16 %v968_v48  ;;  %v852_v55 = vunpack.c.l.bf16 %v976_v49  ;;  %v979_v33 = vld [vmem:[%s1372_s1 + $0x170] sm:$0xff]  }
  0x23   :  { %1050 = vxpose.xlu1.b32.cont [8/16] (narrow) %v1049_v2, 8  ;;  %v1065_v2 = vpack.i.bf16 %v805_v58, %v773_v57  ;;  %v885_v57 = vunpack.c.h.bf16 %v984_v46  ;;  %v917_v58 = vunpack.c.h.bf16 %v992_v47  ;;  %v988_v46 = vld [vmem:[%s1372_s1 + $0x1b8] sm:$0xff]  }
  0x24   :  { %v996_v47 = vld [vmem:[%s1372_s1 + $0x1f8] sm:$0xff]  }
  0x25   :  { %1013 = vxpose.xlu0.b32.cont [8/16] (narrow) %v1012_v5, 8  ;;  %v1028_v5 = vpack.i.bf16 %v741_v61, %v709_v60  ;;  %v821_v60 = vunpack.c.h.bf16 %v968_v48  ;;  %v853_v61 = vunpack.c.h.bf16 %v976_v49  ;;  %v972_v48 = vld [vmem:[%s1372_s1 + $0x138] sm:$0xff]  }
  0x26   :  { %v980_v49 = vld [vmem:[%s1372_s1 + $0x178] sm:$0xff]  }
  0x27   :  { %1052 = vxpose.xlu1.b32.cont [9/16] (narrow) %v1051_v8, 8  ;;  %v873_v8 = vunpack.c.h.bf16 %v981_v62  ;;  %v985_v62 = vld [vmem:[%s1372_s1 + $0x1a0] sm:$0xff]  }
  0x28   :  { %v888_v3 = vunpack.c.l.bf16 %v985_v62 }
  0x29   :  { %1015 = vxpose.xlu0.b32.cont [9/16] (narrow) %v1014_v11, 8  ;;  %v809_v11 = vunpack.c.h.bf16 %v965_v0  ;;  %v969_v0 = vld [vmem:[%s1372_s1 + $0x120] sm:$0xff]  }
  0x2a   :  { %v824_v6 = vunpack.c.l.bf16 %v969_v0 }
  0x2b   :  { %1054 = vxpose.xlu1.b32.cont [10/16] (narrow) %v1053_v18, 8  ;;  %v1111_v18 = vpack.i.bf16 %v905_v9, %v873_v8  ;;  %v1125_v8 = vpack.i.bf16 %v920_v4, %v888_v3  ;;  %v889_v9 = vunpack.c.h.bf16 %v985_v62 }
  0x2d   :  { %1017 = vxpose.xlu0.b32.cont [10/16] (narrow) %v1016_v21, 8  ;;  %v1074_v21 = vpack.i.bf16 %v841_v12, %v809_v11  ;;  %v1088_v11 = vpack.i.bf16 %v856_v7, %v824_v6  ;;  %v825_v12 = vunpack.c.h.bf16 %v969_v0 }
  0x2f   :  { %1056 = vxpose.xlu1.b32.cont [11/16] (narrow) %v1055_v24, 8  ;;  %v1113_v24 = vpack.i.bf16 %v908_v20, %v876_v19  ;;  %v892_v19 = vunpack.c.l.bf16 %v986_v14  ;;  %v924_v20 = vunpack.c.l.bf16 %v994_v15 }
  0x31   :  { %1019 = vxpose.xlu0.b32.cont [11/16] (narrow) %v1018_v27, 8  ;;  %v1076_v27 = vpack.i.bf16 %v844_v23, %v812_v22  ;;  %v828_v22 = vunpack.c.l.bf16 %v970_v16  ;;  %v860_v23 = vunpack.c.l.bf16 %v978_v17 }
  0x33   :  { %1058 = vxpose.xlu1.b32.cont [12/16] (narrow) %v1057_v34, 8  ;;  %v1115_v34 = vpack.i.bf16 %v909_v26, %v877_v25  ;;  %v893_v25 = vunpack.c.h.bf16 %v986_v14  ;;  %v925_v26 = vunpack.c.h.bf16 %v994_v15 }
  0x35   :  { %1021 = vxpose.xlu0.b32.cont [12/16] (narrow) %v1020_v37, 8  ;;  %v1078_v37 = vpack.i.bf16 %v845_v29, %v813_v28  ;;  %v829_v28 = vunpack.c.h.bf16 %v970_v16  ;;  %v861_v29 = vunpack.c.h.bf16 %v978_v17 }
  0x37   :  { %1060 = vxpose.xlu1.b32.cont [13/16] (narrow) %v1059_v40, 8  ;;  %v1117_v40 = vpack.i.bf16 %v912_v36, %v880_v35  ;;  %v896_v35 = vunpack.c.l.bf16 %v987_v30  ;;  %v928_v36 = vunpack.c.l.bf16 %v995_v31 }
  0x39   :  { %1023 = vxpose.xlu0.b32.cont [13/16] (narrow) %v1022_v43, 8  ;;  %v1080_v43 = vpack.i.bf16 %v848_v39, %v816_v38  ;;  %v832_v38 = vunpack.c.l.bf16 %v971_v32  ;;  %v864_v39 = vunpack.c.l.bf16 %v979_v33 }
  0x3b   :  { %1062 = vxpose.xlu1.b32.cont [14/16] (narrow) %v1061_v50, 8  ;;  %v1119_v50 = vpack.i.bf16 %v913_v42, %v881_v41  ;;  %v897_v41 = vunpack.c.h.bf16 %v987_v30  ;;  %v929_v42 = vunpack.c.h.bf16 %v995_v31 }
  0x3d   :  { %1025 = vxpose.xlu0.b32.cont [14/16] (narrow) %v1024_v53, 8  ;;  %v1082_v53 = vpack.i.bf16 %v849_v45, %v817_v44  ;;  %v833_v44 = vunpack.c.h.bf16 %v971_v32  ;;  %v865_v45 = vunpack.c.h.bf16 %v979_v33 }
  0x3f   :  { %1064 = vxpose.xlu1.b32.cont [15/16] (narrow) %v1063_v56, 8  ;;  %v1121_v56 = vpack.i.bf16 %v916_v52, %v884_v51  ;;  %v900_v51 = vunpack.c.l.bf16 %v988_v46  ;;  %v932_v52 = vunpack.c.l.bf16 %v996_v47 }
  0x41   :  { %1027 = vxpose.xlu0.b32.cont [15/16] (narrow) %v1026_v59, 8  ;;  %v1084_v59 = vpack.i.bf16 %v852_v55, %v820_v54  ;;  %v836_v54 = vunpack.c.l.bf16 %v972_v48  ;;  %v868_v55 = vunpack.c.l.bf16 %v980_v49 }
  0x43   :  { %1066 = vxpose.xlu1.b32.end [16/16] (narrow) %v1065_v2, 8  ;;  %v1123_v2 = vpack.i.bf16 %v917_v58, %v885_v57  ;;  %v901_v57 = vunpack.c.h.bf16 %v988_v46  ;;  %v933_v58 = vunpack.c.h.bf16 %v996_v47 }
  0x45   :  { %1029 = vxpose.xlu0.b32.end [16/16] (narrow) %v1028_v5, 8  ;;  %v1086_v5 = vpack.i.bf16 %v853_v61, %v821_v60  ;;  %v837_v60 = vunpack.c.h.bf16 %v972_v48  ;;  %v869_v61 = vunpack.c.h.bf16 %v980_v49  ;;  %v1139_v62 = vpack.i.bf16 %v933_v58, %v901_v57 }
  0x47   :  { %1110 = vxpose.xlu1.b32.start [1/16] (narrow) %v1109_v10, 8  ;;  %v921_v10 = vunpack.c.h.bf16 %v993_v63  ;;  %v1102_v63 = vpack.i.bf16 %v869_v61, %v837_v60 }
  0x49   :  { %1073 = vxpose.xlu0.b32.start [1/16] (narrow) %v1072_v13, 8  ;;  %v857_v13 = vunpack.c.h.bf16 %v977_v1 }
  0x4b   :  { %1112 = vxpose.xlu1.b32.cont [2/16] (narrow) %v1111_v18, 8  ;;  %v1127_v18 = vpack.i.bf16 %v921_v10, %v889_v9 }
  0x4d   :  { %1075 = vxpose.xlu0.b32.cont [2/16] (narrow) %v1074_v21, 8  ;;  %v1090_v21 = vpack.i.bf16 %v857_v13, %v825_v12 }
  0x4f   :  { %1114 = vxpose.xlu1.b32.cont [3/16] (narrow) %v1113_v24, 8  ;;  %v1129_v24 = vpack.i.bf16 %v924_v20, %v892_v19 }
  0x51   :  { %1077 = vxpose.xlu0.b32.cont [3/16] (narrow) %v1076_v27, 8  ;;  %v1092_v27 = vpack.i.bf16 %v860_v23, %v828_v22 }
  0x53   :  { %1116 = vxpose.xlu1.b32.cont [4/16] (narrow) %v1115_v34, 8  ;;  %v1131_v34 = vpack.i.bf16 %v925_v26, %v893_v25 }
  0x55   :  { %1079 = vxpose.xlu0.b32.cont [4/16] (narrow) %v1078_v37, 8  ;;  %v1094_v37 = vpack.i.bf16 %v861_v29, %v829_v28 }
  0x57   :  { %1118 = vxpose.xlu1.b32.cont [5/16] (narrow) %v1117_v40, 8  ;;  %v1133_v40 = vpack.i.bf16 %v928_v36, %v896_v35 }
  0x59   :  { %1081 = vxpose.xlu0.b32.cont [5/16] (narrow) %v1080_v43, 8  ;;  %v1096_v43 = vpack.i.bf16 %v864_v39, %v832_v38 }
  0x5b   :  { %1120 = vxpose.xlu1.b32.cont [6/16] (narrow) %v1119_v50, 8  ;;  %v1135_v50 = vpack.i.bf16 %v929_v42, %v897_v41 }
  0x5d   :  { %1083 = vxpose.xlu0.b32.cont [6/16] (narrow) %v1082_v53, 8  ;;  %v1098_v53 = vpack.i.bf16 %v865_v45, %v833_v44 }
  0x5f   :  { %1122 = vxpose.xlu1.b32.cont [7/16] (narrow) %v1121_v56, 8  ;;  %v1137_v56 = vpack.i.bf16 %v932_v52, %v900_v51 }
  0x61   :  { %1085 = vxpose.xlu0.b32.cont [7/16] (narrow) %v1084_v59, 8  ;;  %v1100_v59 = vpack.i.bf16 %v868_v55, %v836_v54 }
  0x63   :  { %1124 = vxpose.xlu1.b32.cont [8/16] (narrow) %v1123_v2, 8  ;;  %v526_v2 = vlaneseq }
  0x65   :  { %1087 = vxpose.xlu0.b32.cont [8/16] (narrow) %v1086_v5, 8  ;;  %v527_v3 = vshrl.u32 %v526_v2, 7  ;;  %v1150_v5 = vmov 1983009808  }
  0x66   :  { %v569_v6 = vunpack.c.l.s4 %v1150_v5 }
  0x67   :  { %1126 = vxpose.xlu1.b32.cont [9/16] (narrow) %v1125_v8, 8  ;;  %v528_v4 = vsub.s32 0, %v527_v3 }
  0x69   :  { %1089 = vxpose.xlu0.b32.cont [9/16] (narrow) %v1088_v11, 8  ;;  %v570_v11 = vunpack.c.0.s8 %v569_v6 }
  0x6b   :  { %1128 = vxpose.xlu1.b32.cont [10/16] (narrow) %v1127_v18, 8  ;;  %v573_v16 = vsub.s32 %v570_v11, %v527_v3 }
  0x6d   :  { %1091 = vxpose.xlu0.b32.cont [10/16] (narrow) %v1090_v21, 8  ;;  %v11_v21 = vld [vmem:[%s1373_s0] sm:$0xff] }
  0x6e   :  { %v140_v23 = vunpack.c.l.bf16 %v11_v21  ;;  %v141_v46 = vunpack.c.h.bf16 %v11_v21 }
  0x6f   :  { %1130 = vxpose.xlu1.b32.cont [11/16] (narrow) %v1129_v24, 8 }
  0x71   :  { %1093 = vxpose.xlu0.b32.cont [11/16] (narrow) %v1092_v27, 8 }
  0x73   :  { %1132 = vxpose.xlu1.b32.cont [12/16] (narrow) %v1131_v34, 8 }
  0x75   :  { %1095 = vxpose.xlu0.b32.cont [12/16] (narrow) %v1094_v37, 8 }
  0x77   :  { %1134 = vxpose.xlu1.b32.cont [13/16] (narrow) %v1133_v40, 8 }
  0x79   :  { %1097 = vxpose.xlu0.b32.cont [13/16] (narrow) %v1096_v43, 8 }
  0x7b   :  { %1136 = vxpose.xlu1.b32.cont [14/16] (narrow) %v1135_v50, 8 }
  0x7d   :  { %1099 = vxpose.xlu0.b32.cont [14/16] (narrow) %v1098_v53, 8 }
  0x7f   :  { %1138 = vxpose.xlu1.b32.cont [15/16] (narrow) %v1137_v56, 8 }
  0x81   :  { %1101 = vxpose.xlu0.b32.cont [15/16] (narrow) %v1100_v59, 8 }
  0x83   :  { %1140 = vxpose.xlu1.b32.end [16/16] (narrow) %v1139_v62, 8 }
  0x85   :  { %1103 = vxpose.xlu0.b32.end [16/16] (narrow) %v1102_v63, 8 }
  0x87   :  { %v1067_v0 = vpop.trf.xlu1 }
  0x88   :  { %v1071_v7 = vunpack.i.h.bf16 %v1067_v0  ;;  %v1068_v8 = vunpack.i.l.bf16 %v1067_v0 }
  0x89   :  { %v1030_v1 = vpop.trf.xlu0 }
  0x8a   :  { %v1034_v9 = vunpack.i.h.bf16 %v1030_v1  ;;  %v1031_v10 = vunpack.i.l.bf16 %v1030_v1  ;;  %v541_v12 = vrot.slane %v1071_v7, %v528_v4  ;;  %v537_v13 = vrot.slane %v1068_v8, %v528_v4 }
  0x8c   :  { %v533_v14 = vrot.slane %v1034_v9, %v528_v4  ;;  %v529_v15 = vrot.slane %v1031_v10, %v528_v4  ;;  %v567_v17 = vcombine.low %v537_v13, %v541_v12 }
  0x8e   :  { %v566_v18 = vcombine.low %v529_v15, %v533_v14  ;;  %v581_v19 = vrot.slane %v567_v17, %v573_v16 }
  0x90   :  { %v574_v20 = vrot.slane %v566_v18, %v573_v16 }
  0x92   :  { %v582_v22 = vcombine.low %v574_v20, %v581_v19 }
  0x94   :  { %v602_v24 = vmul.f32 %v582_v22, %v140_v23 }
  0x96   :  { %v613_v25 = vrot.slane %v602_v24, %v573_v16  ;;  %v606_v26 = vcombine.high %v602_v24, %v602_v24 }
  0x98   :  { %v621_v28 = vcombine.high %v613_v25, %v613_v25  ;;  %v620_v36 = vrot.slane %v606_v26, %v573_v16  ;;  %v649_v39 = vsel %vm648_vm0, %v613_v25, 0.0 }
  0x9a   :  { %v650_v40 = vsel %vm648_vm0, %v621_v28, 0.0  ;;  %v622_v47 = vcombine.high %v620_v36, %v620_v36  ;;  %v652_v48 = vsel %vm648_vm0, %v620_v36, 0.0 }
  0x9b   :  { %v651_v44 = vadd.f32 %v650_v40, %v649_v39 }
  0x9c   :  { %v654_v52 = vsel %vm648_vm0, %v622_v47, 0.0 }
  0x9d   :  { %v653_v50 = vadd.f32 %v652_v48, %v651_v44 }
  0x9f   :  { %v655_v55 = vadd.f32 %v654_v52, %v653_v50 }
  0xc7   :  { %v1141_v27 = vpop.trf.xlu1 }
  0xc8   :  { %v1145_v29 = vunpack.i.h.bf16 %v1141_v27  ;;  %v1142_v30 = vunpack.i.l.bf16 %v1141_v27 }
  0xc9   :  { %v1104_v31 = vpop.trf.xlu0 }
  0xca   :  { %v1108_v32 = vunpack.i.h.bf16 %v1104_v31  ;;  %v1105_v33 = vunpack.i.l.bf16 %v1104_v31  ;;  %v557_v34 = vrot.slane %v1145_v29, %v528_v4  ;;  %v553_v35 = vrot.slane %v1142_v30, %v528_v4 }
  0xcc   :  { %v549_v37 = vrot.slane %v1108_v32, %v528_v4  ;;  %v545_v38 = vrot.slane %v1105_v33, %v528_v4  ;;  %v584_v41 = vcombine.low %v553_v35, %v557_v34 }
  0xce   :  { %v583_v42 = vcombine.low %v545_v38, %v549_v37  ;;  %v598_v43 = vrot.slane %v584_v41, %v573_v16 }
  0xd0   :  { %v591_v45 = vrot.slane %v583_v42, %v573_v16 }
  0xd2   :  { %v599_v49 = vcombine.low %v591_v45, %v598_v43 }
  0xd4   :  { %v603_v51 = vmul.f32 %v599_v49, %v141_v46 }
  0xd6   :  { %v623_v53 = vcombine.high %v603_v51, %v603_v51  ;;  %v630_v54 = vrot.slane %v603_v51, %v573_v16 }
  0xd8   :  { %v637_v56 = vrot.slane %v623_v53, %v573_v16  ;;  %v638_v57 = vcombine.high %v630_v54, %v630_v54  ;;  %v656_v58 = vsel %vm648_vm0, %v630_v54, 0.0 }
  0xd9   :  { %v657_v59 = vadd.f32 %v656_v58, %v655_v55 }
  0xda   :  { %v639_v60 = vcombine.high %v637_v56, %v637_v56  ;;  %v658_v61 = vsel %vm648_vm0, %v638_v57, 0.0  ;;  %v660_v63 = vsel %vm648_vm0, %v637_v56, 0.0 }
  0xdb   :  { %v659_v62 = vadd.f32 %v658_v61, %v657_v59 }
  0xdc   :  { %v662_v1 = vsel %vm648_vm0, %v639_v60, 0.0 }
  0xdd   :  { %v661_v0 = vadd.f32 %v660_v63, %v659_v62 }
  0xdf   :  { %v663_v2 = vadd.f32 %v662_v1, %v661_v0 }
  0xe1   :  { %664 = vadd.xlane.f32.xlu0 %v663_v2 }
 0x16e   :  { %v665_v3 = vpop.xlane.xlu0 %664 }
 0x16f   :  { %v666_v4 = vsub.f32 0.0, %v665_v3 }
 0x171   :  { %v667_v5 = vmul.f32 1.442695, %v666_v4 }
 0x173   :  { %1146 = vpow2.f32 %v667_v5 }
 0x17d   :  { %v1147_v6 = vpop.eup %1146 }
 0x17e   :  { %v669_v7 = vadd.f32 1.0, %v1147_v6 }
 0x180   :  { %1148 = vrcp.f32 %v669_v7 }
 0x18a   :  { %v1149_v8 = vpop.eup %1148 }
 0x18b   :  { %673 = vst.msk [vmem:[%s1374_s2] sm:$0x3] %vm672_vm1, %v1149_v8 }

</bundles_post_ra>
